<compile_context>
chip_gen: v7x
topology: tpu7x:2x2x1
jax: 0.10.0
libtpu: 0.0.40
codegen_flags: <defaults>
</compile_context>

<pallas_src>
import functools

import jax
import jax.numpy as jnp
import numpy as np
from jax import lax
from jax.experimental import pallas as pl
from jax.experimental.pallas import tpu as pltpu

_VMEM_LIMIT = 32 * 1024 * 1024  # explicit scoped-VMEM budget, safe on v5e/v6e/v7x


# -----------------------------------------------------------------------------
# Kernel 0: packed input projection  xw_p = [feat @ W1 | feat_a @ W1]   (bf16)
# -----------------------------------------------------------------------------
def _project_kernel(feat_ref, feat_a_ref, w1_ref, xw_ref):
    w1 = w1_ref[...]
    xw = jnp.dot(feat_ref[...], w1, preferred_element_type=jnp.float32)
    xwa = jnp.dot(feat_a_ref[...], w1, preferred_element_type=jnp.float32)
    # single lane-dense (block_m, 2*F_out) store instead of two masked half-stores
    xw_ref[...] = jnp.concatenate([xw, xwa], axis=1).astype(xw_ref.dtype)


# -----------------------------------------------------------------------------
# Kernel 1: first graph aggregation  z_p = adj @ xw_p   (packed columns: z | z_a)
#   epilogue at last k-step also emits relu(z_p) in bf16 (readout RHS) and
#   zw2 = z @ W2 in bf16 (RHS for the second adj pass).
# -----------------------------------------------------------------------------
def _gcn1_kernel(adj_ref, xw_ref, w2_ref, zp_ref, ep_ref, zw2_ref):
    k = pl.program_id(1)

    @pl.when(k == 0)
    def _():
        zp_ref[...] = jnp.zeros_like(zp_ref)

    zp_ref[...] += jnp.dot(adj_ref[...], xw_ref[...],
                           preferred_element_type=jnp.float32)

    @pl.when(k == pl.num_programs(1) - 1)
    def _():
        f_out = w2_ref.shape[0]
        zp = zp_ref[...]
        ep_ref[...] = jnp.maximum(zp, 0.0).astype(ep_ref.dtype)
        zw2_ref[...] = jnp.dot(zp[:, :f_out], w2_ref[...],
                               preferred_element_type=jnp.float32
                               ).astype(zw2_ref.dtype)


# -----------------------------------------------------------------------------
# Kernel 2: h = adj @ (z @ W2),  vsum = mask @ [relu(z) | relu(z_a)]
#   epilogue at last k-step: AvgReadout (scale by 1/deg, F.normalize, sigmoid)
#   and the Bilinear discriminator logits (ret | ret_a packed into 4 columns).
# -----------------------------------------------------------------------------
def _gcn2_kernel(adj_ref, mask_ref, zw2_ref, ep_ref, zrow_ref,
                 invdeg_ref, wd_ref, bd_ref,
                 h_ref, logits_ref, vsum_acc):
    k = pl.program_id(1)

    @pl.when(k == 0)
    def _():
        h_ref[...] = jnp.zeros_like(h_ref)
        vsum_acc[...] = jnp.zeros_like(vsum_acc)

    h_ref[...] += jnp.dot(adj_ref[...], zw2_ref[...],
                          preferred_element_type=jnp.float32)
    vsum_acc[...] += jnp.dot(mask_ref[...], ep_ref[...],
                             preferred_element_type=jnp.float32)

    @pl.when(k == pl.num_programs(1) - 1)
    def _():
        f_out = wd_ref.shape[0]

        # AvgReadout: (mask @ emb) / row_sum  ->  F.normalize(p=2, dim=1) -> sigmoid
        ge = vsum_acc[...] * invdeg_ref[...]                # (bm, 2F) * (bm, 1)
        gx, ga = ge[:, :f_out], ge[:, f_out:]
        gx = gx * lax.rsqrt(jnp.maximum(jnp.sum(gx * gx, axis=1, keepdims=True), 1e-24))
        ga = ga * lax.rsqrt(jnp.maximum(jnp.sum(ga * ga, axis=1, keepdims=True), 1e-24))
        g = 1.0 / (1.0 + jnp.exp(-gx))
        g_a = 1.0 / (1.0 + jnp.exp(-ga))

        # Discriminator (nn.Bilinear(n_h, n_h, 1)): sc = sum((x @ Wd) * c, -1) + b
        zrow = zrow_ref[...]
        emb = jnp.maximum(zrow[:, :f_out], 0.0)
        emb_a = jnp.maximum(zrow[:, f_out:], 0.0)
        wd = wd_ref[...]
        u = jnp.dot(emb, wd, preferred_element_type=jnp.float32)
        u_a = jnp.dot(emb_a, wd, preferred_element_type=jnp.float32)
        bd = bd_ref[0, 0]
        logits_ref[:, 0:1] = jnp.sum(u * g, axis=1, keepdims=True) + bd       # ret[:,0]
        logits_ref[:, 1:2] = jnp.sum(u_a * g, axis=1, keepdims=True) + bd     # ret[:,1]
        logits_ref[:, 2:3] = jnp.sum(u_a * g_a, axis=1, keepdims=True) + bd   # ret_a[:,0]
        logits_ref[:, 3:4] = jnp.sum(u * g_a, axis=1, keepdims=True) + bd     # ret_a[:,1]


# -----------------------------------------------------------------------------
# Wrapper
# -----------------------------------------------------------------------------
def encoder_sparse_forward(feat, feat_a, adj, graph_neigh,
                           w1, w2, disc_w, disc_b,
                           *, block_m=128, block_k=128):
    n, f_in = feat.shape
    f_out = w1.shape[1]
    block_m = min(block_m, n)
    block_k = min(block_k, n)
    assert n % block_m == 0 and n % block_k == 0, "pad N to a multiple of the block size"
    f32, bf16 = jnp.float32, jnp.bfloat16

    # MXU operands in bf16 (the binary graph_neigh is exact in bf16); in a training
    # loop these N x N casts should be hoisted/cached outside the step function.
    adj_bf = adj.astype(bf16)
    mask_bf = graph_neigh.astype(bf16)
    # Precomputed degree vector (removes the in-kernel XLU reduce and the
    # all-columns dependency); clamped so zero-degree rows don't produce inf/NaN.
    inv_deg = (1.0 / jnp.maximum(
        jnp.sum(graph_neigh.astype(f32), axis=1, keepdims=True), 1e-12)).astype(f32)

    grid_rows = n // block_m
    grid_k = n // block_k
    cp_1d = pltpu.CompilerParams(dimension_semantics=("parallel",),
                                 vmem_limit_bytes=_VMEM_LIMIT)
    cp_2d = pltpu.CompilerParams(dimension_semantics=("parallel", "arbitrary"),
                                 vmem_limit_bytes=_VMEM_LIMIT)

    # --- kernel 0: packed projection ---------------------------------------
    xw_p = pl.pallas_call(
        _project_kernel,
        out_shape=jax.ShapeDtypeStruct((n, 2 * f_out), bf16),
        grid=(grid_rows,),
        in_specs=[pl.BlockSpec((block_m, f_in), lambda i: (i, 0)),
                  pl.BlockSpec((block_m, f_in), lambda i: (i, 0)),
                  pl.BlockSpec((f_in, f_out), lambda i: (0, 0))],
        out_specs=pl.BlockSpec((block_m, 2 * f_out), lambda i: (i, 0)),
        compiler_params=cp_1d,
    )(feat.astype(bf16), feat_a.astype(bf16), w1.astype(bf16))

    # --- kernel 1: z_p = adj @ xw_p  (+ relu, + z @ W2) ---------------------
    z_p, e_p, zw2 = pl.pallas_call(
        _gcn1_kernel,
        out_shape=(jax.ShapeDtypeStruct((n, 2 * f_out), f32),
                   jax.ShapeDtypeStruct((n, 2 * f_out), bf16),
                   jax.ShapeDtypeStruct((n, f_in), bf16)),
        grid=(grid_rows, grid_k),
        in_specs=[pl.BlockSpec((block_m, block_k), lambda i, k: (i, k)),
                  pl.BlockSpec((block_k, 2 * f_out), lambda i, k: (k, 0)),
                  pl.BlockSpec((f_out, f_in), lambda i, k: (0, 0))],
        out_specs=(pl.BlockSpec((block_m, 2 * f_out), lambda i, k: (i, 0)),
                   pl.BlockSpec((block_m, 2 * f_out), lambda i, k: (i, 0)),
                   pl.BlockSpec((block_m, f_in), lambda i, k: (i, 0))),
        compiler_params=cp_2d,
    )(adj_bf, xw_p, w2.astype(f32))

    # --- kernel 2: second adj pass + readout/discriminator epilogue ---------
    # TODO(synk): if adj == diag(1/deg) @ graph_neigh (GraphST row-normalized case),
    # the adj and mask streams below can be fused into a single N x N pass.
    h, logits = pl.pallas_call(
        _gcn2_kernel,
        out_shape=(jax.ShapeDtypeStruct((n, f_in), f32),
                   jax.ShapeDtypeStruct((n, 4), f32)),
        grid=(grid_rows, grid_k),
        in_specs=[pl.BlockSpec((block_m, block_k), lambda i, k: (i, k)),    # adj
                  pl.BlockSpec((block_m, block_k), lambda i, k: (i, k)),    # mask
                  pl.BlockSpec((block_k, f_in), lambda i, k: (k, 0)),       # z @ W2
                  pl.BlockSpec((block_k, 2 * f_out), lambda i, k: (k, 0)),  # relu(z_p)
                  pl.BlockSpec((block_m, 2 * f_out), lambda i, k: (i, 0)),  # z_p rows
                  pl.BlockSpec((block_m, 1), lambda i, k: (i, 0)),          # 1/deg
                  pl.BlockSpec((f_out, f_out), lambda i, k: (0, 0)),        # disc W
                  pl.BlockSpec(memory_space=pltpu.MemorySpace.SMEM)],       # disc b
        out_specs=(pl.BlockSpec((block_m, f_in), lambda i, k: (i, 0)),
                   pl.BlockSpec((block_m, 4), lambda i, k: (i, 0))),
        scratch_shapes=[pltpu.VMEM((block_m, 2 * f_out), f32)],
        compiler_params=cp_2d,
    )(adj_bf, mask_bf, zw2, e_p, z_p, inv_deg,
      disc_w.astype(f32), disc_b.astype(f32))

    hiden_emb = z_p[:, :f_out]
    ret = logits[:, 0:2]
    ret_a = logits[:, 2:4]
    return hiden_emb, h, ret, ret_a


# -----------------------------------------------------------------------------
# Reference (pure JAX, float32) and test harness
# -----------------------------------------------------------------------------
def _xavier_uniform(key, shape, fan_in, fan_out):
    bound = float(np.sqrt(6.0 / (fan_in + fan_out)))
    return jax.random.uniform(key, shape, jnp.float32, -bound, bound)


def _reference(feat, feat_a, adj, mask, w1, w2, wd, b):
    z = adj @ (feat @ w1)
    h = adj @ (z @ w2)
    emb = jnp.maximum(z, 0.0)
    emb_a = jnp.maximum(adj @ (feat_a @ w1), 0.0)

    def readout(e):
        ge = (mask @ e) / jnp.sum(mask, axis=1, keepdims=True)
        ge = ge / jnp.maximum(jnp.linalg.norm(ge, axis=1, keepdims=True), 1e-12)
        return 1.0 / (1.0 + jnp.exp(-ge))

    g, g_a = readout(emb), readout(emb_a)
    bil = lambda x, c: jnp.sum((x @ wd) * c, axis=1, keepdims=True) + b
    ret = jnp.concatenate([bil(emb, g), bil(emb_a, g)], axis=1)
    ret_a = jnp.concatenate([bil(emb_a, g_a), bil(emb, g_a)], axis=1)
    return z, h, ret, ret_a


if __name__ == "__main__":
    key = jax.random.PRNGKey(0)
    N, F_IN, F_OUT = 256, 256, 64

    k_feat, k_feata, k_adj, k_w1, k_w2, k_wd = jax.random.split(key, 6)

    feat = jax.random.normal(k_feat, (N, F_IN), jnp.float32)
    feat_a = jax.random.normal(k_feata, (N, F_IN), jnp.float32)

    # Symmetric binary graph with self loops; adj row-normalized, mask binary.
    rand = jax.random.uniform(k_adj, (N, N))
    binary = ((rand + rand.T) > 1.4).astype(jnp.float32)
    binary = jnp.clip(binary + jnp.eye(N, dtype=jnp.float32), 0.0, 1.0)
    graph_neigh = binary
    adj = binary / jnp.sum(binary, axis=1, keepdims=True)

    # Parameters (xavier_uniform like reset_parameters / Discriminator init).
    w1 = _xavier_uniform(k_w1, (F_IN, F_OUT), F_IN, F_OUT)
    w2 = _xavier_uniform(k_w2, (F_OUT, F_IN), F_OUT, F_IN)
    disc_w = _xavier_uniform(k_wd, (F_OUT, F_OUT), F_OUT * F_OUT, F_OUT)
    disc_b = jnp.zeros((1, 1), jnp.float32)   # nn.Bilinear bias filled with 0.0

    fwd = jax.jit(functools.partial(encoder_sparse_forward,
                                    block_m=128, block_k=128))
    outs = jax.block_until_ready(
        fwd(feat, feat_a, adj, graph_neigh, w1, w2, disc_w, disc_b))

    refs = _reference(feat, feat_a, adj, graph_neigh, w1, w2, disc_w, 0.0)
    # bf16 MXU operands with f32 accumulation -> tolerance appropriate for bf16.
    for o, r in zip(outs, refs):
        np.testing.assert_allclose(np.asarray(o), np.asarray(r),
                                   rtol=2e-2, atol=2e-2)

    print("KERNEL_OK")
</pallas_src>

<mosaic_0001>
module attributes {stable_mosaic.version = 11 : i64} {
  func.func @_project_kernel(%arg0: i32, %arg1: memref<128x256xbf16, #tpu.memory_space<vmem>>, %arg2: memref<128x256xbf16, #tpu.memory_space<vmem>>, %arg3: memref<256x64xbf16, #tpu.memory_space<vmem>>, %arg4: memref<128x128xbf16, #tpu.memory_space<vmem>>) attributes {dimension_semantics = [#tpu.dimension_semantics<parallel>], iteration_bounds = array<i64: 2>, scalar_prefetch = 0 : i64, scratch_operands = 0 : i64, tpu.core_type = #tpu.core_type<tc>, window_params = [{transform_indices = @transform_0, window_bounds = array<i64: 128, 256>}, {transform_indices = @transform_1, window_bounds = array<i64: 128, 256>}, {pipeline_mode = #tpu.pipeline_mode<synchronous>, transform_indices = @transform_2, window_bounds = array<i64: 256, 64>}, {transform_indices = @transform_3, window_bounds = array<i64: 128, 128>}]} {
    %c0 = arith.constant 0 : index
    %c0_0 = arith.constant 0 : index
    %0 = vector.load %arg3[%c0, %c0_0] : memref<256x64xbf16, #tpu.memory_space<vmem>>, vector<256x64xbf16>
    %c0_1 = arith.constant 0 : index
    %c0_2 = arith.constant 0 : index
    %1 = vector.load %arg1[%c0_1, %c0_2] : memref<128x256xbf16, #tpu.memory_space<vmem>>, vector<128x256xbf16>
    %cst = arith.constant dense<0.000000e+00> : vector<128x64xf32>
    %2 = tpu.matmul %1, %0, %cst {dimension_numbers = #tpu.dot_dimension_numbers<[1], [0], [0], [1], [0, 0, 1, 1], [], []>} : vector<128x256xbf16>, vector<256x64xbf16>, vector<128x64xf32> -> vector<128x64xf32>
    %c0_3 = arith.constant 0 : index
    %c0_4 = arith.constant 0 : index
    %3 = vector.load %arg2[%c0_3, %c0_4] : memref<128x256xbf16, #tpu.memory_space<vmem>>, vector<128x256xbf16>
    %cst_5 = arith.constant dense<0.000000e+00> : vector<128x64xf32>
    %4 = tpu.matmul %3, %0, %cst_5 {dimension_numbers = #tpu.dot_dimension_numbers<[1], [0], [0], [1], [0, 0, 1, 1], [], []>} : vector<128x256xbf16>, vector<256x64xbf16>, vector<128x64xf32> -> vector<128x64xf32>
    %5 = tpu.concatenate %2, %4 in 1 : vector<128x64xf32>, vector<128x64xf32> -> vector<128x128xf32>
    %6 = arith.truncf %5 : vector<128x128xf32> to vector<128x128xbf16>
    %c0_6 = arith.constant 0 : index
    %c0_7 = arith.constant 0 : index
    %7 = vector.load %arg4[%c0_6, %c0_7] : memref<128x128xbf16, #tpu.memory_space<vmem>>, vector<128x128xbf16>
    tpu.vector_store %arg4[%c0_6, %c0_7], %6 {strides = array<i32>} : memref<128x128xbf16, #tpu.memory_space<vmem>>, vector<128x128xbf16>,
    return
  }
  func.func @transform_0(%arg0: i32) -> (i32, i32) {
    %c0_i32 = arith.constant 0 : i32
    %c0_i32_0 = arith.constant 0 : i32
    return %arg0, %c0_i32 : i32, i32
  }
  func.func @transform_1(%arg0: i32) -> (i32, i32) {
    %c0_i32 = arith.constant 0 : i32
    %c0_i32_0 = arith.constant 0 : i32
    return %arg0, %c0_i32 : i32, i32
  }
  func.func @transform_2(%arg0: i32) -> (i32, i32) {
    %c0_i32 = arith.constant 0 : i32
    %c0_i32_0 = arith.constant 0 : i32
    %c0_i32_1 = arith.constant 0 : i32
    return %c0_i32, %c0_i32_0 : i32, i32
  }
  func.func @transform_3(%arg0: i32) -> (i32, i32) {
    %c0_i32 = arith.constant 0 : i32
    %c0_i32_0 = arith.constant 0 : i32
    return %arg0, %c0_i32 : i32, i32
  }
}

module attributes {stable_mosaic.version = 11 : i64} {
  func.func @_gcn1_kernel(%arg0: i32, %arg1: i32, %arg2: memref<128x128xbf16, #tpu.memory_space<vmem>>, %arg3: memref<128x128xbf16, #tpu.memory_space<vmem>>, %arg4: memref<64x256xf32, #tpu.memory_space<vmem>>, %arg5: memref<128x128xf32, #tpu.memory_space<vmem>>, %arg6: memref<128x128xbf16, #tpu.memory_space<vmem>>, %arg7: memref<128x256xbf16, #tpu.memory_space<vmem>>) attributes {dimension_semantics = [#tpu.dimension_semantics<parallel>, #tpu.dimension_semantics<arbitrary>], iteration_bounds = array<i64: 2, 2>, scalar_prefetch = 0 : i64, scratch_operands = 0 : i64, tpu.core_type = #tpu.core_type<tc>, window_params = [{transform_indices = @transform_0, window_bounds = array<i64: 128, 128>}, {transform_indices = @transform_1, window_bounds = array<i64: 128, 128>}, {pipeline_mode = #tpu.pipeline_mode<synchronous>, transform_indices = @transform_2, window_bounds = array<i64: 64, 256>}, {transform_indices = @transform_3, window_bounds = array<i64: 128, 128>}, {transform_indices = @transform_4, window_bounds = array<i64: 128, 128>}, {transform_indices = @transform_5, window_bounds = array<i64: 128, 256>}]} {
    %c0_i32 = arith.constant 0 : i32
    %0 = arith.cmpi eq, %arg1, %c0_i32 : i32
    %1 = arith.extui %0 : i1 to i32
    %c0_i32_0 = arith.constant 0 : i32
    %2 = arith.cmpi ne, %1, %c0_i32_0 : i32
    scf.if %2 {
      %cst_9 = arith.constant 0.000000e+00 : f32
      %12 = vector.broadcast %cst_9 : f32 to vector<128x128xf32>
      %c0_10 = arith.constant 0 : index
      %c0_11 = arith.constant 0 : index
      %13 = vector.load %arg5[%c0_10, %c0_11] : memref<128x128xf32, #tpu.memory_space<vmem>>, vector<128x128xf32>
      tpu.vector_store %arg5[%c0_10, %c0_11], %12 {strides = array<i32>} : memref<128x128xf32, #tpu.memory_space<vmem>>, vector<128x128xf32>,
    } else {
    }
    %c0 = arith.constant 0 : index
    %c0_1 = arith.constant 0 : index
    %3 = vector.load %arg5[%c0, %c0_1] : memref<128x128xf32, #tpu.memory_space<vmem>>, vector<128x128xf32>
    %c0_2 = arith.constant 0 : index
    %c0_3 = arith.constant 0 : index
    %4 = vector.load %arg2[%c0_2, %c0_3] : memref<128x128xbf16, #tpu.memory_space<vmem>>, vector<128x128xbf16>
    %c0_4 = arith.constant 0 : index
    %c0_5 = arith.constant 0 : index
    %5 = vector.load %arg3[%c0_4, %c0_5] : memref<128x128xbf16, #tpu.memory_space<vmem>>, vector<128x128xbf16>
    %cst = arith.constant dense<0.000000e+00> : vector<128x128xf32>
    %6 = tpu.matmul %4, %5, %cst {dimension_numbers = #tpu.dot_dimension_numbers<[1], [0], [0], [1], [0, 0, 1, 1], [], []>} : vector<128x128xbf16>, vector<128x128xbf16>, vector<128x128xf32> -> vector<128x128xf32>
    %7 = arith.addf %3, %6 : vector<128x128xf32>
    %c0_6 = arith.constant 0 : index
    %c0_7 = arith.constant 0 : index
    %8 = vector.load %arg5[%c0_6, %c0_7] : memref<128x128xf32, #tpu.memory_space<vmem>>, vector<128x128xf32>
    tpu.vector_store %arg5[%c0_6, %c0_7], %7 {strides = array<i32>} : memref<128x128xf32, #tpu.memory_space<vmem>>, vector<128x128xf32>,
    %c1_i32 = arith.constant 1 : i32
    %9 = arith.cmpi eq, %arg1, %c1_i32 : i32
    %10 = arith.extui %9 : i1 to i32
    %c0_i32_8 = arith.constant 0 : i32
    %11 = arith.cmpi ne, %10, %c0_i32_8 : i32
    scf.if %11 {
      %c0_9 = arith.constant 0 : index
      %c0_10 = arith.constant 0 : index
      %12 = vector.load %arg5[%c0_9, %c0_10] : memref<128x128xf32, #tpu.memory_space<vmem>>, vector<128x128xf32>
      %cst_11 = arith.constant 0.000000e+00 : f32
      %13 = vector.broadcast %cst_11 : f32 to vector<128x128xf32>
      %14 = arith.maximumf %12, %13 : vector<128x128xf32>
      %15 = arith.truncf %14 : vector<128x128xf32> to vector<128x128xbf16>
      %c0_12 = arith.constant 0 : index
      %c0_13 = arith.constant 0 : index
      %16 = vector.load %arg6[%c0_12, %c0_13] : memref<128x128xbf16, #tpu.memory_space<vmem>>, vector<128x128xbf16>
      tpu.vector_store %arg6[%c0_12, %c0_13], %15 {strides = array<i32>} : memref<128x128xbf16, #tpu.memory_space<vmem>>, vector<128x128xbf16>,
      %17 = vector.extract_strided_slice %12 {offsets = [0, 0], sizes = [128, 64], strides = [1, 1]} : vector<128x128xf32> to vector<128x64xf32>
      %c0_14 = arith.constant 0 : index
      %c0_15 = arith.constant 0 : index
      %18 = vector.load %arg4[%c0_14, %c0_15] : memref<64x256xf32, #tpu.memory_space<vmem>>, vector<64x256xf32>
      %cst_16 = arith.constant dense<0.000000e+00> : vector<128x256xf32>
      %19 = tpu.matmul %17, %18, %cst_16 {dimension_numbers = #tpu.dot_dimension_numbers<[1], [0], [0], [1], [0, 0, 1, 1], [], []>} : vector<128x64xf32>, vector<64x256xf32>, vector<128x256xf32> -> vector<128x256xf32>
      %20 = arith.truncf %19 : vector<128x256xf32> to vector<128x256xbf16>
      %c0_17 = arith.constant 0 : index
      %c0_18 = arith.constant 0 : index
      %21 = vector.load %arg7[%c0_17, %c0_18] : memref<128x256xbf16, #tpu.memory_space<vmem>>, vector<128x256xbf16>
      tpu.vector_store %arg7[%c0_17, %c0_18], %20 {strides = array<i32>} : memref<128x256xbf16, #tpu.memory_space<vmem>>, vector<128x256xbf16>,
    } else {
    }
    return
  }
  func.func @transform_0(%arg0: i32, %arg1: i32) -> (i32, i32) {
    %c0_i32 = arith.constant 0 : i32
    return %arg0, %arg1 : i32, i32
  }
  func.func @transform_1(%arg0: i32, %arg1: i32) -> (i32, i32) {
    %c0_i32 = arith.constant 0 : i32
    %c0_i32_0 = arith.constant 0 : i32
    return %arg1, %c0_i32 : i32, i32
  }
  func.func @transform_2(%arg0: i32, %arg1: i32) -> (i32, i32) {
    %c0_i32 = arith.constant 0 : i32
    %c0_i32_0 = arith.constant 0 : i32
    %c0_i32_1 = arith.constant 0 : i32
    return %c0_i32, %c0_i32_0 : i32, i32
  }
  func.func @transform_3(%arg0: i32, %arg1: i32) -> (i32, i32) {
    %c0_i32 = arith.constant 0 : i32
    %c0_i32_0 = arith.constant 0 : i32
    return %arg0, %c0_i32 : i32, i32
  }
  func.func @transform_4(%arg0: i32, %arg1: i32) -> (i32, i32) {
    %c0_i32 = arith.constant 0 : i32
    %c0_i32_0 = arith.constant 0 : i32
    return %arg0, %c0_i32 : i32, i32
  }
  func.func @transform_5(%arg0: i32, %arg1: i32) -> (i32, i32) {
    %c0_i32 = arith.constant 0 : i32
    %c0_i32_0 = arith.constant 0 : i32
    return %arg0, %c0_i32 : i32, i32
  }
}

module attributes {stable_mosaic.version = 11 : i64} {
  func.func @_gcn2_kernel(%arg0: i32, %arg1: i32, %arg2: memref<128x128xbf16, #tpu.memory_space<vmem>>, %arg3: memref<128x128xbf16, #tpu.memory_space<vmem>>, %arg4: memref<128x256xbf16, #tpu.memory_space<vmem>>, %arg5: memref<128x128xbf16, #tpu.memory_space<vmem>>, %arg6: memref<128x128xf32, #tpu.memory_space<vmem>>, %arg7: memref<128x1xf32, #tpu.memory_space<vmem>>, %arg8: memref<64x64xf32, #tpu.memory_space<vmem>>, %arg9: memref<1x1xf32, #tpu.memory_space<smem>>, %arg10: memref<128x256xf32, #tpu.memory_space<vmem>>, %arg11: memref<128x4xf32, #tpu.memory_space<vmem>>, %arg12: memref<128x128xf32, #tpu.memory_space<vmem>>) attributes {dimension_semantics = [#tpu.dimension_semantics<parallel>, #tpu.dimension_semantics<arbitrary>], iteration_bounds = array<i64: 2, 2>, scalar_prefetch = 0 : i64, scratch_operands = 1 : i64, tpu.core_type = #tpu.core_type<tc>, window_params = [{transform_indices = @transform_0, window_bounds = array<i64: 128, 128>}, {transform_indices = @transform_1, window_bounds = array<i64: 128, 128>}, {transform_indices = @transform_2, window_bounds = array<i64: 128, 256>}, {transform_indices = @transform_3, window_bounds = array<i64: 128, 128>}, {transform_indices = @transform_4, window_bounds = array<i64: 128, 128>}, {transform_indices = @transform_5, window_bounds = array<i64: 128, 1>}, {pipeline_mode = #tpu.pipeline_mode<synchronous>, transform_indices = @transform_6, window_bounds = array<i64: 64, 64>}, {transform_indices = @transform_7, window_bounds = array<i64: 1, 1>}, {transform_indices = @transform_8, window_bounds = array<i64: 128, 256>}, {transform_indices = @transform_9, window_bounds = array<i64: 128, 4>}]} {
    %c0_i32 = arith.constant 0 : i32
    %0 = arith.cmpi eq, %arg1, %c0_i32 : i32
    %1 = arith.extui %0 : i1 to i32
    %c0_i32_0 = arith.constant 0 : i32
    %2 = arith.cmpi ne, %1, %c0_i32_0 : i32
    scf.if %2 {
      %cst_18 = arith.constant 0.000000e+00 : f32
      %18 = vector.broadcast %cst_18 : f32 to vector<128x256xf32>
      %c0_19 = arith.constant 0 : index
      %c0_20 = arith.constant 0 : index
      %19 = vector.load %arg10[%c0_19, %c0_20] : memref<128x256xf32, #tpu.memory_space<vmem>>, vector<128x256xf32>
      tpu.vector_store %arg10[%c0_19, %c0_20], %18 {strides = array<i32>} : memref<128x256xf32, #tpu.memory_space<vmem>>, vector<128x256xf32>,
      %cst_21 = arith.constant 0.000000e+00 : f32
      %20 = vector.broadcast %cst_21 : f32 to vector<128x128xf32>
      %c0_22 = arith.constant 0 : index
      %c0_23 = arith.constant 0 : index
      %21 = vector.load %arg12[%c0_22, %c0_23] : memref<128x128xf32, #tpu.memory_space<vmem>>, vector<128x128xf32>
      tpu.vector_store %arg12[%c0_22, %c0_23], %20 {strides = array<i32>} : memref<128x128xf32, #tpu.memory_space<vmem>>, vector<128x128xf32>,
    } else {
    }
    %c0 = arith.constant 0 : index
    %c0_1 = arith.constant 0 : index
    %3 = vector.load %arg10[%c0, %c0_1] : memref<128x256xf32, #tpu.memory_space<vmem>>, vector<128x256xf32>
    %c0_2 = arith.constant 0 : index
    %c0_3 = arith.constant 0 : index
    %4 = vector.load %arg2[%c0_2, %c0_3] : memref<128x128xbf16, #tpu.memory_space<vmem>>, vector<128x128xbf16>
    %c0_4 = arith.constant 0 : index
    %c0_5 = arith.constant 0 : index
    %5 = vector.load %arg4[%c0_4, %c0_5] : memref<128x256xbf16, #tpu.memory_space<vmem>>, vector<128x256xbf16>
    %cst = arith.constant dense<0.000000e+00> : vector<128x256xf32>
    %6 = tpu.matmul %4, %5, %cst {dimension_numbers = #tpu.dot_dimension_numbers<[1], [0], [0], [1], [0, 0, 1, 1], [], []>} : vector<128x128xbf16>, vector<128x256xbf16>, vector<128x256xf32> -> vector<128x256xf32>
    %7 = arith.addf %3, %6 : vector<128x256xf32>
    %c0_6 = arith.constant 0 : index
    %c0_7 = arith.constant 0 : index
    %8 = vector.load %arg10[%c0_6, %c0_7] : memref<128x256xf32, #tpu.memory_space<vmem>>, vector<128x256xf32>
    tpu.vector_store %arg10[%c0_6, %c0_7], %7 {strides = array<i32>} : memref<128x256xf32, #tpu.memory_space<vmem>>, vector<128x256xf32>,
    %c0_8 = arith.constant 0 : index
    %c0_9 = arith.constant 0 : index
    %9 = vector.load %arg12[%c0_8, %c0_9] : memref<128x128xf32, #tpu.memory_space<vmem>>, vector<128x128xf32>
    %c0_10 = arith.constant 0 : index
    %c0_11 = arith.constant 0 : index
    %10 = vector.load %arg3[%c0_10, %c0_11] : memref<128x128xbf16, #tpu.memory_space<vmem>>, vector<128x128xbf16>
    %c0_12 = arith.constant 0 : index
    %c0_13 = arith.constant 0 : index
    %11 = vector.load %arg5[%c0_12, %c0_13] : memref<128x128xbf16, #tpu.memory_space<vmem>>, vector<128x128xbf16>
    %cst_14 = arith.constant dense<0.000000e+00> : vector<128x128xf32>
    %12 = tpu.matmul %10, %11, %cst_14 {dimension_numbers = #tpu.dot_dimension_numbers<[1], [0], [0], [1], [0, 0, 1, 1], [], []>} : vector<128x128xbf16>, vector<128x128xbf16>, vector<128x128xf32> -> vector<128x128xf32>
    %13 = arith.addf %9, %12 : vector<128x128xf32>
    %c0_15 = arith.constant 0 : index
    %c0_16 = arith.constant 0 : index
    %14 = vector.load %arg12[%c0_15, %c0_16] : memref<128x128xf32, #tpu.memory_space<vmem>>, vector<128x128xf32>
    tpu.vector_store %arg12[%c0_15, %c0_16], %13 {strides = array<i32>} : memref<128x128xf32, #tpu.memory_space<vmem>>, vector<128x128xf32>,
    %c1_i32 = arith.constant 1 : i32
    %15 = arith.cmpi eq, %arg1, %c1_i32 : i32
    %16 = arith.extui %15 : i1 to i32
    %c0_i32_17 = arith.constant 0 : i32
    %17 = arith.cmpi ne, %16, %c0_i32_17 : i32
    scf.if %17 {
      %c0_18 = arith.constant 0 : index
      %c0_19 = arith.constant 0 : index
      %18 = vector.load %arg12[%c0_18, %c0_19] : memref<128x128xf32, #tpu.memory_space<vmem>>, vector<128x128xf32>
      %c0_20 = arith.constant 0 : index
      %c0_21 = arith.constant 0 : index
      %19 = vector.load %arg7[%c0_20, %c0_21] : memref<128x1xf32, #tpu.memory_space<vmem>>, vector<128x1xf32>
      %20 = vector.broadcast %19 : vector<128x1xf32> to vector<128x128xf32>
      %21 = arith.mulf %18, %20 : vector<128x128xf32>
      %22 = vector.extract_strided_slice %21 {offsets = [0, 0], sizes = [128, 64], strides = [1, 1]} : vector<128x128xf32> to vector<128x64xf32>
      %23 = vector.extract_strided_slice %21 {offsets = [0, 64], sizes = [128, 64], strides = [1, 1]} : vector<128x128xf32> to vector<128x64xf32>
      %24 = arith.mulf %22, %22 : vector<128x64xf32>
      %cst_22 = arith.constant dense<0.000000e+00> : vector<128xf32>
      %25 = vector.multi_reduction <add>, %24, %cst_22 [1] : vector<128x64xf32> to vector<128xf32>
      %26 = vector.shape_cast %25 : vector<128xf32> to vector<128x1xf32>
      %cst_23 = arith.constant 1.000000e-24 : f32
      %27 = vector.broadcast %cst_23 : f32 to vector<128x1xf32>
      %28 = arith.maximumf %26, %27 : vector<128x1xf32>
      %29 = math.rsqrt %28 : vector<128x1xf32>
      %30 = vector.broadcast %29 : vector<128x1xf32> to vector<128x64xf32>
      %31 = arith.mulf %22, %30 : vector<128x64xf32>
      %32 = arith.mulf %23, %23 : vector<128x64xf32>
      %cst_24 = arith.constant dense<0.000000e+00> : vector<128xf32>
      %33 = vector.multi_reduction <add>, %32, %cst_24 [1] : vector<128x64xf32> to vector<128xf32>
      %34 = vector.shape_cast %33 : vector<128xf32> to vector<128x1xf32>
      %cst_25 = arith.constant 1.000000e-24 : f32
      %35 = vector.broadcast %cst_25 : f32 to vector<128x1xf32>
      %36 = arith.maximumf %34, %35 : vector<128x1xf32>
      %37 = math.rsqrt %36 : vector<128x1xf32>
      %38 = vector.broadcast %37 : vector<128x1xf32> to vector<128x64xf32>
      %39 = arith.mulf %23, %38 : vector<128x64xf32>
      %cst_26 = arith.constant 0.000000e+00 : f32
      %40 = vector.broadcast %cst_26 : f32 to vector<128x64xf32>
      %41 = arith.subf %40, %31 : vector<128x64xf32>
      %42 = math.exp %41 : vector<128x64xf32>
      %cst_27 = arith.constant 1.000000e+00 : f32
      %43 = vector.broadcast %cst_27 : f32 to vector<128x64xf32>
      %44 = arith.addf %43, %42 : vector<128x64xf32>
      %cst_28 = arith.constant 1.000000e+00 : f32
      %45 = vector.broadcast %cst_28 : f32 to vector<128x64xf32>
      %46 = arith.divf %45, %44 : vector<128x64xf32>
      %cst_29 = arith.constant 0.000000e+00 : f32
      %47 = vector.broadcast %cst_29 : f32 to vector<128x64xf32>
      %48 = arith.subf %47, %39 : vector<128x64xf32>
      %49 = math.exp %48 : vector<128x64xf32>
      %cst_30 = arith.constant 1.000000e+00 : f32
      %50 = vector.broadcast %cst_30 : f32 to vector<128x64xf32>
      %51 = arith.addf %50, %49 : vector<128x64xf32>
      %cst_31 = arith.constant 1.000000e+00 : f32
      %52 = vector.broadcast %cst_31 : f32 to vector<128x64xf32>
      %53 = arith.divf %52, %51 : vector<128x64xf32>
      %c0_32 = arith.constant 0 : index
      %c0_33 = arith.constant 0 : index
      %54 = vector.load %arg6[%c0_32, %c0_33] : memref<128x128xf32, #tpu.memory_space<vmem>>, vector<128x128xf32>
      %55 = vector.extract_strided_slice %54 {offsets = [0, 0], sizes = [128, 64], strides = [1, 1]} : vector<128x128xf32> to vector<128x64xf32>
      %cst_34 = arith.constant 0.000000e+00 : f32
      %56 = vector.broadcast %cst_34 : f32 to vector<128x64xf32>
      %57 = arith.maximumf %55, %56 : vector<128x64xf32>
      %58 = vector.extract_strided_slice %54 {offsets = [0, 64], sizes = [128, 64], strides = [1, 1]} : vector<128x128xf32> to vector<128x64xf32>
      %cst_35 = arith.constant 0.000000e+00 : f32
      %59 = vector.broadcast %cst_35 : f32 to vector<128x64xf32>
      %60 = arith.maximumf %58, %59 : vector<128x64xf32>
      %c0_36 = arith.constant 0 : index
      %c0_37 = arith.constant 0 : index
      %61 = vector.load %arg8[%c0_36, %c0_37] : memref<64x64xf32, #tpu.memory_space<vmem>>, vector<64x64xf32>
      %cst_38 = arith.constant dense<0.000000e+00> : vector<128x64xf32>
      %62 = tpu.matmul %57, %61, %cst_38 {dimension_numbers = #tpu.dot_dimension_numbers<[1], [0], [0], [1], [0, 0, 1, 1], [], []>} : vector<128x64xf32>, vector<64x64xf32>, vector<128x64xf32> -> vector<128x64xf32>
      %cst_39 = arith.constant dense<0.000000e+00> : vector<128x64xf32>
      %63 = tpu.matmul %60, %61, %cst_39 {dimension_numbers = #tpu.dot_dimension_numbers<[1], [0], [0], [1], [0, 0, 1, 1], [], []>} : vector<128x64xf32>, vector<64x64xf32>, vector<128x64xf32> -> vector<128x64xf32>
      %c0_40 = arith.constant 0 : index
      %c0_41 = arith.constant 0 : index
      %64 = memref.load %arg9[%c0_40, %c0_41] : memref<1x1xf32, #tpu.memory_space<smem>>
      %65 = arith.mulf %62, %46 : vector<128x64xf32>
      %cst_42 = arith.constant dense<0.000000e+00> : vector<128xf32>
      %66 = vector.multi_reduction <add>, %65, %cst_42 [1] : vector<128x64xf32> to vector<128xf32>
      %67 = vector.shape_cast %66 : vector<128xf32> to vector<128x1xf32>
      %68 = vector.broadcast %64 : f32 to vector<128x1xf32>
      %69 = arith.addf %67, %68 : vector<128x1xf32>
      %c0_43 = arith.constant 0 : index
      %c0_44 = arith.constant 0 : index
      %70 = vector.load %arg11[%c0_43, %c0_44] : memref<128x4xf32, #tpu.memory_space<vmem>>, vector<128x1xf32>
      tpu.vector_store %arg11[%c0_43, %c0_44], %69 {strides = array<i32>} : memref<128x4xf32, #tpu.memory_space<vmem>>, vector<128x1xf32>,
      %71 = arith.mulf %63, %46 : vector<128x64xf32>
      %cst_45 = arith.constant dense<0.000000e+00> : vector<128xf32>
      %72 = vector.multi_reduction <add>, %71, %cst_45 [1] : vector<128x64xf32> to vector<128xf32>
      %73 = vector.shape_cast %72 : vector<128xf32> to vector<128x1xf32>
      %74 = vector.broadcast %64 : f32 to vector<128x1xf32>
      %75 = arith.addf %73, %74 : vector<128x1xf32>
      %c0_46 = arith.constant 0 : index
      %c1 = arith.constant 1 : index
      %76 = vector.load %arg11[%c0_46, %c1] : memref<128x4xf32, #tpu.memory_space<vmem>>, vector<128x1xf32>
      tpu.vector_store %arg11[%c0_46, %c1], %75 {strides = array<i32>} : memref<128x4xf32, #tpu.memory_space<vmem>>, vector<128x1xf32>,
      %77 = arith.mulf %63, %53 : vector<128x64xf32>
      %cst_47 = arith.constant dense<0.000000e+00> : vector<128xf32>
      %78 = vector.multi_reduction <add>, %77, %cst_47 [1] : vector<128x64xf32> to vector<128xf32>
      %79 = vector.shape_cast %78 : vector<128xf32> to vector<128x1xf32>
      %80 = vector.broadcast %64 : f32 to vector<128x1xf32>
      %81 = arith.addf %79, %80 : vector<128x1xf32>
      %c0_48 = arith.constant 0 : index
      %c2 = arith.constant 2 : index
      %82 = vector.load %arg11[%c0_48, %c2] : memref<128x4xf32, #tpu.memory_space<vmem>>, vector<128x1xf32>
      tpu.vector_store %arg11[%c0_48, %c2], %81 {strides = array<i32>} : memref<128x4xf32, #tpu.memory_space<vmem>>, vector<128x1xf32>,
      %83 = arith.mulf %62, %53 : vector<128x64xf32>
      %cst_49 = arith.constant dense<0.000000e+00> : vector<128xf32>
      %84 = vector.multi_reduction <add>, %83, %cst_49 [1] : vector<128x64xf32> to vector<128xf32>
      %85 = vector.shape_cast %84 : vector<128xf32> to vector<128x1xf32>
      %86 = vector.broadcast %64 : f32 to vector<128x1xf32>
      %87 = arith.addf %85, %86 : vector<128x1xf32>
      %c0_50 = arith.constant 0 : index
      %c3 = arith.constant 3 : index
      %88 = vector.load %arg11[%c0_50, %c3] : memref<128x4xf32, #tpu.memory_space<vmem>>, vector<128x1xf32>
      tpu.vector_store %arg11[%c0_50, %c3], %87 {strides = array<i32>} : memref<128x4xf32, #tpu.memory_space<vmem>>, vector<128x1xf32>,
    } else {
    }
    return
  }
  func.func @transform_0(%arg0: i32, %arg1: i32) -> (i32, i32) {
    %c0_i32 = arith.constant 0 : i32
    return %arg0, %arg1 : i32, i32
  }
  func.func @transform_1(%arg0: i32, %arg1: i32) -> (i32, i32) {
    %c0_i32 = arith.constant 0 : i32
    return %arg0, %arg1 : i32, i32
  }
  func.func @transform_2(%arg0: i32, %arg1: i32) -> (i32, i32) {
    %c0_i32 = arith.constant 0 : i32
    %c0_i32_0 = arith.constant 0 : i32
    return %arg1, %c0_i32 : i32, i32
  }
  func.func @transform_3(%arg0: i32, %arg1: i32) -> (i32, i32) {
    %c0_i32 = arith.constant 0 : i32
    %c0_i32_0 = arith.constant 0 : i32
    return %arg1, %c0_i32 : i32, i32
  }
  func.func @transform_4(%arg0: i32, %arg1: i32) -> (i32, i32) {
    %c0_i32 = arith.constant 0 : i32
    %c0_i32_0 = arith.constant 0 : i32
    return %arg0, %c0_i32 : i32, i32
  }
  func.func @transform_5(%arg0: i32, %arg1: i32) -> (i32, i32) {
    %c0_i32 = arith.constant 0 : i32
    %c0_i32_0 = arith.constant 0 : i32
    return %arg0, %c0_i32 : i32, i32
  }
  func.func @transform_6(%arg0: i32, %arg1: i32) -> (i32, i32) {
    %c0_i32 = arith.constant 0 : i32
    %c0_i32_0 = arith.constant 0 : i32
    %c0_i32_1 = arith.constant 0 : i32
    return %c0_i32, %c0_i32_0 : i32, i32
  }
  func.func @transform_7(%arg0: i32, %arg1: i32) -> (i32, i32) {
    %c0_i32 = arith.constant 0 : i32
    %c0_i32_0 = arith.constant 0 : i32
    %c0_i32_1 = arith.constant 0 : i32
    return %c0_i32, %c0_i32_0 : i32, i32
  }
  func.func @transform_8(%arg0: i32, %arg1: i32) -> (i32, i32) {
    %c0_i32 = arith.constant 0 : i32
    %c0_i32_0 = arith.constant 0 : i32
    return %arg0, %c0_i32 : i32, i32
  }
  func.func @transform_9(%arg0: i32, %arg1: i32) -> (i32, i32) {
    %c0_i32 = arith.constant 0 : i32
    %c0_i32_0 = arith.constant 0 : i32
    return %arg0, %c0_i32 : i32, i32
  }
}

</mosaic_0001>

<bundles_post_ra>
// kernel: encoder_sparse_forward.3
= control target key start
LH: loop header
LB: loop body
LE: loop exit
PB: predicated region body
PF: predicated region fallthrough
CT: control target
= control target key end

     0   :  { %s1360_s12 = smov 0   ;;  %s1547_s0 = inlined_call_operand.vmem [shape: bf16[256,256], index: 0, kind: input, shape index: {}]   ;;  %s1548_s1 = inlined_call_operand.vmem [shape: bf16[256,256], index: 1, kind: input, shape index: {}]   ;;  %s1549_s2 = inlined_call_operand.vmem [shape: bf16[256,64], index: 2, kind: input, shape index: {}]   ;;  %s1550_s3 = inlined_call_operand.vmem [shape: bf16[256,128], index: 3, kind: output, shape index: {}]  }
   0x1 LB: > { %s946_s13 = sadd.s32 4294967295, %s1337_s12   ;;  %p950_p0 = scmp.ge.s32.totalorder %s1337_s12, 1  ;;  %s1337_s12 = sphi %s1360_s12, %s13_s12  }
   0x2   : > { %p151_p1 = scmp.lt.s32.totalorder %s1337_s12, 3 }
   0x4   : > { %p152_p2 = pnand %p950_p0, %p151_p1 }
   0x5   : > { %v1267_v0 = vld [vmem:[%s1549_s2 + $0x40] sm:$0xff] (!%p152_p2)   ;;  %s951_s16 = sshll.u32 (!%p152_p2), %s946_s13, 4  ;;  %v1269_v2 = vld [vmem:[%s1549_s2 + $0x48] sm:$0xff] (!%p152_p2)   ;;  %v1271_v4 = vld [vmem:[%s1549_s2 + $0x50] sm:$0xff] (!%p152_p2)   ;;  %s1339_s29 = smov (!%p152_p2), 64   ;;  %vm781_vm0 = vcmask (!%p152_p2), 523264  }
   0x6   : > { %155 = sbr.rel (%p152_p2) target bundleno = 434 (0x1b2), region = 32  ;;  %v1268_v1 = vld [vmem:[%s1549_s2] sm:$0xff] (!%p152_p2)   ;;  %1154 = vmatprep.subr.bf16.mxu1 (!%p152_p2), %v1267_v0  ;;  %1090 = vmatprep.subr.bf16.mxu0 (!%p152_p2), %v1267_v0  ;;  %v1270_v3 = vld [vmem:[%s1549_s2 + $0x8] sm:$0xff] (!%p152_p2)   ;;  %p183_p3 = scmp.lt.s32.totalorder (!%p152_p2), %s951_s16, 31  ;;  %v1272_v5 = vld [vmem:[%s1549_s2 + $0x10] sm:$0xff] (!%p152_p2)  }
   0x7   : > { %1155 = vmatpush3.bf16.msra.mxu1 (!%p152_p2), %v1268_v1  ;;  %1091 = vmatpush3.bf16.msra.mxu0 (!%p152_p2), %v1268_v1  ;;  %v1273_v6 = vld [vmem:[%s1549_s2 + $0x58] sm:$0xff] (!%p152_p2)   ;;  %v1275_v8 = vld [vmem:[%s1549_s2 + $0x60] sm:$0xff] (!%p152_p2)   ;;  %v1277_v10 = vld [vmem:[%s1549_s2 + $0x68] sm:$0xff] (!%p152_p2)  }
   0x8   : > { %1156 = vmatprep.subr.bf16.mxu1 (!%p152_p2), %v1269_v2  ;;  %1092 = vmatprep.subr.bf16.mxu0 (!%p152_p2), %v1269_v2  ;;  %v1274_v7 = vld [vmem:[%s1549_s2 + $0x18] sm:$0xff] (!%p152_p2)   ;;  %v1276_v9 = vld [vmem:[%s1549_s2 + $0x20] sm:$0xff] (!%p152_p2)   ;;  %v1278_v12 = vld [vmem:[%s1549_s2 + $0x28] sm:$0xff] (!%p152_p2)  }
   0x9   : > { %v1279_v13 = vld [vmem:[%s1549_s2 + $0x70] sm:$0xff] (!%p152_p2)   ;;  %v1281_v15 = vld [vmem:[%s1549_s2 + $0x78] sm:$0xff] (!%p152_p2)  }
   0xa   : > { %v1280_v14 = vld [vmem:[%s1549_s2 + $0x30] sm:$0xff] (!%p152_p2)   ;;  %v1282_v16 = vld [vmem:[%s1549_s2 + $0x38] sm:$0xff] (!%p152_p2)  }
   0xb   : > { %1157 = vmatpush3.bf16.msra.mxu1 (!%p152_p2), %v1270_v3  ;;  %1093 = vmatpush3.bf16.msra.mxu0 (!%p152_p2), %v1270_v3 }
   0xc   : > { %1158 = vmatprep.subr.bf16.mxu1 (!%p152_p2), %v1271_v4  ;;  %1094 = vmatprep.subr.bf16.mxu0 (!%p152_p2), %v1271_v4 }
   0xd   : > { %s1552_s16 = smov (!%p183_p3, %s951_s16), 31 }
   0xe   : > { %s1025_s4 = sshll.u32 %s1552_s16, 3  ;;  %s958_s30 = sshll.u32 %s1552_s16, 2 }
   0xf   : > { %1159 = vmatpush3.bf16.msra.mxu1 %v1272_v5  ;;  %1095 = vmatpush3.bf16.msra.mxu0 %v1272_v5  ;;  %s1401_s9 = scalar_lea.vmem %s1548_s1, %s1025_s4  ;;  %s1425_s26 = scalar_lea.vmem %s1547_s0, %s1025_s4 }
  0x10   : > { %1160 = vmatprep.subr.bf16.mxu1 %v1273_v6  ;;  %1096 = vmatprep.subr.bf16.mxu0 %v1273_v6  ;;  %v1285_v11 = vld [vmem:[%s1401_s9 + $0x4] ss:$8 sps:$4 sm:$0xff]   ;;  %v1283_v18 = vld [vmem:[%s1401_s9] ss:$8 sps:$4 sm:$0xff]   ;;  %v1286_v19 = vld [vmem:[%s1401_s9 + $0x14] ss:$8 sps:$4 sm:$0xff]   ;;  %s1503_s6 = scalar_lea.vmem %s1550_s3, %s958_s30 }
  0x11   : > { %652 = vmatprep.mubr.bf16.mxu1 %v1285_v11  ;;  %v1309_v17 = vld [vmem:[%s1425_s26 + $0x4] ss:$8 sps:$4 sm:$0xff]   ;;  %v1307_v20 = vld [vmem:[%s1425_s26] ss:$8 sps:$4 sm:$0xff]   ;;  %v1310_v21 = vld [vmem:[%s1425_s26 + $0x14] ss:$8 sps:$4 sm:$0xff]  }
  0x12   : > { %459 = vmatprep.mubr.bf16.mxu0 %v1309_v17  ;;  %v1288_v22 = vld [vmem:[%s1401_s9 + $0x10] ss:$8 sps:$4 sm:$0xff]   ;;  %v1289_v23 = vld [vmem:[%s1401_s9 + $0x24] ss:$8 sps:$4 sm:$0xff]   ;;  %v1291_v26 = vld [vmem:[%s1401_s9 + $0x20] ss:$8 sps:$4 sm:$0xff]  }
  0x13   : > { %1161 = vmatpush3.bf16.msra.mxu1 %v1274_v7  ;;  %1097 = vmatpush3.bf16.msra.mxu0 %v1274_v7  ;;  %v1312_v24 = vld [vmem:[%s1425_s26 + $0x10] ss:$8 sps:$4 sm:$0xff]   ;;  %v1313_v25 = vld [vmem:[%s1425_s26 + $0x24] ss:$8 sps:$4 sm:$0xff]   ;;  %v1292_v27 = vld [vmem:[%s1401_s9 + $0x34] ss:$8 sps:$4 sm:$0xff]  }
  0x14   : > { %1162 = vmatprep.subr.bf16.mxu1 %v1275_v8  ;;  %1098 = vmatprep.subr.bf16.mxu0 %v1275_v8  ;;  %v1315_v28 = vld [vmem:[%s1425_s26 + $0x20] ss:$8 sps:$4 sm:$0xff]   ;;  %v1316_v29 = vld [vmem:[%s1425_s26 + $0x34] ss:$8 sps:$4 sm:$0xff]   ;;  %v1294_v30 = vld [vmem:[%s1401_s9 + $0x30] ss:$8 sps:$4 sm:$0xff]  }
  0x15   : > { %v1295_v31 = vld [vmem:[%s1401_s9 + $0x44] ss:$8 sps:$4 sm:$0xff]   ;;  %v1318_v32 = vld [vmem:[%s1425_s26 + $0x30] ss:$8 sps:$4 sm:$0xff]   ;;  %v1297_v34 = vld [vmem:[%s1401_s9 + $0x40] ss:$8 sps:$4 sm:$0xff]  }
  0x16   : > { %v1319_v33 = vld [vmem:[%s1425_s26 + $0x44] ss:$8 sps:$4 sm:$0xff]   ;;  %v1298_v35 = vld [vmem:[%s1401_s9 + $0x54] ss:$8 sps:$4 sm:$0xff]   ;;  %v1321_v36 = vld [vmem:[%s1425_s26 + $0x40] ss:$8 sps:$4 sm:$0xff]  }
  0x17   : > { %1163 = vmatpush3.bf16.msra.mxu1 %v1276_v9  ;;  %1099 = vmatpush3.bf16.msra.mxu0 %v1276_v9  ;;  %v1322_v37 = vld [vmem:[%s1425_s26 + $0x54] ss:$8 sps:$4 sm:$0xff]   ;;  %v1300_v38 = vld [vmem:[%s1401_s9 + $0x50] ss:$8 sps:$4 sm:$0xff]   ;;  %v1301_v39 = vld [vmem:[%s1401_s9 + $0x64] ss:$8 sps:$4 sm:$0xff]  }
  0x18   : > { %1164 = vmatprep.subr.bf16.mxu1 %v1277_v10  ;;  %1100 = vmatprep.subr.bf16.mxu0 %v1277_v10  ;;  %v1324_v40 = vld [vmem:[%s1425_s26 + $0x50] ss:$8 sps:$4 sm:$0xff]   ;;  %v1325_v41 = vld [vmem:[%s1425_s26 + $0x64] ss:$8 sps:$4 sm:$0xff]   ;;  %v1303_v42 = vld [vmem:[%s1401_s9 + $0x60] ss:$8 sps:$4 sm:$0xff]  }
  0x19   : > { %v1304_v43 = vld [vmem:[%s1401_s9 + $0x74] ss:$8 sps:$4 sm:$0xff]   ;;  %v1327_v44 = vld [vmem:[%s1425_s26 + $0x60] ss:$8 sps:$4 sm:$0xff]   ;;  %v1306_v46 = vld [vmem:[%s1401_s9 + $0x70] ss:$8 sps:$4 sm:$0xff]  }
  0x1a   : > { %v1328_v45 = vld [vmem:[%s1425_s26 + $0x74] ss:$8 sps:$4 sm:$0xff]   ;;  %v1330_v47 = vld [vmem:[%s1425_s26 + $0x70] ss:$8 sps:$4 sm:$0xff]  }
  0x1b   : > { %1165 = vmatpush3.bf16.msra.mxu1 %v1278_v12  ;;  %1101 = vmatpush3.bf16.msra.mxu0 %v1278_v12 }
  0x1c   : > { %1166 = vmatprep.subr.bf16.mxu1 %v1279_v13  ;;  %1102 = vmatprep.subr.bf16.mxu0 %v1279_v13 }
  0x1f   : > { %1167 = vmatpush3.bf16.msra.mxu1 %v1280_v14  ;;  %1103 = vmatpush3.bf16.msra.mxu0 %v1280_v14 }
  0x20   : > { %1168 = vmatprep.subr.bf16.mxu1 %v1281_v15  ;;  %1104 = vmatprep.subr.bf16.mxu0 %v1281_v15 }
  0x23   : > { %1169 = vmatpush3.bf16.msra.mxu1 %v1282_v16  ;;  %1105 = vmatpush3.bf16.msra.mxu0 %v1282_v16 }
  0x26   : > { %653 = vmatmul.mubr.bf16.vlgmr.msra.gmra.mrb[0].mxu1 %v1283_v18  ;;  %460 = vmatmul.mubr.bf16.vlgmr.msra.gmra.mrb[0].mxu0 %v1307_v20 }
  0x27   : > { %660 = vmatprep.mubr.bf16.mxu1 %v1286_v19  ;;  %467 = vmatprep.mubr.bf16.mxu0 %v1310_v21 }
  0x2e   : > { %661 = vmatmul.mubr.bf16.gmra.mrb[4].mxu1 %v1288_v22  ;;  %468 = vmatmul.mubr.bf16.gmra.mrb[4].mxu0 %v1312_v24 }
  0x2f   : > { %668 = vmatprep.mubr.bf16.mxu1 %v1289_v23  ;;  %475 = vmatprep.mubr.bf16.mxu0 %v1313_v25 }
  0x36   : > { %669 = vmatmul.mubr.bf16.gmra.mrb[8].mxu1 %v1291_v26  ;;  %476 = vmatmul.mubr.bf16.gmra.mrb[8].mxu0 %v1315_v28 }
  0x37   : > { %676 = vmatprep.mubr.bf16.mxu1 %v1292_v27  ;;  %483 = vmatprep.mubr.bf16.mxu0 %v1316_v29 }
  0x3e   : > { %677 = vmatmul.mubr.bf16.gmra.mrb[12].mxu1 %v1294_v30  ;;  %484 = vmatmul.mubr.bf16.gmra.mrb[12].mxu0 %v1318_v32 }
  0x3f   : > { %684 = vmatprep.mubr.bf16.mxu1 %v1295_v31  ;;  %491 = vmatprep.mubr.bf16.mxu0 %v1319_v33 }
  0x46   : > { %685 = vmatmul.mubr.bf16.gmra.mrb[16].mxu1 %v1297_v34  ;;  %492 = vmatmul.mubr.bf16.gmra.mrb[16].mxu0 %v1321_v36 }
  0x47   : > { %692 = vmatprep.mubr.bf16.mxu1 %v1298_v35  ;;  %499 = vmatprep.mubr.bf16.mxu0 %v1322_v37 }
  0x4e   : > { %693 = vmatmul.mubr.bf16.gmra.mrb[20].mxu1 %v1300_v38  ;;  %500 = vmatmul.mubr.bf16.gmra.mrb[20].mxu0 %v1324_v40 }
  0x4f   : > { %700 = vmatprep.mubr.bf16.mxu1 %v1301_v39  ;;  %507 = vmatprep.mubr.bf16.mxu0 %v1325_v41 }
  0x56   : > { %701 = vmatmul.mubr.bf16.gmra.mrb[24].mxu1 %v1303_v42  ;;  %508 = vmatmul.mubr.bf16.gmra.mrb[24].mxu0 %v1327_v44 }
  0x57   : > { %708 = vmatprep.mubr.bf16.mxu1 %v1304_v43  ;;  %515 = vmatprep.mubr.bf16.mxu0 %v1328_v45 }
  0x5e   : > { %709 = vmatmul.mubr.bf16.gmra.mrb[28].mxu1 %v1306_v46  ;;  %516 = vmatmul.mubr.bf16.gmra.mrb[28].mxu0 %v1330_v47 }
  0xf9   : > { %v1170_v48 = vpop.f32.mrb[0].mxu1  ;;  %v1106_v50 = vpop.f32.mrb[0].mxu0 }
  0xfa   : > { %v1171_v49 = vpop.f32.mrb[1].mxu1  ;;  %v1107_v53 = vpop.f32.mrb[1].mxu0 }
  0xfb   : > { %v1172_v51 = vadd.f32 %v1171_v49, %v1170_v48  ;;  %v1173_v52 = vpop.f32.mrb[2].mxu1  ;;  %v1461_v55 = vadd.f32 %v1107_v53, %v1106_v50  ;;  %v1109_v56 = vpop.f32.mrb[2].mxu0 }
  0xfc   : > { %v1174_v54 = vpop.f32.mrb[3].mxu1  ;;  %v1110_v58 = vpop.f32.mrb[3].mxu0 }
  0xfd   : > { %v1175_v57 = vadd.f32 %v1174_v54, %v1173_v52  ;;  %v1463_v59 = vadd.f32 %v1110_v58, %v1109_v56 }
  0xff   : > { %v1227_v60 = vpack.i.bf16 %v1175_v57, %v1172_v51 }
 0x101   : > { %v1176_v61 = vpop.f32.mrb[4].mxu1  ;;  %1228 = vrot.lane.b32.xlu0 %v1227_v60, %s1339_s29  ;;  %v1112_v63 = vpop.f32.mrb[4].mxu0 }
 0x102   : > { %v1177_v62 = vpop.f32.mrb[5].mxu1  ;;  %v1113_v2 = vpop.f32.mrb[5].mxu0 }
 0x103   : > { %v1178_v0 = vadd.f32 %v1177_v62, %v1176_v61  ;;  %v1179_v1 = vpop.f32.mrb[6].mxu1  ;;  %v1466_v4 = vadd.f32 %v1113_v2, %v1112_v63  ;;  %v1115_v5 = vpop.f32.mrb[6].mxu0 }
 0x104   : > { %v1180_v3 = vpop.f32.mrb[7].mxu1  ;;  %v1116_v7 = vpop.f32.mrb[7].mxu0 }
 0x105   : > { %v1181_v6 = vadd.f32 %v1180_v3, %v1179_v1  ;;  %v1468_v8 = vadd.f32 %v1116_v7, %v1115_v5 }
 0x107   : > { %v1232_v9 = vpack.i.bf16 %v1181_v6, %v1178_v0 }
 0x109   : > { %v1182_v10 = vpop.f32.mrb[8].mxu1  ;;  %1233 = vrot.lane.b32.xlu0 %v1232_v9, %s1339_s29  ;;  %v1118_v12 = vpop.f32.mrb[8].mxu0 }
 0x10a   : > { %v1183_v11 = vpop.f32.mrb[9].mxu1  ;;  %v1119_v15 = vpop.f32.mrb[9].mxu0 }
 0x10b   : > { %v1184_v13 = vadd.f32 %v1183_v11, %v1182_v10  ;;  %v1185_v14 = vpop.f32.mrb[10].mxu1  ;;  %v1471_v17 = vadd.f32 %v1119_v15, %v1118_v12  ;;  %v1121_v18 = vpop.f32.mrb[10].mxu0 }
 0x10c   : > { %v1186_v16 = vpop.f32.mrb[11].mxu1  ;;  %v1122_v20 = vpop.f32.mrb[11].mxu0 }
 0x10d   : > { %v1187_v19 = vadd.f32 %v1186_v16, %v1185_v14  ;;  %v1473_v21 = vadd.f32 %v1122_v20, %v1121_v18 }
 0x10f   : > { %v1237_v22 = vpack.i.bf16 %v1187_v19, %v1184_v13 }
 0x111   : > { %v1188_v23 = vpop.f32.mrb[12].mxu1  ;;  %1238 = vrot.lane.b32.xlu1 %v1237_v22, %s1339_s29  ;;  %v1124_v25 = vpop.f32.mrb[12].mxu0 }
 0x112   : > { %v1189_v24 = vpop.f32.mrb[13].mxu1  ;;  %v1125_v28 = vpop.f32.mrb[13].mxu0 }
 0x113   : > { %v1190_v26 = vadd.f32 %v1189_v24, %v1188_v23  ;;  %v1191_v27 = vpop.f32.mrb[14].mxu1  ;;  %v1476_v30 = vadd.f32 %v1125_v28, %v1124_v25  ;;  %v1127_v31 = vpop.f32.mrb[14].mxu0 }
 0x114   : > { %v1192_v29 = vpop.f32.mrb[15].mxu1  ;;  %v1128_v33 = vpop.f32.mrb[15].mxu0 }
 0x115   : > { %v1193_v32 = vadd.f32 %v1192_v29, %v1191_v27  ;;  %v1478_v34 = vadd.f32 %v1128_v33, %v1127_v31 }
 0x117   : > { %v1242_v35 = vpack.i.bf16 %v1193_v32, %v1190_v26 }
 0x119   : > { %v1194_v36 = vpop.f32.mrb[16].mxu1  ;;  %1243 = vrot.lane.b32.xlu1 %v1242_v35, %s1339_s29  ;;  %v1130_v38 = vpop.f32.mrb[16].mxu0 }
 0x11a   : > { %v1195_v37 = vpop.f32.mrb[17].mxu1  ;;  %v1131_v41 = vpop.f32.mrb[17].mxu0 }
 0x11b   : > { %v1196_v39 = vadd.f32 %v1195_v37, %v1194_v36  ;;  %v1197_v40 = vpop.f32.mrb[18].mxu1  ;;  %v1481_v43 = vadd.f32 %v1131_v41, %v1130_v38  ;;  %v1133_v44 = vpop.f32.mrb[18].mxu0 }
 0x11c   : > { %v1198_v42 = vpop.f32.mrb[19].mxu1  ;;  %v1134_v46 = vpop.f32.mrb[19].mxu0 }
 0x11d   : > { %v1199_v45 = vadd.f32 %v1198_v42, %v1197_v40  ;;  %v1483_v47 = vadd.f32 %v1134_v46, %v1133_v44 }
 0x11f   : > { %v1247_v48 = vpack.i.bf16 %v1199_v45, %v1196_v39 }
 0x121   : > { %v1200_v49 = vpop.f32.mrb[20].mxu1  ;;  %1248 = vrot.lane.b32.xlu0 %v1247_v48, %s1339_s29  ;;  %v1136_v51 = vpop.f32.mrb[20].mxu0 }
 0x122   : > { %v1201_v50 = vpop.f32.mrb[21].mxu1  ;;  %v1137_v54 = vpop.f32.mrb[21].mxu0 }
 0x123   : > { %v1202_v52 = vadd.f32 %v1201_v50, %v1200_v49  ;;  %v1203_v53 = vpop.f32.mrb[22].mxu1  ;;  %v1486_v57 = vadd.f32 %v1137_v54, %v1136_v51  ;;  %v1139_v58 = vpop.f32.mrb[22].mxu0 }
 0x124   : > { %v1204_v56 = vpop.f32.mrb[23].mxu1  ;;  %v1140_v61 = vpop.f32.mrb[23].mxu0 }
 0x125   : > { %v1205_v60 = vadd.f32 %v1204_v56, %v1203_v53  ;;  %v1488_v62 = vadd.f32 %v1140_v61, %v1139_v58 }
 0x127   : > { %v1252_v63 = vpack.i.bf16 %v1205_v60, %v1202_v52 }
 0x129   : > { %v1206_v0 = vpop.f32.mrb[24].mxu1  ;;  %1253 = vrot.lane.b32.xlu1 %v1252_v63, %s1339_s29  ;;  %v1142_v2 = vpop.f32.mrb[24].mxu0 }
 0x12a   : > { %v1207_v1 = vpop.f32.mrb[25].mxu1  ;;  %v1143_v6 = vpop.f32.mrb[25].mxu0 }
 0x12b   : > { %v1208_v3 = vadd.f32 %v1207_v1, %v1206_v0  ;;  %v1209_v5 = vpop.f32.mrb[26].mxu1  ;;  %v1491_v9 = vadd.f32 %v1143_v6, %v1142_v2  ;;  %v1145_v10 = vpop.f32.mrb[26].mxu0 }
 0x12c   : > { %v1210_v7 = vpop.f32.mrb[27].mxu1  ;;  %v1146_v12 = vpop.f32.mrb[27].mxu0 }
 0x12d   : > { %v1211_v11 = vadd.f32 %v1210_v7, %v1209_v5  ;;  %v1493_v13 = vadd.f32 %v1146_v12, %v1145_v10 }
 0x12f   : > { %v1257_v14 = vpack.i.bf16 %v1211_v11, %v1208_v3 }
 0x131   : > { %v1212_v15 = vpop.f32.mrb[28].mxu1  ;;  %1258 = vrot.lane.b32.xlu0 %v1257_v14, %s1339_s29  ;;  %v1148_v18 = vpop.f32.mrb[28].mxu0 }
 0x132   : > { %v1213_v16 = vpop.f32.mrb[29].mxu1  ;;  %v1149_v22 = vpop.f32.mrb[29].mxu0 }
 0x133   : > { %v1214_v19 = vadd.f32 %v1213_v16, %v1212_v15  ;;  %v1215_v20 = vpop.f32.mrb[30].mxu1  ;;  %v1496_v24 = vadd.f32 %v1149_v22, %v1148_v18  ;;  %v1151_v25 = vpop.f32.mrb[30].mxu0 }
 0x134   : > { %v1216_v23 = vpop.f32.mrb[31].mxu1  ;;  %v1152_v27 = vpop.f32.mrb[31].mxu0 }
 0x135   : > { %v1217_v26 = vadd.f32 %v1216_v23, %v1215_v20  ;;  %v1153_v28 = vadd.f32 %v1152_v27, %v1151_v25 }
 0x137   : > { %v1262_v29 = vpack.i.bf16 %v1217_v26, %v1214_v19 }
 0x139   : > { %1263 = vrot.lane.b32.xlu1 %v1262_v29, %s1339_s29 }
 0x173   : > { %v1229_v31 = vpop.permute.xlu0 %1228 }
 0x174   : > { %v1231_v32 = vunpack.i.h.bf16 %v1229_v31  ;;  %v1230_v33 = vunpack.i.l.bf16 %v1229_v31 }
 0x176   : > { %v782_v35 = vsel %vm781_vm0, %v1461_v55, %v1230_v33  ;;  %v783_v36 = vsel %vm781_vm0, %v1463_v59, %v1231_v32 }
 0x177   : > { %v1046_v37 = vpack.c.bf16 %v783_v36, %v782_v35 }
 0x179   : > { %1047 = vst [vmem:[%s1503_s6] sm:$0xff] %v1046_v37  }
 0x17b   : > { %v1234_v38 = vpop.permute.xlu0 %1233 }
 0x17c   : > { %v1236_v39 = vunpack.i.h.bf16 %v1234_v38  ;;  %v1235_v40 = vunpack.i.l.bf16 %v1234_v38 }
 0x17e   : > { %v784_v41 = vsel %vm781_vm0, %v1466_v4, %v1235_v40  ;;  %v785_v42 = vsel %vm781_vm0, %v1468_v8, %v1236_v39 }
 0x17f   : > { %v1051_v44 = vpack.c.bf16 %v785_v42, %v784_v41 }
 0x181   : > { %1083 = vst [vmem:[%s1503_s6 + $0x8] sm:$0xff] %v1051_v44  }
 0x183   : > { %v1239_v45 = vpop.permute.xlu1 %1238 }
 0x184   : > { %v1241_v55 = vunpack.i.h.bf16 %v1239_v45  ;;  %v1240_v46 = vunpack.i.l.bf16 %v1239_v45 }
 0x186   : > { %v786_v59 = vsel %vm781_vm0, %v1471_v17, %v1240_v46  ;;  %v787_v48 = vsel %vm781_vm0, %v1473_v21, %v1241_v55 }
 0x187   : > { %v1056_v49 = vpack.c.bf16 %v787_v48, %v786_v59 }
 0x189   : > { %1084 = vst [vmem:[%s1503_s6 + $0x10] sm:$0xff] %v1056_v49  }
 0x18b   : > { %v1244_v50 = vpop.permute.xlu1 %1243 }
 0x18c   : > { %v1246_v4 = vunpack.i.h.bf16 %v1244_v50  ;;  %v1245_v51 = vunpack.i.l.bf16 %v1244_v50 }
 0x18e   : > { %v788_v8 = vsel %vm781_vm0, %v1476_v30, %v1245_v51  ;;  %v789_v52 = vsel %vm781_vm0, %v1478_v34, %v1246_v4 }
 0x18f   : > { %v1061_v53 = vpack.c.bf16 %v789_v52, %v788_v8 }
 0x191   : > { %1085 = vst [vmem:[%s1503_s6 + $0x18] sm:$0xff] %v1061_v53  }
 0x193   : > { %v1249_v54 = vpop.permute.xlu0 %1248 }
 0x194   : > { %v1251_v17 = vunpack.i.h.bf16 %v1249_v54  ;;  %v1250_v56 = vunpack.i.l.bf16 %v1249_v54 }
 0x196   : > { %v790_v21 = vsel %vm781_vm0, %v1481_v43, %v1250_v56  ;;  %v791_v58 = vsel %vm781_vm0, %v1483_v47, %v1251_v17 }
 0x197   : > { %v1066_v60 = vpack.c.bf16 %v791_v58, %v790_v21 }
 0x199   : > { %1086 = vst [vmem:[%s1503_s6 + $0x20] sm:$0xff] %v1066_v60  }
 0x19b   : > { %v1254_v61 = vpop.permute.xlu1 %1253 }
 0x19c   : > { %v1256_v30 = vunpack.i.h.bf16 %v1254_v61  ;;  %v1255_v63 = vunpack.i.l.bf16 %v1254_v61 }
 0x19e   : > { %v792_v34 = vsel %vm781_vm0, %v1486_v57, %v1255_v63  ;;  %v793_v0 = vsel %vm781_vm0, %v1488_v62, %v1256_v30 }
 0x19f   : > { %v1071_v1 = vpack.c.bf16 %v793_v0, %v792_v34 }
 0x1a1   : > { %1087 = vst [vmem:[%s1503_s6 + $0x28] sm:$0xff] %v1071_v1  }
 0x1a3   : > { %v1259_v2 = vpop.permute.xlu0 %1258 }
 0x1a4   : > { %v1261_v43 = vunpack.i.h.bf16 %v1259_v2  ;;  %v1260_v3 = vunpack.i.l.bf16 %v1259_v2 }
 0x1a6   : > { %v794_v47 = vsel %vm781_vm0, %v1491_v9, %v1260_v3  ;;  %v795_v5 = vsel %vm781_vm0, %v1493_v13, %v1261_v43 }
 0x1a7   : > { %v1076_v6 = vpack.c.bf16 %v795_v5, %v794_v47 }
 0x1a9   : > { %1088 = vst [vmem:[%s1503_s6 + $0x30] sm:$0xff] %v1076_v6  }
 0x1ab   : > { %v1264_v7 = vpop.permute.xlu1 %1263 }
 0x1ac   : > { %v1266_v10 = vunpack.i.h.bf16 %v1264_v7  ;;  %v1265_v57 = vunpack.i.l.bf16 %v1264_v7 }
 0x1ae   : > { %v796_v62 = vsel %vm781_vm0, %v1496_v24, %v1265_v57  ;;  %v797_v11 = vsel %vm781_vm0, %v1153_v28, %v1266_v10 }
 0x1af   : > { %v1081_v12 = vpack.c.bf16 %v797_v11, %v796_v62 }
 0x1b1   : > { %1089 = vst [vmem:[%s1503_s6 + $0x38] sm:$0xff] %v1081_v12  }
 0x1b2 PF: > { %s13_s12 = sadd.s32 1, %s1337_s12  }
 0x1b3   : > { %p10_p4 = scmp.ge.s32.totalorder %s13_s12, 4  }
 0x1b5   :  { %12 = sbr.rel (!%p10_p4) target bundleno = 1 (0x1), region = 65 }

// kernel: encoder_sparse_forward.4
= control target key start
LH: loop header
LB: loop body
LE: loop exit
PB: predicated region body
PF: predicated region fallthrough
CT: control target
= control target key end

     0   :  { %s1720_s18 = smov 0   ;;  %s1722_s19 = smov 0   ;;  %s2060_s0 = inlined_call_operand.vmem [shape: bf16[256,256], index: 0, kind: input, shape index: {}]   ;;  %s2061_s1 = inlined_call_operand.vmem [shape: bf16[256,128], index: 1, kind: input, shape index: {}]   ;;  %s2062_s2 = inlined_call_operand.vmem [shape: f32[64,256], index: 2, kind: input, shape index: {}]   ;;  %s2063_s3 = inlined_call_operand.vmem [shape: f32[256,128], index: 3, kind: output, shape index: {0}]   ;;  %s2064_s4 = inlined_call_operand.vmem [shape: bf16[256,128], index: 4, kind: output, shape index: {1}]   ;;  %s2065_s5 = inlined_call_operand.vmem [shape: bf16[256,256], index: 5, kind: output, shape index: {2}]  }
   0x1   :  { %s1724_s20 = smov 0   ;;  %s1726_s21 = smov 0  }
   0x2   :  { %s1728_s22 = smov 0   ;;  %s1730_s23 = smov 0  }
   0x3   :  { %s1732_s24 = smov 0  }
   0x4 LB: > { %s25_s25 = sadd.s32 1, %s1678_s22  ;;  %s28_s26 = sadd.s32 1, %s1682_s23  ;;  %s1686_s24 = sphi %s1732_s24, %s16_s24   ;;  %s1682_s23 = sphi %s1730_s23, %s2071_s23   ;;  %s1678_s22 = sphi %s1728_s22, %s2070_s22   ;;  %s1674_s21 = sphi %s1726_s21, %s2069_s21   ;;  %s1670_s20 = sphi %s1724_s20, %s2068_s20   ;;  %s1666_s19 = sphi %s1722_s19, %s2067_s19   ;;  %s1662_s18 = sphi %s1720_s18, %s2066_s18  }
   0x5   : > { %p26_p0 = scmp.ge.s32.totalorder %s25_s25, 2  ;;  %p44_p1 = scmp.ne.s32.totalorder %s1666_s19, %s1662_s18 }
   0x6   : > { %p45_p2 = scmp.eq.s32.totalorder %s1686_s24, 0  ;;  %s37_s30 = sadd.s32 1, %s1666_s19 }
   0x7   : > { %s2073_s25 = smov (%p26_p0, %s25_s25), 0  ;;  %s2075_s26 = smov (!%p26_p0, %s28_s26), %s1682_s23 }
   0x8   : > { %p46_p3 = por %p45_p2, %p44_p1  ;;  %p30_p4 = scmp.ge.s32.totalorder %s2075_s26, 2 }
   0x9   : > { %s33_s27 = ssub.s32 %s1678_s22, %s2073_s25  ;;  %p1305_p6 = scmp.ge.s32.totalorder %s1686_s24, 4 }
   0xa   : > { %s2077_s26 = smov (%p30_p4, %s2075_s26), 0 }
   0xb   : > { %s32_s28 = ssub.s32 %s1682_s23, %s2077_s26  ;;  %198 = sbr.rel (%p1305_p6) target bundleno = 34 (0x22), region = 20 }
   0xc   : > { %s34_s29 = sor.u32 %s33_s27, %s32_s28 }
   0xd   : > { %p35_p5 = scmp.eq.s32.totalorder %s34_s29, 0 }
   0xf   : > { %s1771_s6 = scalar_select %p35_p5, %s1666_s19, %s37_s30  }
  0x12   : > { %201 = sbr.rel (!%p46_p3) target bundleno = 34 (0x22), region = 24  ;;  %s203_s7 = sand.u32 (%p46_p3), 1, %s1666_s19  }
  0x13   : > { %s1389_s8 = sshll.u32 (%p46_p3), %s1682_s23, 5  ;;  %s1306_s9 = sshll.u32 (%p46_p3), %s203_s7, 6 }
  0x14   : > { %s208_s10 = sadd.s32 (%p46_p3), %s1678_s22, %s1389_s8  ;;  %s205_s15 = scalar_lea.vmem (%p46_p3), [#allocation2], %s1306_s9 }
  0x15   : > { %s1309_s11 = sshll.u32 (%p46_p3), %s208_s10, 2 }
  0x16   : > { %s1780_s14 = scalar_lea.vmem (%p46_p3), %s2060_s0, %s1309_s11 }
  0x17   : > { %v226_v0 = vld [vmem:[%s1780_s14] sm:$0xf] (%p46_p3)  ;;  %v228_v1 = vld [vmem:[%s1780_s14 + $0x8] sm:$0xf] (%p46_p3)  ;;  %v230_v2 = vld [vmem:[%s1780_s14 + $0x10] sm:$0xf] (%p46_p3) }
  0x18   : > { %227 = vst [vmem:[%s205_s15] sm:$0xf] (%p46_p3), %v226_v0  ;;  %229 = vst [vmem:[%s205_s15 + $0x4] sm:$0xf] (%p46_p3), %v228_v1  ;;  %v232_v3 = vld [vmem:[%s1780_s14 + $0x18] sm:$0xf] (%p46_p3) }
  0x19   : > { %231 = vst [vmem:[%s205_s15 + $0x8] sm:$0xf] %v230_v2  ;;  %v234_v4 = vld [vmem:[%s1780_s14 + $0x20] sm:$0xf]  ;;  %v236_v5 = vld [vmem:[%s1780_s14 + $0x28] sm:$0xf] }
  0x1a   : > { %233 = vst [vmem:[%s205_s15 + $0xc] sm:$0xf] %v232_v3  ;;  %235 = vst [vmem:[%s205_s15 + $0x10] sm:$0xf] %v234_v4  ;;  %v238_v6 = vld [vmem:[%s1780_s14 + $0x30] sm:$0xf] }
  0x1b   : > { %237 = vst [vmem:[%s205_s15 + $0x14] sm:$0xf] %v236_v5  ;;  %v240_v7 = vld [vmem:[%s1780_s14 + $0x38] sm:$0xf]  ;;  %v242_v8 = vld [vmem:[%s1780_s14 + $0x40] sm:$0xf] }
  0x1c   : > { %239 = vst [vmem:[%s205_s15 + $0x18] sm:$0xf] %v238_v6  ;;  %241 = vst [vmem:[%s205_s15 + $0x1c] sm:$0xf] %v240_v7  ;;  %v244_v9 = vld [vmem:[%s1780_s14 + $0x48] sm:$0xf] }
  0x1d   : > { %243 = vst [vmem:[%s205_s15 + $0x20] sm:$0xf] %v242_v8  ;;  %v246_v10 = vld [vmem:[%s1780_s14 + $0x50] sm:$0xf]  ;;  %v248_v11 = vld [vmem:[%s1780_s14 + $0x58] sm:$0xf] }
  0x1e   : > { %245 = vst [vmem:[%s205_s15 + $0x24] sm:$0xf] %v244_v9  ;;  %247 = vst [vmem:[%s205_s15 + $0x28] sm:$0xf] %v246_v10  ;;  %v250_v12 = vld [vmem:[%s1780_s14 + $0x60] sm:$0xf] }
  0x1f   : > { %249 = vst [vmem:[%s205_s15 + $0x2c] sm:$0xf] %v248_v11  ;;  %v252_v13 = vld [vmem:[%s1780_s14 + $0x68] sm:$0xf]  ;;  %v254_v14 = vld [vmem:[%s1780_s14 + $0x70] sm:$0xf] }
  0x20   : > { %251 = vst [vmem:[%s205_s15 + $0x30] sm:$0xf] %v250_v12  ;;  %253 = vst [vmem:[%s205_s15 + $0x34] sm:$0xf] %v252_v13  ;;  %v256_v15 = vld [vmem:[%s1780_s14 + $0x78] sm:$0xf] }
  0x21   : > { %255 = vst [vmem:[%s205_s15 + $0x38] sm:$0xf] %v254_v14  ;;  %257 = vst [vmem:[%s205_s15 + $0x3c] sm:$0xf] %v256_v15 }
  0x22 PF: > { %p1310_p7 = scmp.ge.s32.totalorder %s1686_s24, 1  ;;  %p320_p8 = scmp.lt.s32.totalorder %s1686_s24, 5 }
  0x24   : > { %p321_p9 = pnand %p1310_p7, %p320_p8 }
  0x25   : > { %s327_s16 = sand.u32 (!%p321_p9), 1, %s1662_s18   ;;  %s1312_s17 = sshll.u32 (!%p321_p9), %s1670_s20, 4 }
  0x26   : > { %324 = sbr.rel (%p321_p9) target bundleno = 562 (0x232), region = 69  ;;  %s1311_s27 = sshll.u32 (!%p321_p9), %s327_s16, 6 }
  0x27   : > { %p372_p10 = scmp.lt.s32.totalorder (!%p321_p9), %s1312_s17, 31  ;;  %s1314_s28 = sshll.u32 (!%p321_p9), %s1674_s21, 4 }
  0x28   : > { %p378_p11 = scmp.lt.s32.totalorder (!%p321_p9), %s1314_s28, 31  ;;  %p1321_p12 = scmp.ne.s32.totalorder (!%p321_p9), %s1670_s20, 0 }
  0x2d   : > { %s2079_s17 = smov (!%p372_p10, %s1312_s17), 31  ;;  %s2081_s28 = smov (!%p378_p11, %s1314_s28), 31 }
  0x2e   : > { %s1313_s29 = sshll.u32 %s2079_s17, 2  ;;  %s1315_s9 = sshll.u32 %s2081_s28, 3  ;;  %v1688_v16 = vmov (!%p1321_p12), 0.0  }
  0x2f   : > { %s1806_s8 = scalar_lea.vmem %s2061_s1, %s1313_s29  ;;  %s1317_s10 = sshll.u32 %s2081_s28, 2 }
  0x30   : > { %s1811_s13 = scalar_lea.vmem %s2063_s3, %s1315_s9  ;;  %s1816_s21 = scalar_lea.vmem %s2064_s4, %s1317_s10 }
  0x31   : > { %s1821_s17 = scalar_lea.vmem %s2065_s5, %s1315_s9  ;;  %s1823_s29 = scalar_lea.vmem [#allocation2], %s1311_s27  ;;  %401 = vst [vmem:[%s1811_s13] sm:$0xff] (!%p1321_p12), %v1688_v16  ;;  %402 = vst [vmem:[%s1811_s13 + $0x8] sm:$0xff] (!%p1321_p12), %v1688_v16 }
  0x32   : > { %400 = sbr.rel (%p1321_p12) target bundleno = 57 (0x39), region = 77  ;;  %403 = vst [vmem:[%s1811_s13 + $0x10] sm:$0xff] (!%p1321_p12), %v1688_v16  ;;  %404 = vst [vmem:[%s1811_s13 + $0x18] sm:$0xff] (!%p1321_p12), %v1688_v16 }
  0x33   : > { %405 = vst [vmem:[%s1811_s13 + $0x20] sm:$0xff] (!%p1321_p12), %v1688_v16  ;;  %406 = vst [vmem:[%s1811_s13 + $0x28] sm:$0xff] (!%p1321_p12), %v1688_v16 }
  0x34   : > { %407 = vst [vmem:[%s1811_s13 + $0x30] sm:$0xff] (!%p1321_p12), %v1688_v16  ;;  %408 = vst [vmem:[%s1811_s13 + $0x38] sm:$0xff] (!%p1321_p12), %v1688_v16 }
  0x35   : > { %409 = vst [vmem:[%s1811_s13 + $0x40] sm:$0xff] (!%p1321_p12), %v1688_v16  ;;  %410 = vst [vmem:[%s1811_s13 + $0x48] sm:$0xff] (!%p1321_p12), %v1688_v16 }
  0x36   : > { %411 = vst [vmem:[%s1811_s13 + $0x50] sm:$0xff] (!%p1321_p12), %v1688_v16  ;;  %412 = vst [vmem:[%s1811_s13 + $0x58] sm:$0xff] (!%p1321_p12), %v1688_v16 }
  0x37   : > { %413 = vst [vmem:[%s1811_s13 + $0x60] sm:$0xff] (!%p1321_p12), %v1688_v16  ;;  %414 = vst [vmem:[%s1811_s13 + $0x68] sm:$0xff] (!%p1321_p12), %v1688_v16 }
  0x38   : > { %415 = vst [vmem:[%s1811_s13 + $0x70] sm:$0xff] (!%p1321_p12), %v1688_v16  ;;  %416 = vst [vmem:[%s1811_s13 + $0x78] sm:$0xff] (!%p1321_p12), %v1688_v16 }
  0x39 PF: > { %v1616_v17 = vld [vmem:[%s1806_s8] sm:$0xff]   ;;  %v1617_v18 = vld [vmem:[%s1806_s8 + $0x8] sm:$0xff]   ;;  %v1618_v19 = vld [vmem:[%s1806_s8 + $0x10] sm:$0xff]   ;;  %p1338_p13 = scmp.ne.s32.totalorder %s1670_s20, 1 }
  0x3a   : > { %1486 = vmatprep.subr.bf16.mxu0 %v1616_v17  ;;  %1534 = vmatprep.subr.bf16.mxu1 %v1616_v17  ;;  %v1619_v20 = vld [vmem:[%s1806_s8 + $0x18] sm:$0xff]   ;;  %v1624_v21 = vld [vmem:[%s1823_s29] sm:$0xff]   ;;  %v1621_v24 = vld [vmem:[%s1806_s8 + $0x28] sm:$0xff]   ;;  %vm822_vm0 = vcmask (!%p1338_p13), 523264  }
  0x3b   : > { %1487 = vmatpush3.bf16.msra.mxu0 %v1616_v17  ;;  %1542 = vmatpush3.bf16.msra.mxu1 %v1616_v17  ;;  %v1625_v22 = vld [vmem:[%s1823_s29 + $0x20] sm:$0xff]   ;;  %v1622_v25 = vld [vmem:[%s1806_s8 + $0x30] sm:$0xff]   ;;  %v1623_v26 = vld [vmem:[%s1806_s8 + $0x38] sm:$0xff]  }
  0x3c   : > { %1488 = vmatprep.subr.bf16.mxu0 %v1617_v18  ;;  %1535 = vmatprep.subr.bf16.mxu1 %v1617_v18  ;;  %v1620_v23 = vld [vmem:[%s1806_s8 + $0x20] sm:$0xff]   ;;  %v1626_v27 = vld [vmem:[%s1823_s29 + $0x8] sm:$0xff]   ;;  %v1628_v29 = vld [vmem:[%s1823_s29 + $0x10] sm:$0xff]  }
  0x3d   : > { %1502 = vmatprep.mubr.bf16.mxu0 %v1624_v21  ;;  %1510 = vmatprep.mubr.bf16.mxu1 %v1625_v22  ;;  %v1627_v28 = vld [vmem:[%s1823_s29 + $0x28] sm:$0xff]   ;;  %v1629_v30 = vld [vmem:[%s1823_s29 + $0x30] sm:$0xff]   ;;  %v1630_v31 = vld [vmem:[%s1823_s29 + $0x18] sm:$0xff]  }
  0x3e   : > { %v1631_v32 = vld [vmem:[%s1823_s29 + $0x38] sm:$0xff]   ;;  %v419_v33 = vld [vmem:[%s1811_s13 + $0x10] sm:$0xff]  ;;  %v417_v35 = vld [vmem:[%s1811_s13] sm:$0xff] }
  0x3f   : > { %1489 = vmatpush3.bf16.msra.mxu0 %v1617_v18  ;;  %1543 = vmatpush3.bf16.msra.mxu1 %v1617_v18  ;;  %v427_v34 = vld [vmem:[%s1811_s13 + $0x50] sm:$0xff]  ;;  %v425_v36 = vld [vmem:[%s1811_s13 + $0x40] sm:$0xff]  ;;  %v420_v39 = vld [vmem:[%s1811_s13 + $0x18] sm:$0xff] }
  0x40   : > { %1490 = vmatprep.subr.bf16.mxu0 %v1618_v19  ;;  %1536 = vmatprep.subr.bf16.mxu1 %v1618_v19  ;;  %v428_v40 = vld [vmem:[%s1811_s13 + $0x58] sm:$0xff]  ;;  %v418_v45 = vld [vmem:[%s1811_s13 + $0x8] sm:$0xff]  ;;  %v423_v57 = vld [vmem:[%s1811_s13 + $0x30] sm:$0xff] }
  0x41   : > { %v426_v46 = vld [vmem:[%s1811_s13 + $0x48] sm:$0xff]  ;;  %v431_v58 = vld [vmem:[%s1811_s13 + $0x70] sm:$0xff]  ;;  %v421_v59 = vld [vmem:[%s1811_s13 + $0x20] sm:$0xff] }
  0x42   : > { %v429_v60 = vld [vmem:[%s1811_s13 + $0x60] sm:$0xff]  ;;  %v424_v63 = vld [vmem:[%s1811_s13 + $0x38] sm:$0xff]  ;;  %v422_v5 = vld [vmem:[%s1811_s13 + $0x28] sm:$0xff] }
  0x43   : > { %1491 = vmatpush3.bf16.msra.mxu0 %v1618_v19  ;;  %1544 = vmatpush3.bf16.msra.mxu1 %v1618_v19  ;;  %v432_v0 = vld [vmem:[%s1811_s13 + $0x78] sm:$0xff]  ;;  %v430_v6 = vld [vmem:[%s1811_s13 + $0x68] sm:$0xff]  ;;  %v806_v19 = vld [vmem:[%s2062_s2] sm:$0xff] (!%p1338_p13) }
  0x44   : > { %1492 = vmatprep.subr.bf16.mxu0 %v1619_v20  ;;  %1537 = vmatprep.subr.bf16.mxu1 %v1619_v20  ;;  %v807_v17 = vld [vmem:[%s2062_s2 + $0x8] sm:$0xff] (!%p1338_p13)  ;;  %v809_v18 = vld [vmem:[%s2062_s2 + $0x18] sm:$0xff] (!%p1338_p13)  ;;  %v808_v21 = vld [vmem:[%s2062_s2 + $0x10] sm:$0xff] (!%p1338_p13) }
  0x45   : > { %v811_v22 = vld [vmem:[%s2062_s2 + $0x28] sm:$0xff] (!%p1338_p13) }
  0x47   : > { %1493 = vmatpush3.bf16.msra.mxu0 %v1619_v20  ;;  %1545 = vmatpush3.bf16.msra.mxu1 %v1619_v20  ;;  %v1518_v20 = vpack.c.bf16 (!%p1338_p13), %v809_v18, %v807_v17 }
  0x48   : > { %1494 = vmatprep.subr.bf16.mxu0 %v1620_v23  ;;  %1538 = vmatprep.subr.bf16.mxu1 %v1620_v23 }
  0x4b   : > { %1495 = vmatpush3.bf16.msra.mxu0 %v1620_v23  ;;  %1546 = vmatpush3.bf16.msra.mxu1 %v1620_v23  ;;  %v813_v23 = vld [vmem:[%s2062_s2 + $0x38] sm:$0xff] (!%p1338_p13) }
  0x4c   : > { %1496 = vmatprep.subr.bf16.mxu0 %v1621_v24  ;;  %1539 = vmatprep.subr.bf16.mxu1 %v1621_v24 }
  0x4f   : > { %1497 = vmatpush3.bf16.msra.mxu0 %v1621_v24  ;;  %1547 = vmatpush3.bf16.msra.mxu1 %v1621_v24  ;;  %v1689_v24 = vmov (!%p1338_p13), 0.0  }
  0x50   : > { %1498 = vmatprep.subr.bf16.mxu0 %v1622_v25  ;;  %1540 = vmatprep.subr.bf16.mxu1 %v1622_v25 }
  0x53   : > { %1499 = vmatpush3.bf16.msra.mxu0 %v1622_v25  ;;  %1548 = vmatpush3.bf16.msra.mxu1 %v1622_v25  ;;  %v1520_v25 = vpack.c.bf16 (!%p1338_p13), %v808_v21, %v806_v19 }
  0x54   : > { %1500 = vmatprep.subr.bf16.mxu0 %v1623_v26  ;;  %1541 = vmatprep.subr.bf16.mxu1 %v1623_v26 }
  0x57   : > { %1501 = vmatpush3.bf16.msra.mxu0 %v1623_v26  ;;  %1549 = vmatpush3.bf16.msra.mxu1 %v1623_v26  ;;  %v1522_v26 = vpack.c.bf16 (!%p1338_p13), %v813_v23, %v811_v22 }
  0x58   : > { %1519 = vmatprep.subr.bf16.mxu0 (!%p1338_p13), %v1518_v20  ;;  %1550 = vmatprep.subr.bf16.mxu1 (!%p1338_p13), %v1518_v20 }
  0x5a   : > { %1503 = vmatmul.mubr.bf16.vlgmr.msra.gmra.mrb[0].mxu0 %v1626_v27  ;;  %1511 = vmatmul.mubr.bf16.vlgmr.msra.gmra.mrb[0].mxu1 %v1627_v28  ;;  %v810_v27 = vld [vmem:[%s2062_s2 + $0x20] sm:$0xff] (!%p1338_p13)  ;;  %v812_v28 = vld [vmem:[%s2062_s2 + $0x30] sm:$0xff] (!%p1338_p13) }
  0x5b   : > { %1506 = vmatprep.mubr.bf16.mxu0 %v1628_v29  ;;  %1514 = vmatprep.mubr.bf16.mxu1 %v1629_v30  ;;  %v815_v29 = vld [vmem:[%s2062_s2 + $0x48] sm:$0xff] (!%p1338_p13)  ;;  %v817_v30 = vld [vmem:[%s2062_s2 + $0x58] sm:$0xff] (!%p1338_p13) }
  0x5c   : > { %1521 = vmatpush1.bf16.msra.mxu0 (!%p1338_p13), %v1520_v25  ;;  %1554 = vmatpush1.bf16.msra.mxu1 (!%p1338_p13), %v1520_v25 }
  0x5d   : > { %1523 = vmatprep.subr.bf16.mxu0 (!%p1338_p13), %v1522_v26  ;;  %1551 = vmatprep.subr.bf16.mxu1 (!%p1338_p13), %v1522_v26 }
  0x62   : > { %1507 = vmatmul.mubr.bf16.gmra.mrb[4].mxu0 %v1630_v31  ;;  %1515 = vmatmul.mubr.bf16.gmra.mrb[4].mxu1 %v1631_v32  ;;  %v1524_v31 = vpack.c.bf16 (!%p1338_p13), %v812_v28, %v810_v27  ;;  %v814_v32 = vld [vmem:[%s2062_s2 + $0x40] sm:$0xff] (!%p1338_p13) }
  0x63   : > { %935 = vmatprep.mubr.f32.mxu0 (!%p1338_p13), %v1689_v24  ;;  %983 = vmatprep.mubr.f32.mxu1 (!%p1338_p13), %v1689_v24 }
  0x64   : > { %1525 = vmatpush1.bf16.msra.mxu0 (!%p1338_p13), %v1524_v31  ;;  %1555 = vmatpush1.bf16.msra.mxu1 (!%p1338_p13), %v1524_v31 }
 0x12d   : > { %v1504_v37 = vpop.f32.mrb[0].mxu0  ;;  %v1512_v38 = vpop.f32.mrb[0].mxu1 }
 0x12e   : > { %v660_v41 = vadd.f32 %v1504_v37, %v419_v33  ;;  %v668_v42 = vadd.f32 %v1512_v38, %v427_v34  ;;  %v595_v43 = vpop.f32.mrb[1].mxu0  ;;  %v627_v44 = vpop.f32.mrb[1].mxu1  ;;  %v816_v33 = vld [vmem:[%s2062_s2 + $0x50] sm:$0xff] (!%p1338_p13)  ;;  %v819_v34 = vld [vmem:[%s2062_s2 + $0x68] sm:$0xff] (!%p1338_p13) }
 0x12f   : > { %v658_v47 = vadd.f32 %v595_v43, %v417_v35  ;;  %v666_v48 = vadd.f32 %v627_v44, %v425_v36  ;;  %v1505_v49 = vpop.f32.mrb[2].mxu0  ;;  %v1513_v50 = vpop.f32.mrb[2].mxu1  ;;  %v1526_v35 = vpack.c.bf16 (!%p1338_p13), %v817_v30, %v815_v29  ;;  %v821_v36 = vld [vmem:[%s2062_s2 + $0x78] sm:$0xff] (!%p1338_p13)  ;;  %v1528_v44 = vpack.c.bf16 (!%p1338_p13), %v816_v33, %v814_v32 }
 0x130   : > { %676 = vst [vmem:[%s1811_s13 + $0x10] sm:$0xff] %v660_v41  ;;  %684 = vst [vmem:[%s1811_s13 + $0x50] sm:$0xff] %v668_v42  ;;  %v661_v51 = vadd.f32 %v1505_v49, %v420_v39  ;;  %v669_v52 = vadd.f32 %v1513_v50, %v428_v40  ;;  %v598_v53 = vpop.f32.mrb[3].mxu0  ;;  %v630_v54 = vpop.f32.mrb[3].mxu1 }
 0x131   : > { %674 = vst [vmem:[%s1811_s13] sm:$0xff] %v658_v47  ;;  %682 = vst [vmem:[%s1811_s13 + $0x40] sm:$0xff] %v666_v48  ;;  %v659_v55 = vadd.f32 %v598_v53, %v418_v45  ;;  %v667_v56 = vadd.f32 %v630_v54, %v426_v46  ;;  %v818_v45 = vld [vmem:[%s2062_s2 + $0x60] sm:$0xff] (!%p1338_p13)  ;;  %v820_v53 = vld [vmem:[%s2062_s2 + $0x70] sm:$0xff] (!%p1338_p13)  ;;  %1527 = vmatprep.subr.bf16.mxu0 (!%p1338_p13), %v1526_v35  ;;  %1552 = vmatprep.subr.bf16.mxu1 (!%p1338_p13), %v1526_v35 }
 0x132   : > { %677 = vst [vmem:[%s1811_s13 + $0x18] sm:$0xff] %v661_v51  ;;  %685 = vst [vmem:[%s1811_s13 + $0x58] sm:$0xff] %v669_v52  ;;  %v1530_v52 = vpack.c.bf16 (!%p1338_p13), %v821_v36, %v819_v34  ;;  %1529 = vmatpush1.bf16.msra.mxu0 (!%p1338_p13), %v1528_v44  ;;  %1556 = vmatpush1.bf16.msra.mxu1 (!%p1338_p13), %v1528_v44 }
 0x133   : > { %675 = vst [vmem:[%s1811_s13 + $0x8] sm:$0xff] %v659_v55  ;;  %683 = vst [vmem:[%s1811_s13 + $0x48] sm:$0xff] %v667_v56 }
 0x134   : > { %1531 = vmatprep.subr.bf16.mxu0 (!%p1338_p13), %v1530_v52  ;;  %1553 = vmatprep.subr.bf16.mxu1 (!%p1338_p13), %v1530_v52 }
 0x135   : > { %v1508_v61 = vpop.f32.mrb[4].mxu0  ;;  %v1516_v62 = vpop.f32.mrb[4].mxu1  ;;  %693 = sbr.rel (%p1338_p13) target bundleno = 562 (0x232), region = 81 }
 0x136   : > { %v664_v1 = vadd.f32 %v1508_v61, %v423_v57  ;;  %v672_v2 = vadd.f32 %v1516_v62, %v431_v58  ;;  %v611_v3 = vpop.f32.mrb[5].mxu0  ;;  %v643_v4 = vpop.f32.mrb[5].mxu1 }
 0x137   : > { %v662_v7 = vadd.f32 %v611_v3, %v421_v59  ;;  %v670_v8 = vadd.f32 %v643_v4, %v429_v60  ;;  %v1509_v9 = vpop.f32.mrb[6].mxu0  ;;  %v1517_v10 = vpop.f32.mrb[6].mxu1  ;;  %v1950_v43 = vld [vmem:[%s1811_s13 + $0x10] sm:$0xff] (!%p1338_p13) }
 0x138   : > { %680 = vst [vmem:[%s1811_s13 + $0x30] sm:$0xff] %v664_v1  ;;  %688 = vst [vmem:[%s1811_s13 + $0x70] sm:$0xff] %v672_v2  ;;  %v665_v11 = vadd.f32 %v1509_v9, %v424_v63  ;;  %v673_v12 = vadd.f32 %v1517_v10, %v432_v0  ;;  %v614_v13 = vpop.f32.mrb[7].mxu0  ;;  %v646_v14 = vpop.f32.mrb[7].mxu1  ;;  %v1936_v37 = vld [vmem:[%s1811_s13] sm:$0xff] (!%p1338_p13)  ;;  %v712_v48 = vmax.f32 (!%p1338_p13), %v1950_v43, 0.0 }
 0x139   : > { %678 = vst [vmem:[%s1811_s13 + $0x20] sm:$0xff] %v662_v7  ;;  %686 = vst [vmem:[%s1811_s13 + $0x60] sm:$0xff] %v670_v8  ;;  %v663_v15 = vadd.f32 %v614_v13, %v422_v5  ;;  %v671_v16 = vadd.f32 %v646_v14, %v430_v6  ;;  %v1939_v38 = vld [vmem:[%s1811_s13 + $0x40] sm:$0xff] (!%p1338_p13)  ;;  %v710_v39 = vmax.f32 (!%p1338_p13), %v1936_v37, 0.0  ;;  %v704_v49 = vld [vmem:[%s1811_s13 + $0x50] sm:$0xff] (!%p1338_p13)  ;;  %v1532_v13 = vpack.c.bf16 (!%p1338_p13), %v820_v53, %v818_v45 }
 0x13a   : > { %681 = vst [vmem:[%s1811_s13 + $0x38] sm:$0xff] %v665_v11  ;;  %689 = vst [vmem:[%s1811_s13 + $0x78] sm:$0xff] %v673_v12  ;;  %v718_v40 = vmax.f32 (!%p1338_p13), %v1939_v38, 0.0  ;;  %v1944_v41 = vld [vmem:[%s1811_s13 + $0x8] sm:$0xff] (!%p1338_p13)  ;;  %v1960_v50 = vld [vmem:[%s1811_s13 + $0x18] sm:$0xff] (!%p1338_p13)  ;;  %v720_v54 = vmax.f32 (!%p1338_p13), %v704_v49, 0.0 }
 0x13b   : > { %679 = vst [vmem:[%s1811_s13 + $0x28] sm:$0xff] %v663_v15  ;;  %687 = vst [vmem:[%s1811_s13 + $0x68] sm:$0xff] %v671_v16  ;;  %v1947_v42 = vld [vmem:[%s1811_s13 + $0x48] sm:$0xff] (!%p1338_p13)  ;;  %v711_v46 = vmax.f32 (!%p1338_p13), %v1944_v41, 0.0  ;;  %v1963_v51 = vld [vmem:[%s1811_s13 + $0x58] sm:$0xff] (!%p1338_p13)  ;;  %v713_v55 = vmax.f32 (!%p1338_p13), %v1960_v50, 0.0  ;;  %1533 = vmatpush1.bf16.msra.mxu0 (!%p1338_p13), %v1532_v13  ;;  %1557 = vmatpush1.bf16.msra.mxu1 (!%p1338_p13), %v1532_v13 }
 0x13c   : > { %v719_v47 = vmax.f32 %v1947_v42, 0.0  ;;  %v721_v56 = vmax.f32 %v1963_v51, 0.0 }
 0x13d   : > { %v1426_v59 = vpack.c.bf16 %v711_v46, %v710_v39  ;;  %v1431_v2 = vpack.c.bf16 %v713_v55, %v712_v48 }
 0x13e   : > { %v1446_v60 = vpack.c.bf16 %v719_v47, %v718_v40  ;;  %v1451_v3 = vpack.c.bf16 %v721_v56, %v720_v54  ;;  %1355 = vmatmul.mubr.msk.f32.vlgmr.msra.gmra.mrb[0].mxu0 %vm822_vm0, %v1936_v37  ;;  %1363 = vmatmul.mubr.msk.f32.vlgmr.msra.gmra.mrb[0].mxu1 %vm822_vm0, %v1939_v38 }
 0x13f   : > { %v700_v1 = vld [vmem:[%s1811_s13 + $0x30] sm:$0xff]  ;;  %1427 = vst [vmem:[%s1816_s21] sm:$0xff] %v1426_v59   ;;  %1463 = vst [vmem:[%s1816_s21 + $0x8] sm:$0xff] %v1431_v2   ;;  %941 = vmatprep.mubr.f32.mxu0 %v1689_v24  ;;  %989 = vmatprep.mubr.f32.mxu1 %v1689_v24 }
 0x140   : > { %v698_v57 = vld [vmem:[%s1811_s13 + $0x20] sm:$0xff]  ;;  %v708_v6 = vld [vmem:[%s1811_s13 + $0x70] sm:$0xff]  ;;  %1466 = vst [vmem:[%s1816_s21 + $0x20] sm:$0xff] %v1446_v60   ;;  %v716_v9 = vmax.f32 %v700_v1, 0.0  ;;  %1467 = vst [vmem:[%s1816_s21 + $0x28] sm:$0xff] %v1451_v3  }
 0x141   : > { %v706_v58 = vld [vmem:[%s1811_s13 + $0x60] sm:$0xff]  ;;  %v714_v61 = vmax.f32 %v698_v57, 0.0  ;;  %v701_v7 = vld [vmem:[%s1811_s13 + $0x38] sm:$0xff]  ;;  %v724_v10 = vmax.f32 %v708_v6, 0.0 }
 0x142   : > { %v722_v62 = vmax.f32 %v706_v58, 0.0  ;;  %v699_v63 = vld [vmem:[%s1811_s13 + $0x28] sm:$0xff]  ;;  %v709_v8 = vld [vmem:[%s1811_s13 + $0x78] sm:$0xff]  ;;  %v717_v11 = vmax.f32 %v701_v7, 0.0  ;;  %1356 = vmatmul.mubr.msk.f32.gmra.mrb[2].mxu0 %vm822_vm0, %v1944_v41  ;;  %1364 = vmatmul.mubr.msk.f32.gmra.mrb[2].mxu1 %vm822_vm0, %v1947_v42 }
 0x143   : > { %v707_v0 = vld [vmem:[%s1811_s13 + $0x68] sm:$0xff]  ;;  %v715_v4 = vmax.f32 %v699_v63, 0.0  ;;  %v725_v12 = vmax.f32 %v709_v8, 0.0  ;;  %947 = vmatprep.mubr.f32.mxu0 %v1689_v24  ;;  %995 = vmatprep.mubr.f32.mxu1 %v1689_v24 }
 0x144   : > { %v723_v5 = vmax.f32 %v707_v0, 0.0  ;;  %v1441_v16 = vpack.c.bf16 %v717_v11, %v716_v9 }
 0x145   : > { %v1436_v14 = vpack.c.bf16 %v715_v4, %v714_v61  ;;  %v1461_v17 = vpack.c.bf16 %v725_v12, %v724_v10 }
 0x146   : > { %v1456_v15 = vpack.c.bf16 %v723_v5, %v722_v62  ;;  %1465 = vst [vmem:[%s1816_s21 + $0x18] sm:$0xff] %v1441_v16   ;;  %1357 = vmatmul.mubr.msk.f32.gmra.mrb[4].mxu0 %vm822_vm0, %v1950_v43  ;;  %1365 = vmatmul.mubr.msk.f32.gmra.mrb[4].mxu1 %vm822_vm0, %v704_v49 }
 0x147   : > { %1464 = vst [vmem:[%s1816_s21 + $0x10] sm:$0xff] %v1436_v14   ;;  %1469 = vst [vmem:[%s1816_s21 + $0x38] sm:$0xff] %v1461_v17   ;;  %953 = vmatprep.mubr.f32.mxu0 %v1689_v24  ;;  %1001 = vmatprep.mubr.f32.mxu1 %v1689_v24 }
 0x148   : > { %1468 = vst [vmem:[%s1816_s21 + $0x30] sm:$0xff] %v1456_v15  }
 0x14a   : > { %1358 = vmatmul.mubr.msk.f32.gmra.mrb[6].mxu0 %vm822_vm0, %v1960_v50  ;;  %1366 = vmatmul.mubr.msk.f32.gmra.mrb[6].mxu1 %vm822_vm0, %v1963_v51 }
 0x14b   : > { %959 = vmatprep.mubr.f32.mxu0 %v1689_v24  ;;  %1007 = vmatprep.mubr.f32.mxu1 %v1689_v24 }
 0x14e   : > { %1359 = vmatmul.mubr.msk.f32.gmra.mrb[8].mxu0 %vm822_vm0, %v698_v57  ;;  %1367 = vmatmul.mubr.msk.f32.gmra.mrb[8].mxu1 %vm822_vm0, %v706_v58 }
 0x14f   : > { %965 = vmatprep.mubr.f32.mxu0 %v1689_v24  ;;  %1013 = vmatprep.mubr.f32.mxu1 %v1689_v24 }
 0x152   : > { %1360 = vmatmul.mubr.msk.f32.gmra.mrb[10].mxu0 %vm822_vm0, %v699_v63  ;;  %1368 = vmatmul.mubr.msk.f32.gmra.mrb[10].mxu1 %vm822_vm0, %v707_v0 }
 0x153   : > { %971 = vmatprep.mubr.f32.mxu0 %v1689_v24  ;;  %1019 = vmatprep.mubr.f32.mxu1 %v1689_v24 }
 0x156   : > { %1361 = vmatmul.mubr.msk.f32.gmra.mrb[12].mxu0 %vm822_vm0, %v700_v1  ;;  %1369 = vmatmul.mubr.msk.f32.gmra.mrb[12].mxu1 %vm822_vm0, %v708_v6 }
 0x157   : > { %977 = vmatprep.mubr.f32.mxu0 %v1689_v24  ;;  %1025 = vmatprep.mubr.f32.mxu1 %v1689_v24 }
 0x15a   : > { %1362 = vmatmul.mubr.msk.f32.gmra.mrb[14].mxu0 %vm822_vm0, %v701_v7  ;;  %1370 = vmatmul.mubr.msk.f32.gmra.mrb[14].mxu1 %vm822_vm0, %v709_v8 }
 0x211   : > { %v937_v18 = vpop.f32.mrb[0].mxu0  ;;  %v985_v19 = vpop.f32.mrb[0].mxu1 }
 0x212   : > { %v939_v20 = vpop.f32.mrb[1].mxu0  ;;  %v987_v21 = vpop.f32.mrb[1].mxu1 }
 0x213   : > { %v1407_v22 = vpack.c.bf16 %v939_v20, %v937_v18  ;;  %v1415_v23 = vpack.c.bf16 %v987_v21, %v985_v19 }
 0x215   : > { %1128 = vst [vmem:[%s1821_s17] sm:$0xff] %v1407_v22  ;;  %1136 = vst [vmem:[%s1821_s17 + $0x40] sm:$0xff] %v1415_v23  ;;  %v943_v25 = vpop.f32.mrb[2].mxu0  ;;  %v991_v26 = vpop.f32.mrb[2].mxu1 }
 0x216   : > { %v945_v27 = vpop.f32.mrb[3].mxu0  ;;  %v993_v24 = vpop.f32.mrb[3].mxu1 }
 0x217   : > { %v1408_v28 = vpack.c.bf16 %v945_v27, %v943_v25  ;;  %v1416_v29 = vpack.c.bf16 %v993_v24, %v991_v26 }
 0x219   : > { %1129 = vst [vmem:[%s1821_s17 + $0x8] sm:$0xff] %v1408_v28  ;;  %1137 = vst [vmem:[%s1821_s17 + $0x48] sm:$0xff] %v1416_v29  ;;  %v949_v30 = vpop.f32.mrb[4].mxu0  ;;  %v997_v31 = vpop.f32.mrb[4].mxu1 }
 0x21a   : > { %v951_v32 = vpop.f32.mrb[5].mxu0  ;;  %v999_v33 = vpop.f32.mrb[5].mxu1 }
 0x21b   : > { %v1409_v34 = vpack.c.bf16 %v951_v32, %v949_v30  ;;  %v1417_v35 = vpack.c.bf16 %v999_v33, %v997_v31 }
 0x21d   : > { %1130 = vst [vmem:[%s1821_s17 + $0x10] sm:$0xff] %v1409_v34  ;;  %1138 = vst [vmem:[%s1821_s17 + $0x50] sm:$0xff] %v1417_v35  ;;  %v955_v36 = vpop.f32.mrb[6].mxu0  ;;  %v1003_v37 = vpop.f32.mrb[6].mxu1 }
 0x21e   : > { %v957_v38 = vpop.f32.mrb[7].mxu0  ;;  %v1005_v39 = vpop.f32.mrb[7].mxu1 }
 0x21f   : > { %v1410_v40 = vpack.c.bf16 %v957_v38, %v955_v36  ;;  %v1418_v41 = vpack.c.bf16 %v1005_v39, %v1003_v37 }
 0x221   : > { %1131 = vst [vmem:[%s1821_s17 + $0x18] sm:$0xff] %v1410_v40  ;;  %1139 = vst [vmem:[%s1821_s17 + $0x58] sm:$0xff] %v1418_v41  ;;  %v961_v42 = vpop.f32.mrb[8].mxu0  ;;  %v1009_v43 = vpop.f32.mrb[8].mxu1 }
 0x222   : > { %v963_v44 = vpop.f32.mrb[9].mxu0  ;;  %v1011_v45 = vpop.f32.mrb[9].mxu1 }
 0x223   : > { %v1411_v46 = vpack.c.bf16 %v963_v44, %v961_v42  ;;  %v1419_v47 = vpack.c.bf16 %v1011_v45, %v1009_v43 }
 0x225   : > { %1132 = vst [vmem:[%s1821_s17 + $0x20] sm:$0xff] %v1411_v46  ;;  %1140 = vst [vmem:[%s1821_s17 + $0x60] sm:$0xff] %v1419_v47  ;;  %v967_v48 = vpop.f32.mrb[10].mxu0  ;;  %v1015_v49 = vpop.f32.mrb[10].mxu1 }
 0x226   : > { %v969_v50 = vpop.f32.mrb[11].mxu0  ;;  %v1017_v51 = vpop.f32.mrb[11].mxu1 }
 0x227   : > { %v1412_v52 = vpack.c.bf16 %v969_v50, %v967_v48  ;;  %v1420_v53 = vpack.c.bf16 %v1017_v51, %v1015_v49 }
 0x229   : > { %1133 = vst [vmem:[%s1821_s17 + $0x28] sm:$0xff] %v1412_v52  ;;  %1141 = vst [vmem:[%s1821_s17 + $0x68] sm:$0xff] %v1420_v53  ;;  %v973_v54 = vpop.f32.mrb[12].mxu0  ;;  %v1021_v55 = vpop.f32.mrb[12].mxu1 }
 0x22a   : > { %v975_v56 = vpop.f32.mrb[13].mxu0  ;;  %v1023_v57 = vpop.f32.mrb[13].mxu1 }
 0x22b   : > { %v1413_v58 = vpack.c.bf16 %v975_v56, %v973_v54  ;;  %v1421_v59 = vpack.c.bf16 %v1023_v57, %v1021_v55 }
 0x22d   : > { %1134 = vst [vmem:[%s1821_s17 + $0x30] sm:$0xff] %v1413_v58  ;;  %1142 = vst [vmem:[%s1821_s17 + $0x70] sm:$0xff] %v1421_v59  ;;  %v979_v60 = vpop.f32.mrb[14].mxu0  ;;  %v1027_v61 = vpop.f32.mrb[14].mxu1 }
 0x22e   : > { %v981_v62 = vpop.f32.mrb[15].mxu0  ;;  %v1029_v63 = vpop.f32.mrb[15].mxu1 }
 0x22f   : > { %v1414_v0 = vpack.c.bf16 %v981_v62, %v979_v60  ;;  %v1422_v1 = vpack.c.bf16 %v1029_v63, %v1027_v61 }
 0x231   : > { %1135 = vst [vmem:[%s1821_s17 + $0x38] sm:$0xff] %v1414_v0  ;;  %1143 = vst [vmem:[%s1821_s17 + $0x78] sm:$0xff] %v1422_v1 }
 0x232 PF: > { %s16_s24 = sadd.s32 1, %s1686_s24   ;;  %s2066_s18 = smov %s1666_s19 }
 0x233   : > { %p13_p0 = scmp.ge.s32.totalorder %s16_s24, 6   ;;  %s2067_s19 = smov %s1771_s6 }
 0x234   : > { %s2068_s20 = smov %s1678_s22  ;;  %s2069_s21 = smov %s1682_s23 }
 0x235   : > { %s2070_s22 = smov %s2073_s25  ;;  %s2071_s23 = smov %s2077_s26 }
 0x236   :  { %15 = sbr.rel (!%p13_p0) target bundleno = 4 (0x4), region = 143 }

// kernel: encoder_sparse_forward.5
= control target key start
LH: loop header
LB: loop body
LE: loop exit
PB: predicated region body
PF: predicated region fallthrough
CT: control target
= control target key end

     0   :  { %s5038_s0 = inlined_call_operand.vmem [shape: bf16[256,256], index: 0, kind: input, shape index: {}]   ;;  %s5039_s1 = inlined_call_operand.vmem [shape: bf16[256,256], index: 1, kind: input, shape index: {}]   ;;  %s5040_s2 = inlined_call_operand.vmem [shape: bf16[256,256], index: 2, kind: input, shape index: {}]   ;;  %s5041_s3 = inlined_call_operand.vmem [shape: bf16[256,128], index: 3, kind: input, shape index: {}]   ;;  %s5042_s4 = inlined_call_operand.vmem [shape: f32[256,128], index: 4, kind: input, shape index: {}]   ;;  %s5043_s5 = inlined_call_operand.vmem [shape: f32[256,1], index: 5, kind: input, shape index: {}]   ;;  %s5044_s6 = inlined_call_operand.vmem [shape: f32[64,64], index: 6, kind: input, shape index: {}]   ;;  %s5045_s7 = inlined_call_operand.<no memory space> [shape: f32[1,1], index: 7, kind: input, shape index: {}]   ;;  %s5046_s8 = inlined_call_operand.hbm [shape: f32[256,256], index: 8, kind: output, shape index: {0}]   ;;  %s5047_s9 = inlined_call_operand.vmem [shape: f32[256,4], index: 9, kind: output, shape index: {1}]  }
   0x1   :  { %5070 = sst [smem:[#allocation32_spill]] %s5038_s0 }
   0x2   :  { %5071 = sst [smem:[#allocation33_spill]] %s5039_s1 }
   0x3   :  { %15 = sst [smem:[#allocation3]] %s5045_s7 }
   0x4   :  { %16 = vsyncpa [#allocation7], 0 }
   0x5   :  { %18 = vsyncpa [#allocation7 + $0x1], 0  ;;  %s3897_s11 = smov 0   ;;  %s3899_s12 = smov 0  }
   0x6   :  { %s3901_s13 = smov 0   ;;  %s3903_s14 = smov 0  }
   0x7   :  { %s3905_s15 = smov 0   ;;  %s3907_s16 = smov 0  }
   0x8   :  { %s3909_s17 = smov 0   ;;  %s3911_s18 = smov 0  }
   0x9   :  { %s3913_s19 = smov 0   ;;  %s3915_s7 = smov 0  }
   0xa LB: > { %5072 = sst [smem:[#allocation9_spill]] %s3799_s11  ;;  %s3070_s20 = sadd.s32 4294967295, %s3835_s7   ;;  %s3835_s7 = sphi %s3915_s7, %s24_s7   ;;  %s3831_s19 = sphi %s3913_s19, %s5123_s19   ;;  %s3827_s18 = sphi %s3911_s18, %s5122_s18   ;;  %s3823_s17 = sphi %s3909_s17, %s5121_s17   ;;  %s3819_s16 = sphi %s3907_s16, %s5126_s16   ;;  %s3815_s15 = sphi %s3905_s15, %s5119_s15   ;;  %s3811_s14 = sphi %s3903_s14, %s5118_s14   ;;  %s3807_s13 = sphi %s3901_s13, %s5117_s13   ;;  %s3803_s12 = sphi %s3899_s12, %s5125_s12   ;;  %s3799_s11 = sphi %s3897_s11, %s5124_s11  }
   0xb   : > { %5073 = sst [smem:[#allocation10_spill]] %s3807_s13  ;;  %s3071_s21 = sadd.s32 4294967294, %s3835_s7  }
   0xc   : > { %5074 = sst [smem:[#allocation11_spill]] %s3815_s15  ;;  %s33_s22 = sadd.s32 1, %s3827_s18 }
   0xd   : > { %5075 = sst [smem:[#allocation12_spill]] %s3827_s18  ;;  %s36_s23 = sadd.s32 1, %s3831_s19 }
   0xe   : > { %5076 = sst [smem:[#allocation13_spill]] %s3831_s19  ;;  %p34_p0 = scmp.ge.s32.totalorder %s33_s22, 2 }
   0xf   : > { %s45_s24 = sadd.s32 1, %s3815_s15  ;;  %p52_p1 = scmp.ne.s32.totalorder %s3815_s15, %s3811_s14 }
  0x10   : > { %p53_p2 = scmp.eq.s32.totalorder %s3835_s7, 0  ;;  %s5128_s22 = smov (%p34_p0, %s33_s22), 0 }
  0x11   : > { %5077 = sst [smem:[#allocation14_spill]] %s5128_s22  ;;  %s5130_s23 = smov (!%p34_p0, %s36_s23), %s3831_s19 }
  0x12   : > { %s41_s25 = ssub.s32 %s3827_s18, %s5128_s22  ;;  %p3960_p3 = por %p53_p2, %p52_p1 }
  0x13   : > { %p38_p4 = scmp.ge.s32.totalorder %s5130_s23, 2  ;;  %s245_s27 = sadd.s32 1, %s3807_s13 }
  0x14   : > { %p255_p5 = scmp.ne.s32.totalorder %s3807_s13, %s3803_s12  ;;  %p256_p6 = scmp.eq.s32.totalorder %s3070_s20, 3 }
  0x15   : > { %s5132_s23 = smov (%p38_p4, %s5130_s23), 0  ;;  %p261_p8 = scmp.ne.s32.totalorder %s3803_s12, %s3799_s11 }
  0x16   : > { %5079 = sst [smem:[#allocation15_spill]] %s5132_s23  ;;  %p3969_p7 = por %p256_p6, %p255_p5 }
  0x17   : > { %s40_s29 = ssub.s32 %s3831_s19, %s5132_s23  ;;  %p262_p9 = scmp.eq.s32.totalorder %s3071_s21, 3 }
  0x18   : > { %s42_s30 = sor.u32 %s41_s25, %s40_s29  ;;  %p243_p10 = scmp.eq.s32.totalorder %s40_s29, 0 }
  0x19   : > { %p43_p11 = scmp.eq.s32.totalorder %s42_s30, 0  ;;  %p3977_p12 = por %p262_p9, %p261_p8 }
  0x1a   : > { %s3982_s22 = scalar_select %p243_p10, %s3807_s13, %s245_s27  }
  0x1b   : > { %s5081_s10 = scalar_select %p3977_p12, 1, 0 }
  0x1c   : > { %5083 = sst [smem:[#allocation17_spill]] %s3982_s22  ;;  %p3073_p13 = scmp.ge.s32.totalorder %s3835_s7, 4 }
  0x1d   : > { %5082 = sst [smem:[#allocation16_spill]] %s5081_s10 }
  0x1e   : > { %s3985_s20 = scalar_select %p43_p11, %s3815_s15, %s45_s24  }
  0x1f   : > { %310 = sbr.rel (%p3073_p13) target bundleno = 78 (0x4e), region = 24 }
  0x20   : > { %5084 = sst [smem:[#allocation18_spill]] %s3985_s20 }
  0x26   : > { %313 = sbr.rel (!%p3960_p3) target bundleno = 58 (0x3a), region = 28  ;;  %s315_s21 = sand.u32 (%p3960_p3), 1, %s3815_s15  }
  0x27   : > { %s3177_s25 = sshll.u32 (%p3960_p3), %s3831_s19, 5  ;;  %s3074_s29 = sshll.u32 (%p3960_p3), %s315_s21, 6 }
  0x28   : > { %s320_s30 = sadd.s32 (%p3960_p3), %s3827_s18, %s3177_s25  ;;  %s5085_s0 = sld [smem:[#allocation32_spill]] (%p3960_p3) }
  0x29   : > { %s3077_s23 = sshll.u32 (%p3960_p3), %s320_s30, 2  ;;  %s317_s24 = scalar_lea.vmem (%p3960_p3), [#allocation4], %s3074_s29 }
  0x2e   : > { %s3996_s27 = scalar_lea.vmem %s5085_s0, %s3077_s23 }
  0x2f   : > { %v338_v0 = vld [vmem:[%s3996_s27] sm:$0xf]  ;;  %v340_v1 = vld [vmem:[%s3996_s27 + $0x8] sm:$0xf]  ;;  %v342_v2 = vld [vmem:[%s3996_s27 + $0x10] sm:$0xf] }
  0x30   : > { %339 = vst [vmem:[%s317_s24] sm:$0xf] %v338_v0  ;;  %341 = vst [vmem:[%s317_s24 + $0x4] sm:$0xf] %v340_v1  ;;  %v344_v3 = vld [vmem:[%s3996_s27 + $0x18] sm:$0xf] }
  0x31   : > { %343 = vst [vmem:[%s317_s24 + $0x8] sm:$0xf] %v342_v2  ;;  %v346_v4 = vld [vmem:[%s3996_s27 + $0x20] sm:$0xf]  ;;  %v348_v5 = vld [vmem:[%s3996_s27 + $0x28] sm:$0xf] }
  0x32   : > { %345 = vst [vmem:[%s317_s24 + $0xc] sm:$0xf] %v344_v3  ;;  %347 = vst [vmem:[%s317_s24 + $0x10] sm:$0xf] %v346_v4  ;;  %v350_v6 = vld [vmem:[%s3996_s27 + $0x30] sm:$0xf] }
  0x33   : > { %349 = vst [vmem:[%s317_s24 + $0x14] sm:$0xf] %v348_v5  ;;  %v352_v7 = vld [vmem:[%s3996_s27 + $0x38] sm:$0xf]  ;;  %v354_v8 = vld [vmem:[%s3996_s27 + $0x40] sm:$0xf] }
  0x34   : > { %351 = vst [vmem:[%s317_s24 + $0x18] sm:$0xf] %v350_v6  ;;  %353 = vst [vmem:[%s317_s24 + $0x1c] sm:$0xf] %v352_v7  ;;  %v356_v9 = vld [vmem:[%s3996_s27 + $0x48] sm:$0xf] }
  0x35   : > { %355 = vst [vmem:[%s317_s24 + $0x20] sm:$0xf] %v354_v8  ;;  %v358_v10 = vld [vmem:[%s3996_s27 + $0x50] sm:$0xf]  ;;  %v360_v11 = vld [vmem:[%s3996_s27 + $0x58] sm:$0xf] }
  0x36   : > { %357 = vst [vmem:[%s317_s24 + $0x24] sm:$0xf] %v356_v9  ;;  %359 = vst [vmem:[%s317_s24 + $0x28] sm:$0xf] %v358_v10  ;;  %v362_v12 = vld [vmem:[%s3996_s27 + $0x60] sm:$0xf] }
  0x37   : > { %361 = vst [vmem:[%s317_s24 + $0x2c] sm:$0xf] %v360_v11  ;;  %v364_v13 = vld [vmem:[%s3996_s27 + $0x68] sm:$0xf]  ;;  %v366_v14 = vld [vmem:[%s3996_s27 + $0x70] sm:$0xf] }
  0x38   : > { %363 = vst [vmem:[%s317_s24 + $0x30] sm:$0xf] %v362_v12  ;;  %365 = vst [vmem:[%s317_s24 + $0x34] sm:$0xf] %v364_v13  ;;  %v368_v15 = vld [vmem:[%s3996_s27 + $0x78] sm:$0xf] }
  0x39   : > { %367 = vst [vmem:[%s317_s24 + $0x38] sm:$0xf] %v366_v14  ;;  %369 = vst [vmem:[%s317_s24 + $0x3c] sm:$0xf] %v368_v15 }
  0x3a PF: > { %424 = sbr.rel (!%p3960_p3) target bundleno = 78 (0x4e), region = 69  ;;  %s426_s11 = sand.u32 (%p3960_p3), 1, %s3815_s15  }
  0x3b   : > { %s3178_s23 = sshll.u32 (%p3960_p3), %s3831_s19, 5  ;;  %s3078_s10 = sshll.u32 (%p3960_p3), %s426_s11, 6 }
  0x3c   : > { %s431_s21 = sadd.s32 (%p3960_p3), %s3827_s18, %s3178_s23  ;;  %s5086_s1 = sld [smem:[#allocation33_spill]] (%p3960_p3) }
  0x3d   : > { %s3081_s25 = sshll.u32 (%p3960_p3), %s431_s21, 2  ;;  %s428_s26 = scalar_lea.vmem (%p3960_p3), [#allocation5], %s3078_s10 }
  0x42   : > { %s4022_s0 = scalar_lea.vmem %s5086_s1, %s3081_s25 }
  0x43   : > { %v449_v16 = vld [vmem:[%s4022_s0] sm:$0xf]  ;;  %v451_v17 = vld [vmem:[%s4022_s0 + $0x8] sm:$0xf]  ;;  %v453_v18 = vld [vmem:[%s4022_s0 + $0x10] sm:$0xf] }
  0x44   : > { %450 = vst [vmem:[%s428_s26] sm:$0xf] %v449_v16  ;;  %452 = vst [vmem:[%s428_s26 + $0x4] sm:$0xf] %v451_v17  ;;  %v455_v19 = vld [vmem:[%s4022_s0 + $0x18] sm:$0xf] }
  0x45   : > { %454 = vst [vmem:[%s428_s26 + $0x8] sm:$0xf] %v453_v18  ;;  %v457_v20 = vld [vmem:[%s4022_s0 + $0x20] sm:$0xf]  ;;  %v459_v21 = vld [vmem:[%s4022_s0 + $0x28] sm:$0xf] }
  0x46   : > { %456 = vst [vmem:[%s428_s26 + $0xc] sm:$0xf] %v455_v19  ;;  %458 = vst [vmem:[%s428_s26 + $0x10] sm:$0xf] %v457_v20  ;;  %v461_v22 = vld [vmem:[%s4022_s0 + $0x30] sm:$0xf] }
  0x47   : > { %460 = vst [vmem:[%s428_s26 + $0x14] sm:$0xf] %v459_v21  ;;  %v463_v23 = vld [vmem:[%s4022_s0 + $0x38] sm:$0xf]  ;;  %v465_v24 = vld [vmem:[%s4022_s0 + $0x40] sm:$0xf] }
  0x48   : > { %462 = vst [vmem:[%s428_s26 + $0x18] sm:$0xf] %v461_v22  ;;  %464 = vst [vmem:[%s428_s26 + $0x1c] sm:$0xf] %v463_v23  ;;  %v467_v25 = vld [vmem:[%s4022_s0 + $0x48] sm:$0xf] }
  0x49   : > { %466 = vst [vmem:[%s428_s26 + $0x20] sm:$0xf] %v465_v24  ;;  %v469_v26 = vld [vmem:[%s4022_s0 + $0x50] sm:$0xf]  ;;  %v471_v27 = vld [vmem:[%s4022_s0 + $0x58] sm:$0xf] }
  0x4a   : > { %468 = vst [vmem:[%s428_s26 + $0x24] sm:$0xf] %v467_v25  ;;  %470 = vst [vmem:[%s428_s26 + $0x28] sm:$0xf] %v469_v26  ;;  %v473_v28 = vld [vmem:[%s4022_s0 + $0x60] sm:$0xf] }
  0x4b   : > { %472 = vst [vmem:[%s428_s26 + $0x2c] sm:$0xf] %v471_v27  ;;  %v475_v29 = vld [vmem:[%s4022_s0 + $0x68] sm:$0xf]  ;;  %v477_v30 = vld [vmem:[%s4022_s0 + $0x70] sm:$0xf] }
  0x4c   : > { %474 = vst [vmem:[%s428_s26 + $0x30] sm:$0xf] %v473_v28  ;;  %476 = vst [vmem:[%s428_s26 + $0x34] sm:$0xf] %v475_v29  ;;  %v479_v31 = vld [vmem:[%s4022_s0 + $0x78] sm:$0xf] }
  0x4d   : > { %478 = vst [vmem:[%s428_s26 + $0x38] sm:$0xf] %v477_v30  ;;  %480 = vst [vmem:[%s428_s26 + $0x3c] sm:$0xf] %v479_v31 }
  0x4e PF: > { %p3082_p0 = scmp.ge.s32.totalorder %s3835_s7, 1  ;;  %p571_p1 = scmp.lt.s32.totalorder %s3835_s7, 5 }
  0x50   : > { %p572_p2 = pnand %p3082_p0, %p571_p1 }
  0x51   : > { %s578_s27 = sand.u32 (!%p572_p2), 1, %s3811_s14   ;;  %s5053_s24 = sand.u32 (!%p572_p2), 1, %s3803_s12  }
  0x52   : > { %575 = sbr.rel (%p572_p2) target bundleno = 1298 (0x512), region = 126  ;;  %s3083_s11 = sshll.u32 (!%p572_p2), %s578_s27, 6 }
  0x53   : > { %s3085_s23 = sshll.u32 (!%p572_p2), %s5053_s24, 8  ;;  %s3086_s0 = sshll.u32 (!%p572_p2), %s3819_s16, 4 }
  0x54   : > { %p653_p3 = scmp.lt.s32.totalorder (!%p572_p2), %s3086_s0, 31  ;;  %s3091_s10 = sshll.u32 (!%p572_p2), %s3823_s17, 4 }
  0x55   : > { %p666_p4 = scmp.lt.s32.totalorder (!%p572_p2), %s3091_s10, 31  ;;  %s4073_s30 = scalar_lea.vmem (!%p572_p2), [#allocation4], %s3083_s11 }
  0x56   : > { %s4075_s1 = scalar_lea.vmem (!%p572_p2), [#allocation5], %s3083_s11  ;;  %s4077_s19 = scalar_lea.vmem (!%p572_p2), [#allocation6], %s3085_s23 }
  0x57   : > { %p3097_p5 = scmp.ne.s32.totalorder (!%p572_p2), %s3819_s16, 0 }
  0x59   : > { %s5134_s0 = smov (!%p653_p3, %s3086_s0), 31  ;;  %s5136_s10 = smov (!%p666_p4, %s3091_s10), 31 }
  0x5a   : > { %s3179_s21 = sshll.u32 %s5134_s0, 3  ;;  %s3090_s25 = sshll.u32 %s5134_s0, 2  ;;  %v3837_v32 = vmov (!%p3097_p5), 0.0  }
  0x5b   : > { %s4051_s26 = scalar_lea.vmem %s5040_s2, %s3179_s21  ;;  %s4056_s14 = scalar_lea.vmem %s5041_s3, %s3090_s25  ;;  %689 = vst [vmem:[%s4077_s19] sm:$0xff] (!%p3097_p5), %v3837_v32  ;;  %690 = vst [vmem:[%s4077_s19 + $0x8] sm:$0xff] (!%p3097_p5), %v3837_v32 }
  0x5c   : > { %s3092_s27 = sshll.u32 %s5136_s10, 3  ;;  %688 = sbr.rel (%p3097_p5) target bundleno = 115 (0x73), region = 138  ;;  %691 = vst [vmem:[%s4077_s19 + $0x10] sm:$0xff] (!%p3097_p5), %v3837_v32  ;;  %692 = vst [vmem:[%s4077_s19 + $0x18] sm:$0xff] (!%p3097_p5), %v3837_v32 }
  0x5d   : > { %s4061_s20 = scalar_lea.vmem %s5042_s4, %s3092_s27  ;;  %s4066_s0 = scalar_lea.vmem %s5043_s5, %s3092_s27  ;;  %693 = vst [vmem:[%s4077_s19 + $0x20] sm:$0xff] (!%p3097_p5), %v3837_v32  ;;  %694 = vst [vmem:[%s4077_s19 + $0x28] sm:$0xff] (!%p3097_p5), %v3837_v32 }
  0x5e   : > { %s4071_s21 = scalar_lea.vmem %s5047_s9, %s3092_s27  ;;  %695 = vst [vmem:[%s4077_s19 + $0x30] sm:$0xff] (!%p3097_p5), %v3837_v32  ;;  %696 = vst [vmem:[%s4077_s19 + $0x38] sm:$0xff] (!%p3097_p5), %v3837_v32 }
  0x5f   : > { %697 = vst [vmem:[%s4077_s19 + $0x40] sm:$0xff] (!%p3097_p5), %v3837_v32  ;;  %698 = vst [vmem:[%s4077_s19 + $0x48] sm:$0xff] (!%p3097_p5), %v3837_v32 }
  0x60   : > { %699 = vst [vmem:[%s4077_s19 + $0x50] sm:$0xff] (!%p3097_p5), %v3837_v32  ;;  %700 = vst [vmem:[%s4077_s19 + $0x58] sm:$0xff] (!%p3097_p5), %v3837_v32 }
  0x61   : > { %701 = vst [vmem:[%s4077_s19 + $0x60] sm:$0xff] (!%p3097_p5), %v3837_v32  ;;  %702 = vst [vmem:[%s4077_s19 + $0x68] sm:$0xff] (!%p3097_p5), %v3837_v32 }
  0x62   : > { %703 = vst [vmem:[%s4077_s19 + $0x70] sm:$0xff] (!%p3097_p5), %v3837_v32  ;;  %704 = vst [vmem:[%s4077_s19 + $0x78] sm:$0xff] (!%p3097_p5), %v3837_v32 }
  0x63   : > { %705 = vst [vmem:[%s4077_s19 + $0x80] sm:$0xff] %v3837_v32  ;;  %706 = vst [vmem:[%s4077_s19 + $0x88] sm:$0xff] %v3837_v32 }
  0x64   : > { %707 = vst [vmem:[%s4077_s19 + $0x90] sm:$0xff] %v3837_v32  ;;  %708 = vst [vmem:[%s4077_s19 + $0x98] sm:$0xff] %v3837_v32 }
  0x65   : > { %709 = vst [vmem:[%s4077_s19 + $0xa0] sm:$0xff] %v3837_v32  ;;  %710 = vst [vmem:[%s4077_s19 + $0xa8] sm:$0xff] %v3837_v32 }
  0x66   : > { %711 = vst [vmem:[%s4077_s19 + $0xb0] sm:$0xff] %v3837_v32  ;;  %712 = vst [vmem:[%s4077_s19 + $0xb8] sm:$0xff] %v3837_v32 }
  0x67   : > { %713 = vst [vmem:[%s4077_s19 + $0xc0] sm:$0xff] %v3837_v32  ;;  %714 = vst [vmem:[%s4077_s19 + $0xc8] sm:$0xff] %v3837_v32 }
  0x68   : > { %715 = vst [vmem:[%s4077_s19 + $0xd0] sm:$0xff] %v3837_v32  ;;  %716 = vst [vmem:[%s4077_s19 + $0xd8] sm:$0xff] %v3837_v32 }
  0x69   : > { %717 = vst [vmem:[%s4077_s19 + $0xe0] sm:$0xff] %v3837_v32  ;;  %718 = vst [vmem:[%s4077_s19 + $0xe8] sm:$0xff] %v3837_v32 }
  0x6a   : > { %719 = vst [vmem:[%s4077_s19 + $0xf0] sm:$0xff] %v3837_v32  ;;  %720 = vst [vmem:[%s4077_s19 + $0xf8] sm:$0xff] %v3837_v32 }
  0x6b   : > { %721 = vst [vmem:[#allocation2] sm:$0xff] %v3837_v32  ;;  %722 = vst [vmem:[#allocation2 + $0x8] sm:$0xff] %v3837_v32 }
  0x6c   : > { %723 = vst [vmem:[#allocation2 + $0x10] sm:$0xff] %v3837_v32  ;;  %724 = vst [vmem:[#allocation2 + $0x18] sm:$0xff] %v3837_v32 }
  0x6d   : > { %725 = vst [vmem:[#allocation2 + $0x20] sm:$0xff] %v3837_v32  ;;  %726 = vst [vmem:[#allocation2 + $0x28] sm:$0xff] %v3837_v32 }
  0x6e   : > { %727 = vst [vmem:[#allocation2 + $0x30] sm:$0xff] %v3837_v32  ;;  %728 = vst [vmem:[#allocation2 + $0x38] sm:$0xff] %v3837_v32 }
  0x6f   : > { %729 = vst [vmem:[#allocation2 + $0x40] sm:$0xff] %v3837_v32  ;;  %730 = vst [vmem:[#allocation2 + $0x48] sm:$0xff] %v3837_v32 }
  0x70   : > { %731 = vst [vmem:[#allocation2 + $0x50] sm:$0xff] %v3837_v32  ;;  %732 = vst [vmem:[#allocation2 + $0x58] sm:$0xff] %v3837_v32 }
  0x71   : > { %733 = vst [vmem:[#allocation2 + $0x60] sm:$0xff] %v3837_v32  ;;  %734 = vst [vmem:[#allocation2 + $0x68] sm:$0xff] %v3837_v32 }
  0x72   : > { %735 = vst [vmem:[#allocation2 + $0x70] sm:$0xff] %v3837_v32  ;;  %736 = vst [vmem:[#allocation2 + $0x78] sm:$0xff] %v3837_v32 }
  0x73 PF: > { %v3483_v33 = vld [vmem:[%s4051_s26 + $0x4] ss:$8 sps:$4 sm:$0xff]   ;;  %v3485_v34 = vld [vmem:[%s4051_s26] ss:$8 sps:$4 sm:$0xff]   ;;  %v3838_v35 = vmov 0   ;;  %v3510_v46 = vld [vmem:[%s4056_s14 + $0x10] sm:$0xff]  }
  0x74   : > { %961 = vmatprep.mubr.bf16.mxu0 %v3838_v35  ;;  %929 = vmatprep.subr.bf16.mxu0 %v3483_v33  ;;  %v3486_v36 = vld [vmem:[%s4051_s26 + $0x14] ss:$8 sps:$4 sm:$0xff]   ;;  %v3488_v37 = vld [vmem:[%s4051_s26 + $0x10] ss:$8 sps:$4 sm:$0xff]   ;;  %v3489_v38 = vld [vmem:[%s4051_s26 + $0x24] ss:$8 sps:$4 sm:$0xff]  }
  0x75   : > { %930 = vmatpush1.bf16.msra.mxu0 %v3485_v34  ;;  %v3491_v39 = vld [vmem:[%s4051_s26 + $0x20] ss:$8 sps:$4 sm:$0xff]   ;;  %v3492_v40 = vld [vmem:[%s4051_s26 + $0x34] ss:$8 sps:$4 sm:$0xff]   ;;  %v3494_v41 = vld [vmem:[%s4051_s26 + $0x30] ss:$8 sps:$4 sm:$0xff]  }
  0x76   : > { %931 = vmatprep.subr.bf16.mxu0 %v3486_v36  ;;  %v3507_v42 = vld [vmem:[%s4056_s14] sm:$0xff]   ;;  %v3509_v44 = vld [vmem:[%s4056_s14 + $0x8] sm:$0xff]   ;;  %v3498_v47 = vld [vmem:[%s4051_s26 + $0x54] ss:$8 sps:$4 sm:$0xff]   ;;  %p3138_p6 = scmp.ne.s32.totalorder %s3819_s16, 1 }
  0x77   : > { %v3495_v43 = vld [vmem:[%s4051_s26 + $0x44] ss:$8 sps:$4 sm:$0xff]   ;;  %3246 = vmatprep.subr.bf16.mxu1 %v3507_v42  ;;  %v3497_v45 = vld [vmem:[%s4051_s26 + $0x40] ss:$8 sps:$4 sm:$0xff]   ;;  %v3500_v48 = vld [vmem:[%s4051_s26 + $0x50] ss:$8 sps:$4 sm:$0xff]  }
  0x78   : > { %3247 = vmatpush3.bf16.msra.mxu1 %v3507_v42  ;;  %v3512_v49 = vld [vmem:[%s4056_s14 + $0x18] sm:$0xff]   ;;  %v3501_v50 = vld [vmem:[%s4051_s26 + $0x64] ss:$8 sps:$4 sm:$0xff]   ;;  %v3503_v51 = vld [vmem:[%s4051_s26 + $0x60] ss:$8 sps:$4 sm:$0xff]  }
  0x79   : > { %932 = vmatpush1.bf16.msra.mxu0 %v3488_v37  ;;  %3248 = vmatprep.subr.bf16.mxu1 %v3509_v44  ;;  %v3513_v52 = vld [vmem:[%s4056_s14 + $0x20] sm:$0xff]   ;;  %v3504_v54 = vld [vmem:[%s4051_s26 + $0x74] ss:$8 sps:$4 sm:$0xff]   ;;  %v3506_v55 = vld [vmem:[%s4051_s26 + $0x70] ss:$8 sps:$4 sm:$0xff]  }
  0x7a   : > { %933 = vmatprep.subr.bf16.mxu0 %v3489_v38  ;;  %v3519_v53 = vld [vmem:[%s4075_s1] sm:$0xff]   ;;  %v3515_v56 = vld [vmem:[%s4056_s14 + $0x28] sm:$0xff]   ;;  %v3516_v58 = vld [vmem:[%s4056_s14 + $0x30] sm:$0xff]  }
  0x7b   : > { %3262 = vmatprep.mubr.bf16.mxu1 %v3519_v53  ;;  %v3508_v57 = vld [vmem:[%s4073_s30] sm:$0xff]   ;;  %v3518_v59 = vld [vmem:[%s4056_s14 + $0x38] sm:$0xff]   ;;  %v3511_v60 = vld [vmem:[%s4073_s30 + $0x8] sm:$0xff]  }
  0x7c   : > { %3249 = vmatpush3.bf16.msra.mxu1 %v3509_v44  ;;  %v3520_v61 = vld [vmem:[%s4075_s1 + $0x8] sm:$0xff]   ;;  %v3522_v62 = vld [vmem:[%s4075_s1 + $0x10] sm:$0xff]   ;;  %v3523_v0 = vld [vmem:[%s4075_s1 + $0x18] sm:$0xff]  }
  0x7d   : > { %934 = vmatpush1.bf16.msra.mxu0 %v3491_v39  ;;  %3250 = vmatprep.subr.bf16.mxu1 %v3510_v46  ;;  %v3514_v63 = vld [vmem:[%s4073_s30 + $0x10] sm:$0xff]   ;;  %v3525_v1 = vld [vmem:[%s4075_s1 + $0x20] sm:$0xff]   ;;  %v3517_v2 = vld [vmem:[%s4073_s30 + $0x18] sm:$0xff]  }
  0x7e   : > { %935 = vmatprep.subr.bf16.mxu0 %v3492_v40  ;;  %v3526_v3 = vld [vmem:[%s4075_s1 + $0x28] sm:$0xff]   ;;  %v3528_v4 = vld [vmem:[%s4075_s1 + $0x30] sm:$0xff]   ;;  %v3521_v5 = vld [vmem:[%s4073_s30 + $0x20] sm:$0xff]  }
  0x7f   : > { %v3529_v6 = vld [vmem:[%s4075_s1 + $0x38] sm:$0xff]   ;;  %v3524_v7 = vld [vmem:[%s4073_s30 + $0x28] sm:$0xff]   ;;  %v3527_v8 = vld [vmem:[%s4073_s30 + $0x30] sm:$0xff]  }
  0x80   : > { %3251 = vmatpush3.bf16.msra.mxu1 %v3510_v46  ;;  %v3530_v9 = vld [vmem:[%s4073_s30 + $0x38] sm:$0xff]   ;;  %v737_v10 = vld [vmem:[%s4077_s19] sm:$0xff]  ;;  %v738_v11 = vld [vmem:[%s4077_s19 + $0x8] sm:$0xff] }
  0x81   : > { %936 = vmatpush1.bf16.msra.mxu0 %v3494_v41  ;;  %3252 = vmatprep.subr.bf16.mxu1 %v3512_v49  ;;  %v739_v13 = vld [vmem:[%s4077_s19 + $0x10] sm:$0xff]  ;;  %v740_v16 = vld [vmem:[%s4077_s19 + $0x18] sm:$0xff]  ;;  %v741_v22 = vld [vmem:[%s4077_s19 + $0x20] sm:$0xff] }
  0x82   : > { %937 = vmatprep.subr.bf16.mxu0 %v3495_v43  ;;  %v742_v23 = vld [vmem:[%s4077_s19 + $0x28] sm:$0xff]  ;;  %v743_v25 = vld [vmem:[%s4077_s19 + $0x30] sm:$0xff]  ;;  %v744_v28 = vld [vmem:[%s4077_s19 + $0x38] sm:$0xff] }
  0x83   : > { %v1108_v29 = vld [vmem:[#allocation2 + $0x10] sm:$0xff]  ;;  %v1106_v32 = vld [vmem:[#allocation2] sm:$0xff]  ;;  %v1109_v36 = vld [vmem:[#allocation2 + $0x18] sm:$0xff] }
  0x84   : > { %3253 = vmatpush3.bf16.msra.mxu1 %v3512_v49  ;;  %v1107_v40 = vld [vmem:[#allocation2 + $0x8] sm:$0xff]  ;;  %v745_v43 = vld [vmem:[%s4077_s19 + $0x40] sm:$0xff]  ;;  %v747_v49 = vld [vmem:[%s4077_s19 + $0x50] sm:$0xff] }
  0x85   : > { %938 = vmatpush1.bf16.msra.mxu0 %v3497_v45  ;;  %3254 = vmatprep.subr.bf16.mxu1 %v3513_v52  ;;  %v746_v46 = vld [vmem:[%s4077_s19 + $0x48] sm:$0xff]  ;;  %v1112_v53 = vld [vmem:[#allocation2 + $0x30] sm:$0xff] }
  0x86   : > { %939 = vmatprep.subr.bf16.mxu0 %v3498_v47 }
  0x88   : > { %3255 = vmatpush3.bf16.msra.mxu1 %v3513_v52  ;;  %v748_v52 = vld [vmem:[%s4077_s19 + $0x58] sm:$0xff] }
  0x89   : > { %940 = vmatpush1.bf16.msra.mxu0 %v3500_v48  ;;  %3256 = vmatprep.subr.bf16.mxu1 %v3515_v56 }
  0x8a   : > { %941 = vmatprep.subr.bf16.mxu0 %v3501_v50 }
  0x8c   : > { %3257 = vmatpush3.bf16.msra.mxu1 %v3515_v56  ;;  %v1110_v56 = vld [vmem:[#allocation2 + $0x20] sm:$0xff] }
  0x8d   : > { %942 = vmatpush1.bf16.msra.mxu0 %v3503_v51  ;;  %3258 = vmatprep.subr.bf16.mxu1 %v3516_v58 }
  0x8e   : > { %943 = vmatprep.subr.bf16.mxu0 %v3504_v54 }
  0x90   : > { %3259 = vmatpush3.bf16.msra.mxu1 %v3516_v58 }
  0x91   : > { %944 = vmatpush1.bf16.msra.mxu0 %v3506_v55  ;;  %3260 = vmatprep.subr.bf16.mxu1 %v3518_v59 }
  0x94   : > { %962 = vmatmul.mubr.bf16.vlgmr.msra.gmra.mrb[0].mxu0 %v3508_v57  ;;  %3261 = vmatpush3.bf16.msra.mxu1 %v3518_v59 }
  0x95   : > { %971 = vmatprep.mubr.bf16.mxu0 %v3838_v35 }
  0x97   : > { %3263 = vmatmul.mubr.bf16.vlgmr.msra.gmra.mrb[0].mxu1 %v3520_v61 }
  0x98   : > { %3266 = vmatprep.mubr.bf16.mxu1 %v3522_v62 }
  0x9c   : > { %972 = vmatmul.mubr.bf16.gmra.mrb[4].mxu0 %v3511_v60  ;;  %v1113_v60 = vld [vmem:[#allocation2 + $0x38] sm:$0xff] }
  0x9d   : > { %981 = vmatprep.mubr.bf16.mxu0 %v3838_v35 }
  0x9f   : > { %3267 = vmatmul.mubr.bf16.gmra.mrb[4].mxu1 %v3523_v0  ;;  %v1111_v0 = vld [vmem:[#allocation2 + $0x28] sm:$0xff] }
  0xa0   : > { %3270 = vmatprep.mubr.bf16.mxu1 %v3525_v1 }
  0xa4   : > { %982 = vmatmul.mubr.bf16.gmra.mrb[8].mxu0 %v3514_v63 }
  0xa5   : > { %991 = vmatprep.mubr.bf16.mxu0 %v3838_v35 }
  0xa7   : > { %3271 = vmatmul.mubr.bf16.gmra.mrb[8].mxu1 %v3526_v3  ;;  %v749_v3 = vld [vmem:[%s4077_s19 + $0x60] sm:$0xff] }
  0xa8   : > { %3274 = vmatprep.mubr.bf16.mxu1 %v3528_v4 }
  0xac   : > { %992 = vmatmul.mubr.bf16.gmra.mrb[12].mxu0 %v3517_v2 }
  0xad   : > { %1001 = vmatprep.mubr.bf16.mxu0 %v3838_v35 }
  0xaf   : > { %3275 = vmatmul.mubr.bf16.gmra.mrb[12].mxu1 %v3529_v6  ;;  %v750_v6 = vld [vmem:[%s4077_s19 + $0x68] sm:$0xff] }
  0xb4   : > { %1002 = vmatmul.mubr.bf16.gmra.mrb[16].mxu0 %v3521_v5 }
  0xb5   : > { %1011 = vmatprep.mubr.bf16.mxu0 %v3838_v35 }
  0xbc   : > { %1012 = vmatmul.mubr.bf16.gmra.mrb[20].mxu0 %v3524_v7 }
  0xbd   : > { %1021 = vmatprep.mubr.bf16.mxu0 %v3838_v35 }
  0xc4   : > { %1022 = vmatmul.mubr.bf16.gmra.mrb[24].mxu0 %v3527_v8 }
  0xc5   : > { %1031 = vmatprep.mubr.bf16.mxu0 %v3838_v35 }
  0xcc   : > { %1032 = vmatmul.mubr.bf16.gmra.mrb[28].mxu0 %v3530_v9  ;;  %v751_v9 = vld [vmem:[%s4077_s19 + $0x70] sm:$0xff] }
 0x167   : > { %v963_v12 = vpop.f32.mrb[0].mxu0 }
 0x168   : > { %v1042_v14 = vadd.f32 %v963_v12, %v737_v10  ;;  %v965_v15 = vpop.f32.mrb[1].mxu0  ;;  %v752_v12 = vld [vmem:[%s4077_s19 + $0x78] sm:$0xff] }
 0x169   : > { %v1043_v17 = vadd.f32 %v965_v15, %v738_v11  ;;  %v967_v18 = vpop.f32.mrb[2].mxu0 }
 0x16a   : > { %1074 = vst [vmem:[%s4077_s19] sm:$0xff] %v1042_v14  ;;  %v1044_v19 = vadd.f32 %v967_v18, %v739_v13  ;;  %v969_v20 = vpop.f32.mrb[3].mxu0  ;;  %v3264_v35 = vpop.f32.mrb[0].mxu1  ;;  %v1116_v13 = vld [vmem:[#allocation2 + $0x50] sm:$0xff] }
 0x16b   : > { %1075 = vst [vmem:[%s4077_s19 + $0x8] sm:$0xff] %v1043_v17  ;;  %v1045_v21 = vadd.f32 %v969_v20, %v740_v16  ;;  %v1349_v38 = vadd.f32 %v3264_v35, %v1108_v29  ;;  %v1284_v39 = vpop.f32.mrb[1].mxu1  ;;  %v1114_v16 = vld [vmem:[#allocation2 + $0x40] sm:$0xff]  ;;  %v1117_v20 = vld [vmem:[#allocation2 + $0x58] sm:$0xff] }
 0x16c   : > { %1076 = vst [vmem:[%s4077_s19 + $0x10] sm:$0xff] %v1044_v19  ;;  %v1347_v41 = vadd.f32 %v1284_v39, %v1106_v32  ;;  %v3265_v42 = vpop.f32.mrb[2].mxu1 }
 0x16d   : > { %1077 = vst [vmem:[%s4077_s19 + $0x18] sm:$0xff] %v1045_v21  ;;  %1365 = vst [vmem:[#allocation2 + $0x10] sm:$0xff] %v1349_v38  ;;  %v1350_v44 = vadd.f32 %v3265_v42, %v1109_v36  ;;  %v1287_v45 = vpop.f32.mrb[3].mxu1  ;;  %v756_v36 = vld [vmem:[%s4077_s19 + $0x98] sm:$0xff] }
 0x16e   : > { %1363 = vst [vmem:[#allocation2] sm:$0xff] %v1347_v41  ;;  %v1348_v47 = vadd.f32 %v1287_v45, %v1107_v40  ;;  %v1118_v40 = vld [vmem:[#allocation2 + $0x60] sm:$0xff] }
 0x16f   : > { %v973_v24 = vpop.f32.mrb[4].mxu0  ;;  %1366 = vst [vmem:[#allocation2 + $0x18] sm:$0xff] %v1350_v44  ;;  %v1121_v44 = vld [vmem:[#allocation2 + $0x78] sm:$0xff] }
 0x170   : > { %v1046_v26 = vadd.f32 %v973_v24, %v741_v22  ;;  %v975_v27 = vpop.f32.mrb[5].mxu0  ;;  %1364 = vst [vmem:[#allocation2 + $0x8] sm:$0xff] %v1348_v47  ;;  %v1115_v24 = vld [vmem:[#allocation2 + $0x48] sm:$0xff] }
 0x171   : > { %v1047_v30 = vadd.f32 %v975_v27, %v742_v23  ;;  %v977_v31 = vpop.f32.mrb[6].mxu0  ;;  %v753_v27 = vld [vmem:[%s4077_s19 + $0x80] sm:$0xff] }
 0x172   : > { %1078 = vst [vmem:[%s4077_s19 + $0x20] sm:$0xff] %v1046_v26  ;;  %v1048_v33 = vadd.f32 %v977_v31, %v743_v25  ;;  %v979_v34 = vpop.f32.mrb[7].mxu0  ;;  %v3268_v59 = vpop.f32.mrb[4].mxu1 }
 0x173   : > { %1079 = vst [vmem:[%s4077_s19 + $0x28] sm:$0xff] %v1047_v30  ;;  %v1049_v37 = vadd.f32 %v979_v34, %v744_v28  ;;  %v1353_v62 = vadd.f32 %v3268_v59, %v1112_v53  ;;  %v1300_v63 = vpop.f32.mrb[5].mxu1  ;;  %v754_v30 = vld [vmem:[%s4077_s19 + $0x88] sm:$0xff] }
 0x174   : > { %1080 = vst [vmem:[%s4077_s19 + $0x30] sm:$0xff] %v1048_v33  ;;  %v1351_v1 = vadd.f32 %v1300_v63, %v1110_v56  ;;  %v3269_v2 = vpop.f32.mrb[6].mxu1  ;;  %v755_v33 = vld [vmem:[%s4077_s19 + $0x90] sm:$0xff] }
 0x175   : > { %1081 = vst [vmem:[%s4077_s19 + $0x38] sm:$0xff] %v1049_v37  ;;  %1369 = vst [vmem:[#allocation2 + $0x30] sm:$0xff] %v1353_v62  ;;  %v1354_v4 = vadd.f32 %v3269_v2, %v1113_v60  ;;  %v1303_v5 = vpop.f32.mrb[7].mxu1  ;;  %v1120_v37 = vld [vmem:[#allocation2 + $0x70] sm:$0xff]  ;;  %v760_v60 = vld [vmem:[%s4077_s19 + $0xb8] sm:$0xff] }
 0x176   : > { %1367 = vst [vmem:[#allocation2 + $0x20] sm:$0xff] %v1351_v1  ;;  %v1352_v7 = vadd.f32 %v1303_v5, %v1111_v0  ;;  %v761_v2 = vld [vmem:[%s4077_s19 + $0xc0] sm:$0xff]  ;;  %v763_v5 = vld [vmem:[%s4077_s19 + $0xd0] sm:$0xff] }
 0x177   : > { %v983_v48 = vpop.f32.mrb[8].mxu0  ;;  %1370 = vst [vmem:[#allocation2 + $0x38] sm:$0xff] %v1354_v4 }
 0x178   : > { %v1050_v50 = vadd.f32 %v983_v48, %v745_v43  ;;  %v985_v51 = vpop.f32.mrb[9].mxu0  ;;  %1368 = vst [vmem:[#allocation2 + $0x28] sm:$0xff] %v1352_v7  ;;  %v1119_v48 = vld [vmem:[#allocation2 + $0x68] sm:$0xff] }
 0x179   : > { %v1051_v54 = vadd.f32 %v985_v51, %v746_v46  ;;  %v987_v55 = vpop.f32.mrb[10].mxu0  ;;  %v757_v51 = vld [vmem:[%s4077_s19 + $0xa0] sm:$0xff] }
 0x17a   : > { %1082 = vst [vmem:[%s4077_s19 + $0x40] sm:$0xff] %v1050_v50  ;;  %v1052_v57 = vadd.f32 %v987_v55, %v747_v49  ;;  %v989_v58 = vpop.f32.mrb[11].mxu0  ;;  %v3272_v19 = vpop.f32.mrb[8].mxu1 }
 0x17b   : > { %1083 = vst [vmem:[%s4077_s19 + $0x48] sm:$0xff] %v1051_v54  ;;  %v1053_v61 = vadd.f32 %v989_v58, %v748_v52  ;;  %v1357_v22 = vadd.f32 %v3272_v19, %v1116_v13  ;;  %v1316_v23 = vpop.f32.mrb[9].mxu1  ;;  %v758_v54 = vld [vmem:[%s4077_s19 + $0xa8] sm:$0xff] }
 0x17c   : > { %1084 = vst [vmem:[%s4077_s19 + $0x50] sm:$0xff] %v1052_v57  ;;  %v1355_v25 = vadd.f32 %v1316_v23, %v1114_v16  ;;  %v3273_v26 = vpop.f32.mrb[10].mxu1  ;;  %v759_v57 = vld [vmem:[%s4077_s19 + $0xb0] sm:$0xff] }
 0x17d   : > { %1085 = vst [vmem:[%s4077_s19 + $0x58] sm:$0xff] %v1053_v61  ;;  %1373 = vst [vmem:[#allocation2 + $0x50] sm:$0xff] %v1357_v22  ;;  %v1358_v28 = vadd.f32 %v3273_v26, %v1117_v20  ;;  %v1319_v29 = vpop.f32.mrb[11].mxu1  ;;  %v768_v20 = vld [vmem:[%s4077_s19 + $0xf8] sm:$0xff] }
 0x17e   : > { %1371 = vst [vmem:[#allocation2 + $0x40] sm:$0xff] %v1355_v25  ;;  %v1356_v31 = vadd.f32 %v1319_v29, %v1115_v24 }
 0x17f   : > { %v993_v8 = vpop.f32.mrb[12].mxu0  ;;  %1374 = vst [vmem:[#allocation2 + $0x58] sm:$0xff] %v1358_v28 }
 0x180   : > { %v1054_v10 = vadd.f32 %v993_v8, %v749_v3  ;;  %v995_v11 = vpop.f32.mrb[13].mxu0  ;;  %1372 = vst [vmem:[#allocation2 + $0x48] sm:$0xff] %v1356_v31  ;;  %v762_v3 = vld [vmem:[%s4077_s19 + $0xc8] sm:$0xff]  ;;  %v764_v8 = vld [vmem:[%s4077_s19 + $0xd8] sm:$0xff] }
 0x181   : > { %v1055_v14 = vadd.f32 %v995_v11, %v750_v6  ;;  %v997_v15 = vpop.f32.mrb[14].mxu0 }
 0x182   : > { %1086 = vst [vmem:[%s4077_s19 + $0x60] sm:$0xff] %v1054_v10  ;;  %v1056_v17 = vadd.f32 %v997_v15, %v751_v9  ;;  %v999_v18 = vpop.f32.mrb[15].mxu0  ;;  %v3276_v43 = vpop.f32.mrb[12].mxu1  ;;  %v766_v15 = vld [vmem:[%s4077_s19 + $0xe8] sm:$0xff] }
 0x183   : > { %1087 = vst [vmem:[%s4077_s19 + $0x68] sm:$0xff] %v1055_v14  ;;  %v1057_v21 = vadd.f32 %v999_v18, %v752_v12  ;;  %v1361_v46 = vadd.f32 %v3276_v43, %v1120_v37  ;;  %v1332_v47 = vpop.f32.mrb[13].mxu1  ;;  %v765_v14 = vld [vmem:[%s4077_s19 + $0xe0] sm:$0xff] }
 0x184   : > { %1088 = vst [vmem:[%s4077_s19 + $0x70] sm:$0xff] %v1056_v17  ;;  %v1359_v49 = vadd.f32 %v1332_v47, %v1118_v40  ;;  %v3277_v50 = vpop.f32.mrb[14].mxu1  ;;  %v767_v17 = vld [vmem:[%s4077_s19 + $0xf0] sm:$0xff] }
 0x185   : > { %1089 = vst [vmem:[%s4077_s19 + $0x78] sm:$0xff] %v1057_v21  ;;  %1377 = vst [vmem:[#allocation2 + $0x70] sm:$0xff] %v1361_v46  ;;  %v1362_v52 = vadd.f32 %v3277_v50, %v1121_v44  ;;  %v1335_v53 = vpop.f32.mrb[15].mxu1 }
 0x186   : > { %1375 = vst [vmem:[#allocation2 + $0x60] sm:$0xff] %v1359_v49  ;;  %v1360_v55 = vadd.f32 %v1335_v53, %v1119_v48 }
 0x187   : > { %v1003_v32 = vpop.f32.mrb[16].mxu0  ;;  %1378 = vst [vmem:[#allocation2 + $0x78] sm:$0xff] %v1362_v52 }
 0x188   : > { %v1058_v34 = vadd.f32 %v1003_v32, %v753_v27  ;;  %v1005_v35 = vpop.f32.mrb[17].mxu0  ;;  %1376 = vst [vmem:[#allocation2 + $0x68] sm:$0xff] %v1360_v55 }
 0x189   : > { %v1059_v38 = vadd.f32 %v1005_v35, %v754_v30  ;;  %v1007_v39 = vpop.f32.mrb[18].mxu0 }
 0x18a   : > { %1090 = vst [vmem:[%s4077_s19 + $0x80] sm:$0xff] %v1058_v34  ;;  %v1060_v41 = vadd.f32 %v1007_v39, %v755_v33  ;;  %v1009_v42 = vpop.f32.mrb[19].mxu0 }
 0x18b   : > { %1091 = vst [vmem:[%s4077_s19 + $0x88] sm:$0xff] %v1059_v38  ;;  %v1061_v45 = vadd.f32 %v1009_v42, %v756_v36 }
 0x18c   : > { %1092 = vst [vmem:[%s4077_s19 + $0x90] sm:$0xff] %v1060_v41 }
 0x18d   : > { %1093 = vst [vmem:[%s4077_s19 + $0x98] sm:$0xff] %v1061_v45 }
 0x18f   : > { %v1013_v56 = vpop.f32.mrb[20].mxu0 }
 0x190   : > { %v1062_v58 = vadd.f32 %v1013_v56, %v757_v51  ;;  %v1015_v59 = vpop.f32.mrb[21].mxu0 }
 0x191   : > { %v1063_v61 = vadd.f32 %v1015_v59, %v758_v54  ;;  %v1017_v62 = vpop.f32.mrb[22].mxu0 }
 0x192   : > { %1094 = vst [vmem:[%s4077_s19 + $0xa0] sm:$0xff] %v1062_v58  ;;  %v1064_v63 = vadd.f32 %v1017_v62, %v759_v57  ;;  %v1019_v0 = vpop.f32.mrb[23].mxu0 }
 0x193   : > { %1095 = vst [vmem:[%s4077_s19 + $0xa8] sm:$0xff] %v1063_v61  ;;  %v1065_v1 = vadd.f32 %v1019_v0, %v760_v60 }
 0x194   : > { %1096 = vst [vmem:[%s4077_s19 + $0xb0] sm:$0xff] %v1064_v63 }
 0x195   : > { %1097 = vst [vmem:[%s4077_s19 + $0xb8] sm:$0xff] %v1065_v1 }
 0x197   : > { %v1023_v4 = vpop.f32.mrb[24].mxu0 }
 0x198   : > { %v1066_v6 = vadd.f32 %v1023_v4, %v761_v2  ;;  %v1025_v7 = vpop.f32.mrb[25].mxu0 }
 0x199   : > { %v1067_v9 = vadd.f32 %v1025_v7, %v762_v3  ;;  %v1027_v10 = vpop.f32.mrb[26].mxu0 }
 0x19a   : > { %1098 = vst [vmem:[%s4077_s19 + $0xc0] sm:$0xff] %v1066_v6  ;;  %v1068_v11 = vadd.f32 %v1027_v10, %v763_v5  ;;  %v1029_v12 = vpop.f32.mrb[27].mxu0 }
 0x19b   : > { %1099 = vst [vmem:[%s4077_s19 + $0xc8] sm:$0xff] %v1067_v9  ;;  %v1069_v13 = vadd.f32 %v1029_v12, %v764_v8 }
 0x19c   : > { %1100 = vst [vmem:[%s4077_s19 + $0xd0] sm:$0xff] %v1068_v11 }
 0x19d   : > { %1101 = vst [vmem:[%s4077_s19 + $0xd8] sm:$0xff] %v1069_v13 }
 0x19f   : > { %v1033_v16 = vpop.f32.mrb[28].mxu0  ;;  %1382 = sbr.rel (%p3138_p6) target bundleno = 1272 (0x4f8), region = 142 }
 0x1a0   : > { %v1070_v18 = vadd.f32 %v1033_v16, %v765_v14  ;;  %v1035_v19 = vpop.f32.mrb[29].mxu0 }
 0x1a1   : > { %v1071_v21 = vadd.f32 %v1035_v19, %v766_v15  ;;  %v1037_v22 = vpop.f32.mrb[30].mxu0 }
 0x1a2   : > { %1102 = vst [vmem:[%s4077_s19 + $0xe0] sm:$0xff] %v1070_v18  ;;  %v1072_v23 = vadd.f32 %v1037_v22, %v767_v17  ;;  %v1039_v24 = vpop.f32.mrb[31].mxu0 }
 0x1a3   : > { %1103 = vst [vmem:[%s4077_s19 + $0xe8] sm:$0xff] %v1071_v21  ;;  %v1073_v25 = vadd.f32 %v1039_v24, %v768_v20 }
 0x1a4   : > { %1104 = vst [vmem:[%s4077_s19 + $0xf0] sm:$0xff] %v1072_v23 }
 0x1a5   : > { %1105 = vst [vmem:[%s4077_s19 + $0xf8] sm:$0xff] %v1073_v25 }
 0x1a6   : > { %v1401_v26 = vld [vmem:[%s4066_s0 + $0x10] sm:$0xff]  ;;  %v1399_v27 = vld [vmem:[%s4066_s0] sm:$0xff]  ;;  %v3839_v28 = vmov 0   ;;  %v1402_v29 = vld [vmem:[%s4066_s0 + $0x18] sm:$0xff]  ;;  %vm1527_vm0 = vcmask 523264   ;;  %s3840_s13 = smov 64  }
 0x1a7   : > { %3532 = vset.pattern.permute.xlu1 %v3839_v28  ;;  %3531 = vset.pattern.permute.xlu0 %v3839_v28  ;;  %v1400_v30 = vld [vmem:[%s4066_s0 + $0x8] sm:$0xff]  ;;  %v4230_v31 = vld [vmem:[%s4061_s20] sm:$0xff]  ;;  %v1406_v36 = vld [vmem:[%s4066_s0 + $0x38] sm:$0xff]  ;;  %vm2500_vm1 = vcmask 7168   ;;  %vm2597_vm2 = vcmask 15368   ;;  %vm2758_vm3 = vcmask 23568  }
 0x1a8   : > { %1427 = vperm.xlu1 %3532, %v1401_v26   ;;  %1417 = vperm.xlu0 %3531, %v1399_v27   ;;  %v1992_v32 = vmax.f32 %v4230_v31, 0.0  ;;  %v1404_v33 = vld [vmem:[%s4066_s0 + $0x28] sm:$0xff]  ;;  %v1403_v34 = vld [vmem:[%s4066_s0 + $0x20] sm:$0xff]  ;;  %v1405_v37 = vld [vmem:[%s4066_s0 + $0x30] sm:$0xff]  ;;  %vm2855_vm4 = vcmask 31768  }
 0x1a9   : > { %v2008_v35 = vld [vmem:[%s5044_s6] sm:$0xff]  ;;  %v2009_v38 = vld [vmem:[%s5044_s6 + $0x8] sm:$0xff]  ;;  %v2010_v40 = vld [vmem:[%s5044_s6 + $0x10] sm:$0xff] }
 0x1aa   : > { %3294 = vmatprep.mubr.msk.f32.mxu0 %vm1527_vm0, %v1992_v32  ;;  %v3358_v39 = vpack.c.bf16 %v2009_v38, %v2008_v35  ;;  %v2011_v41 = vld [vmem:[%s5044_s6 + $0x18] sm:$0xff]  ;;  %v2012_v43 = vld [vmem:[%s5044_s6 + $0x20] sm:$0xff]  ;;  %v2013_v44 = vld [vmem:[%s5044_s6 + $0x28] sm:$0xff] }
 0x1ab   : > { %v3362_v42 = vpack.c.bf16 %v2011_v41, %v2010_v40  ;;  %v1408_v45 = vld [vmem:[%s4066_s0 + $0x48] sm:$0xff]  ;;  %v1407_v46 = vld [vmem:[%s4066_s0 + $0x40] sm:$0xff]  ;;  %v3366_v47 = vpack.c.bf16 %v2013_v44, %v2012_v43  ;;  %v2014_v48 = vld [vmem:[%s5044_s6 + $0x30] sm:$0xff] }
 0x1ac   : > { %1432 = vperm.xlu1 %3532, %v1402_v29   ;;  %1422 = vperm.xlu0 %3531, %v1400_v30   ;;  %v2015_v49 = vld [vmem:[%s5044_s6 + $0x38] sm:$0xff]  ;;  %v1409_v51 = vld [vmem:[%s4066_s0 + $0x50] sm:$0xff]  ;;  %v1412_v53 = vld [vmem:[%s4066_s0 + $0x68] sm:$0xff] }
 0x1ad   : > { %3359 = vmatprep.subr.bf16.mxu0 %v3358_v39  ;;  %3375 = vmatprep.subr.bf16.mxu1 %v3358_v39  ;;  %v1410_v50 = vld [vmem:[%s4066_s0 + $0x58] sm:$0xff]  ;;  %v3370_v52 = vpack.c.bf16 %v2015_v49, %v2014_v48  ;;  %v1411_v54 = vld [vmem:[%s4066_s0 + $0x60] sm:$0xff]  ;;  %v1977_v55 = vld [vmem:[%s4061_s20 + $0x8] sm:$0xff] }
 0x1ae   : > { %3361 = vmatpush3.bf16.msra.mxu0 %v3358_v39  ;;  %3377 = vmatpush3.bf16.msra.mxu1 %v3358_v39  ;;  %v1414_v56 = vld [vmem:[%s4066_s0 + $0x78] sm:$0xff]  ;;  %v1413_v57 = vld [vmem:[%s4066_s0 + $0x70] sm:$0xff]  ;;  %v1993_v59 = vmax.f32 %v1977_v55, 0.0  ;;  %v1980_v62 = vld [vmem:[%s4061_s20 + $0x20] sm:$0xff] }
 0x1af   : > { %3363 = vmatprep.subr.bf16.mxu0 %v3362_v42  ;;  %3379 = vmatprep.subr.bf16.mxu1 %v3362_v42  ;;  %v1978_v58 = vld [vmem:[%s4061_s20 + $0x10] sm:$0xff]  ;;  %v1979_v61 = vld [vmem:[%s4061_s20 + $0x18] sm:$0xff]  ;;  %v1996_v0 = vmax.f32 %v1980_v62, 0.0  ;;  %v1981_v1 = vld [vmem:[%s4061_s20 + $0x28] sm:$0xff] }
 0x1b0   : > { %1442 = vperm.xlu1 %3532, %v1404_v33   ;;  %1437 = vperm.xlu0 %3531, %v1403_v34   ;;  %v1994_v60 = vmax.f32 %v1978_v58, 0.0  ;;  %v1995_v63 = vmax.f32 %v1979_v61, 0.0  ;;  %v1982_v2 = vld [vmem:[%s4061_s20 + $0x30] sm:$0xff]  ;;  %v1997_v3 = vmax.f32 %v1981_v1, 0.0  ;;  %v1983_v5 = vld [vmem:[%s4061_s20 + $0x38] sm:$0xff]  ;;  %v1984_v6 = vld [vmem:[%s4061_s20 + $0x40] sm:$0xff] }
 0x1b1   : > { %v1998_v4 = vmax.f32 %v1982_v2, 0.0  ;;  %v1999_v7 = vmax.f32 %v1983_v5, 0.0  ;;  %v2000_v8 = vmax.f32 %v1984_v6, 0.0  ;;  %v1985_v9 = vld [vmem:[%s4061_s20 + $0x48] sm:$0xff]  ;;  %v1986_v10 = vld [vmem:[%s4061_s20 + $0x50] sm:$0xff]  ;;  %v1987_v13 = vld [vmem:[%s4061_s20 + $0x58] sm:$0xff] }
 0x1b2   : > { %3365 = vmatpush3.bf16.msra.mxu0 %v3362_v42  ;;  %3381 = vmatpush3.bf16.msra.mxu1 %v3362_v42  ;;  %v2001_v11 = vmax.f32 %v1985_v9, 0.0  ;;  %v2002_v12 = vmax.f32 %v1986_v10, 0.0  ;;  %v1988_v14 = vld [vmem:[%s4061_s20 + $0x60] sm:$0xff]  ;;  %v2003_v15 = vmax.f32 %v1987_v13, 0.0  ;;  %v1989_v17 = vld [vmem:[%s4061_s20 + $0x68] sm:$0xff]  ;;  %v1990_v18 = vld [vmem:[%s4061_s20 + $0x70] sm:$0xff] }
 0x1b3   : > { %3367 = vmatprep.subr.bf16.mxu0 %v3366_v47  ;;  %3383 = vmatprep.subr.bf16.mxu1 %v3366_v47  ;;  %v2004_v16 = vmax.f32 %v1988_v14, 0.0  ;;  %v2005_v19 = vmax.f32 %v1989_v17, 0.0  ;;  %v2006_v20 = vmax.f32 %v1990_v18, 0.0  ;;  %v1991_v21 = vld [vmem:[%s4061_s20 + $0x78] sm:$0xff]  ;;  %v1385_v23 = vld [vmem:[#allocation2 + $0x10] sm:$0xff]  ;;  %v1383_v24 = vld [vmem:[#allocation2] sm:$0xff] }
 0x1b4   : > { %1452 = vperm.xlu1 %3532, %v1406_v36   ;;  %1447 = vperm.xlu0 %3531, %v1405_v37   ;;  %v2007_v22 = vmax.f32 %v1991_v21, 0.0  ;;  %v1384_v29 = vld [vmem:[#allocation2 + $0x8] sm:$0xff]  ;;  %v1387_v36 = vld [vmem:[#allocation2 + $0x20] sm:$0xff]  ;;  %v1389_v6 = vld [vmem:[#allocation2 + $0x30] sm:$0xff]  ;;  %s4680_s20 = sld [smem:[#allocation3]] }
 0x1b5   : > { %v1388_v40 = vld [vmem:[#allocation2 + $0x28] sm:$0xff] }
 0x1b6   : > { %3369 = vmatpush3.bf16.msra.mxu0 %v3366_v47  ;;  %3385 = vmatpush3.bf16.msra.mxu1 %v3366_v47 }
 0x1b7   : > { %3371 = vmatprep.subr.bf16.mxu0 %v3370_v52  ;;  %3387 = vmatprep.subr.bf16.mxu1 %v3370_v52 }
 0x1b8   : > { %1462 = vperm.xlu1 %3532, %v1408_v45   ;;  %1457 = vperm.xlu0 %3531, %v1407_v46  }
 0x1ba   : > { %3373 = vmatpush3.bf16.msra.mxu0 %v3370_v52  ;;  %3389 = vmatpush3.bf16.msra.mxu1 %v3370_v52 }
 0x1bc   : > { %1472 = vperm.xlu1 %3532, %v1410_v50   ;;  %1467 = vperm.xlu0 %3531, %v1409_v51  }
 0x1bd   : > { %3295 = vmatmul.mubr.msk.f32.vlgmr.msra.gmra.mrb[0].mxu0 %vm1527_vm0, %v1993_v59 }
 0x1be   : > { %3297 = vmatprep.mubr.msk.f32.mxu0 %vm1527_vm0, %v1994_v60 }
 0x1c0   : > { %1482 = vperm.xlu1 %3532, %v1412_v53   ;;  %1477 = vperm.xlu0 %3531, %v1411_v54  }
 0x1c1   : > { %3298 = vmatmul.mubr.msk.f32.gmra.mrb[2].mxu0 %vm1527_vm0, %v1995_v63 }
 0x1c2   : > { %3300 = vmatprep.mubr.msk.f32.mxu0 %vm1527_vm0, %v1996_v0 }
 0x1c4   : > { %1492 = vperm.xlu1 %3532, %v1414_v56   ;;  %1487 = vperm.xlu0 %3531, %v1413_v57  }
 0x1c5   : > { %3301 = vmatmul.mubr.msk.f32.gmra.mrb[4].mxu0 %vm1527_vm0, %v1997_v3 }
 0x1c6   : > { %3303 = vmatprep.mubr.msk.f32.mxu0 %vm1527_vm0, %v1998_v4 }
 0x1c8   : > { %2209 = vrot.lane.b32.xlu0 %v1992_v32, %s3840_s13  ;;  %2211 = vrot.lane.b32.xlu1 %v1993_v59, %s3840_s13  ;;  %v1386_v32 = vld [vmem:[#allocation2 + $0x18] sm:$0xff] }
 0x1c9   : > { %3304 = vmatmul.mubr.msk.f32.gmra.mrb[6].mxu0 %vm1527_vm0, %v1999_v7 }
 0x1ca   : > { %3306 = vmatprep.mubr.msk.f32.mxu0 %vm1527_vm0, %v2000_v8 }
 0x1cc   : > { %2213 = vrot.lane.b32.xlu0 %v1994_v60, %s3840_s13  ;;  %2215 = vrot.lane.b32.xlu1 %v1995_v63, %s3840_s13 }
 0x1cd   : > { %3307 = vmatmul.mubr.msk.f32.gmra.mrb[8].mxu0 %vm1527_vm0, %v2001_v11 }
 0x1ce   : > { %3309 = vmatprep.mubr.msk.f32.mxu0 %vm1527_vm0, %v2002_v12 }
 0x1d0   : > { %2217 = vrot.lane.b32.xlu0 %v1996_v0, %s3840_s13  ;;  %2219 = vrot.lane.b32.xlu1 %v1997_v3, %s3840_s13  ;;  %v1390_v3 = vld [vmem:[#allocation2 + $0x38] sm:$0xff] }
 0x1d1   : > { %3310 = vmatmul.mubr.msk.f32.gmra.mrb[10].mxu0 %vm1527_vm0, %v2003_v15 }
 0x1d2   : > { %3312 = vmatprep.mubr.msk.f32.mxu0 %vm1527_vm0, %v2004_v16 }
 0x1d4   : > { %2221 = vrot.lane.b32.xlu0 %v1998_v4, %s3840_s13  ;;  %2223 = vrot.lane.b32.xlu1 %v1999_v7, %s3840_s13 }
 0x1d5   : > { %3313 = vmatmul.mubr.msk.f32.gmra.mrb[12].mxu0 %vm1527_vm0, %v2005_v19 }
 0x1d6   : > { %3315 = vmatprep.mubr.msk.f32.mxu0 %vm1527_vm0, %v2006_v20 }
 0x1d8   : > { %2225 = vrot.lane.b32.xlu0 %v2000_v8, %s3840_s13  ;;  %2227 = vrot.lane.b32.xlu1 %v2001_v11, %s3840_s13 }
 0x1d9   : > { %3316 = vmatmul.mubr.msk.f32.gmra.mrb[14].mxu0 %vm1527_vm0, %v2007_v22 }
 0x1dc   : > { %2229 = vrot.lane.b32.xlu0 %v2002_v12, %s3840_s13  ;;  %2231 = vrot.lane.b32.xlu1 %v2003_v15, %s3840_s13 }
 0x1e0   : > { %2233 = vrot.lane.b32.xlu0 %v2004_v16, %s3840_s13  ;;  %2235 = vrot.lane.b32.xlu1 %v2005_v19, %s3840_s13 }
 0x1e4   : > { %2237 = vrot.lane.b32.xlu0 %v2006_v20, %s3840_s13  ;;  %2239 = vrot.lane.b32.xlu1 %v2007_v22, %s3840_s13 }
 0x227   : > { %v1428_v25 = vpop.permute.xlu1 %1427  ;;  %v1418_v26 = vpop.permute.xlu0 %1417 }
 0x228   : > { %v4320_v27 = vmul.f32 %v1428_v25, %v1385_v23  ;;  %v4322_v28 = vmul.f32 %v1418_v26, %v1383_v24  ;;  %v1392_v23 = vld [vmem:[#allocation2 + $0x48] sm:$0xff]  ;;  %v1391_v25 = vld [vmem:[#allocation2 + $0x40] sm:$0xff]  ;;  %v1394_v26 = vld [vmem:[#allocation2 + $0x58] sm:$0xff] }
 0x22a   : > { %v1511_v30 = vmul.f32 %v4322_v28, %v4322_v28  ;;  %v1513_v35 = vmul.f32 %v4320_v27, %v4320_v27 }
 0x22b   : > { %v1433_v31 = vpop.permute.xlu1 %1432  ;;  %v1423_v33 = vpop.permute.xlu0 %1422 }
 0x22c   : > { %v4326_v34 = vmul.f32 %v1423_v33, %v1384_v29  ;;  %1640 = vrot.lane.b32.xlu1 %v1511_v30, %s3840_s13  ;;  %v4331_v37 = vmul.f32 %v1433_v31, %v1386_v32  ;;  %v1528_v63 = vsel %vm1527_vm0, %v1511_v30, 0.0  ;;  %v1534_v2 = vsel %vm1527_vm0, %v1513_v35, 0.0  ;;  %v1393_v32 = vld [vmem:[#allocation2 + $0x50] sm:$0xff]  ;;  %v1396_v33 = vld [vmem:[#allocation2 + $0x68] sm:$0xff] }
 0x22e   : > { %v1512_v38 = vmul.f32 %v4326_v34, %v4326_v34  ;;  %v1514_v45 = vmul.f32 %v4331_v37, %v4331_v37 }
 0x22f   : > { %v1443_v39 = vpop.permute.xlu1 %1442  ;;  %v1438_v41 = vpop.permute.xlu0 %1437 }
 0x230   : > { %v4335_v42 = vmul.f32 %v1438_v41, %v1387_v36  ;;  %1642 = vrot.lane.b32.xlu0 %v1512_v38, %s3840_s13  ;;  %1644 = vrot.lane.b32.xlu1 %v1513_v35, %s3840_s13  ;;  %v4339_v43 = vmul.f32 %v1443_v39, %v1388_v40  ;;  %v1537_v8 = vsel %vm1527_vm0, %v1514_v45, 0.0  ;;  %v1531_v10 = vsel %vm1527_vm0, %v1512_v38, 0.0  ;;  %v1395_v40 = vld [vmem:[#allocation2 + $0x60] sm:$0xff]  ;;  %v1398_v41 = vld [vmem:[#allocation2 + $0x78] sm:$0xff] }
 0x232   : > { %v1515_v44 = vmul.f32 %v4335_v42, %v4335_v42  ;;  %v1516_v48 = vmul.f32 %v4339_v43, %v4339_v43 }
 0x233   : > { %v1453_v46 = vpop.permute.xlu1 %1452  ;;  %v1448_v47 = vpop.permute.xlu0 %1447 }
 0x234   : > { %1648 = vrot.lane.b32.xlu0 %v1515_v44, %s3840_s13  ;;  %1646 = vrot.lane.b32.xlu1 %v1514_v45, %s3840_s13  ;;  %v4378_v7 = vmul.f32 %v1453_v46, %v1390_v3  ;;  %v4381_v9 = vmul.f32 %v1448_v47, %v1389_v6  ;;  %v1543_v13 = vsel %vm1527_vm0, %v1516_v48, 0.0  ;;  %v1540_v15 = vsel %vm1527_vm0, %v1515_v44, 0.0 }
 0x236   : > { %v1518_v14 = vmul.f32 %v4378_v7, %v4378_v7  ;;  %v1517_v16 = vmul.f32 %v4381_v9, %v4381_v9 }
 0x237   : > { %v4349_v49 = vpop.permute.xlu1 %1462  ;;  %v4351_v50 = vpop.permute.xlu0 %1457 }
 0x238   : > { %1650 = vrot.lane.b32.xlu1 %v1516_v48, %s3840_s13  ;;  %v1549_v19 = vsel %vm1527_vm0, %v1518_v14, 0.0  ;;  %v1546_v20 = vsel %vm1527_vm0, %v1517_v16, 0.0  ;;  %v4399_v24 = vmul.f32 %v4349_v49, %v1392_v23  ;;  %v4403_v29 = vmul.f32 %v4351_v50, %v1391_v25  ;;  %v1397_v48 = vld [vmem:[#allocation2 + $0x70] sm:$0xff] }
 0x23a   : > { %v1520_v31 = vmul.f32 %v4399_v24, %v4399_v24  ;;  %v1519_v39 = vmul.f32 %v4403_v29, %v4403_v29 }
 0x23b   : > { %v4354_v51 = vpop.permute.xlu1 %1472  ;;  %v4356_v52 = vpop.permute.xlu0 %1467 }
 0x23c   : > { %v4406_v30 = vmul.f32 %v4354_v51, %v1394_v26  ;;  %v4413_v35 = vmul.f32 %v4356_v52, %v1393_v32 }
 0x23e   : > { %v1522_v38 = vmul.f32 %v4406_v30, %v4406_v30  ;;  %v1521_v47 = vmul.f32 %v4413_v35, %v4413_v35 }
 0x23f   : > { %v4358_v53 = vpop.permute.xlu1 %1482  ;;  %v4360_v54 = vpop.permute.xlu0 %1477 }
 0x240   : > { %v4416_v36 = vmul.f32 %v4358_v53, %v1396_v33  ;;  %v4425_v44 = vmul.f32 %v4360_v54, %v1395_v40 }
 0x242   : > { %v1524_v46 = vmul.f32 %v4416_v36, %v4416_v36  ;;  %v1523_v51 = vmul.f32 %v4425_v44, %v4425_v44 }
 0x243   : > { %v4362_v55 = vpop.permute.xlu1 %1492  ;;  %v4364_v56 = vpop.permute.xlu0 %1487 }
 0x244   : > { %v4428_v45 = vmul.f32 %v4362_v55, %v1398_v41  ;;  %v4437_v49 = vmul.f32 %v4364_v56, %v1397_v48  ;;  %v1564_v3 = vsel %vm1527_vm0, %v1523_v51, 0.0 }
 0x246   : > { %v1526_v50 = vmul.f32 %v4428_v45, %v4428_v45  ;;  %v1525_v52 = vmul.f32 %v4437_v49, %v4437_v49 }
 0x247   : > { %v2210_v57 = vpop.permute.xlu0 %2209  ;;  %v2212_v58 = vpop.permute.xlu1 %2211 }
 0x248   : > { %3334 = vmatprep.mubr.msk.f32.mxu1 %vm1527_vm0, %v2210_v57 }
 0x249   : > { %3335 = vmatmul.mubr.msk.f32.vlgmr.msra.gmra.mrb[0].mxu1 %vm1527_vm0, %v2212_v58 }
 0x24b   : > { %v2214_v59 = vpop.permute.xlu0 %2213  ;;  %v2216_v60 = vpop.permute.xlu1 %2215 }
 0x24c   : > { %3337 = vmatprep.mubr.msk.f32.mxu1 %vm1527_vm0, %v2214_v59 }
 0x24d   : > { %3338 = vmatmul.mubr.msk.f32.gmra.mrb[2].mxu1 %vm1527_vm0, %v2216_v60 }
 0x24f   : > { %v2218_v61 = vpop.permute.xlu0 %2217  ;;  %v2220_v62 = vpop.permute.xlu1 %2219 }
 0x250   : > { %3340 = vmatprep.mubr.msk.f32.mxu1 %vm1527_vm0, %v2218_v61  ;;  %v1552_v61 = vsel %vm1527_vm0, %v1519_v39, 0.0 }
 0x251   : > { %3341 = vmatmul.mubr.msk.f32.gmra.mrb[4].mxu1 %vm1527_vm0, %v2220_v62  ;;  %v1555_v62 = vsel %vm1527_vm0, %v1520_v31, 0.0 }
 0x253   : > { %v2222_v0 = vpop.permute.xlu0 %2221  ;;  %1529 = vadd.xlane.f32.xlu0 %v1528_v63  ;;  %v2224_v1 = vpop.permute.xlu1 %2223  ;;  %v1561_v63 = vsel %vm1527_vm0, %v1522_v38, 0.0 }
 0x254   : > { %3343 = vmatprep.mubr.msk.f32.mxu1 %vm1527_vm0, %v2222_v0  ;;  %v1558_v0 = vsel %vm1527_vm0, %v1521_v47, 0.0 }
 0x255   : > { %3344 = vmatmul.mubr.msk.f32.gmra.mrb[6].mxu1 %vm1527_vm0, %v2224_v1 }
 0x257   : > { %1535 = vadd.xlane.f32.xlu0 %v1534_v2  ;;  %v2226_v4 = vpop.permute.xlu0 %2225  ;;  %v2228_v5 = vpop.permute.xlu1 %2227  ;;  %v1567_v2 = vsel %vm1527_vm0, %v1524_v46, 0.0 }
 0x258   : > { %3346 = vmatprep.mubr.msk.f32.mxu1 %vm1527_vm0, %v2226_v4 }
 0x259   : > { %3347 = vmatmul.mubr.msk.f32.gmra.mrb[8].mxu1 %vm1527_vm0, %v2228_v5  ;;  %v1573_v5 = vsel %vm1527_vm0, %v1526_v50, 0.0 }
 0x25b   : > { %1538 = vadd.xlane.f32.xlu0 %v1537_v8  ;;  %v2230_v11 = vpop.permute.xlu0 %2229  ;;  %v2232_v12 = vpop.permute.xlu1 %2231  ;;  %v1570_v8 = vsel %vm1527_vm0, %v1525_v52, 0.0 }
 0x25c   : > { %1532 = vadd.xlane.f32.xlu1 %v1531_v10  ;;  %3349 = vmatprep.mubr.msk.f32.mxu1 %vm1527_vm0, %v2230_v11 }
 0x25d   : > { %3350 = vmatmul.mubr.msk.f32.gmra.mrb[10].mxu1 %vm1527_vm0, %v2232_v12 }
 0x25f   : > { %1544 = vadd.xlane.f32.xlu0 %v1543_v13  ;;  %v2234_v17 = vpop.permute.xlu0 %2233  ;;  %v2236_v18 = vpop.permute.xlu1 %2235 }
 0x260   : > { %1541 = vadd.xlane.f32.xlu1 %v1540_v15  ;;  %3352 = vmatprep.mubr.msk.f32.mxu1 %vm1527_vm0, %v2234_v17 }
 0x261   : > { %3353 = vmatmul.mubr.msk.f32.gmra.mrb[12].mxu1 %vm1527_vm0, %v2236_v18 }
 0x263   : > { %1550 = vadd.xlane.f32.xlu0 %v1549_v19  ;;  %v2238_v21 = vpop.permute.xlu0 %2237  ;;  %v2240_v22 = vpop.permute.xlu1 %2239 }
 0x264   : > { %1547 = vadd.xlane.f32.xlu1 %v1546_v20  ;;  %3355 = vmatprep.mubr.msk.f32.mxu1 %vm1527_vm0, %v2238_v21 }
 0x265   : > { %3356 = vmatmul.mubr.msk.f32.gmra.mrb[14].mxu1 %vm1527_vm0, %v2240_v22 }
 0x275   : > { %1654 = vrot.lane.b32.xlu1 %v1518_v14, %s3840_s13 }
 0x279   : > { %1658 = vrot.lane.b32.xlu1 %v1520_v31, %s3840_s13  ;;  %1652 = vrot.lane.b32.xlu0 %v1517_v16, %s3840_s13 }
 0x27d   : > { %1662 = vrot.lane.b32.xlu1 %v1522_v38, %s3840_s13  ;;  %1656 = vrot.lane.b32.xlu0 %v1519_v39, %s3840_s13 }
 0x281   : > { %1666 = vrot.lane.b32.xlu1 %v1524_v46, %s3840_s13  ;;  %1660 = vrot.lane.b32.xlu0 %v1521_v47, %s3840_s13 }
 0x285   : > { %1670 = vrot.lane.b32.xlu1 %v1526_v50, %s3840_s13  ;;  %1664 = vrot.lane.b32.xlu0 %v1523_v51, %s3840_s13 }
 0x289   : > { %1668 = vrot.lane.b32.xlu0 %v1525_v52, %s3840_s13 }
 0x290   : > { %v4448_v53 = vpop.f32.mrb[0].mxu0 }
 0x291   : > { %5087 = vst [vmem:[#allocation19_spill] sm:$0xff] %v4448_v53  ;;  %v4450_v54 = vpop.f32.mrb[1].mxu0 }
 0x292   : > { %5088 = vst [vmem:[#allocation20_spill] sm:$0xff] %v4450_v54 }
 0x294   : > { %v4452_v55 = vpop.f32.mrb[2].mxu0 }
 0x295   : > { %5089 = vst [vmem:[#allocation21_spill] sm:$0xff] %v4452_v55  ;;  %v4454_v56 = vpop.f32.mrb[3].mxu0 }
 0x296   : > { %5090 = vst [vmem:[#allocation22_spill] sm:$0xff] %v4454_v56 }
 0x298   : > { %v4456_v57 = vpop.f32.mrb[4].mxu0 }
 0x299   : > { %5091 = vst [vmem:[#allocation23_spill] sm:$0xff] %v4456_v57  ;;  %v4458_v58 = vpop.f32.mrb[5].mxu0 }
 0x29a   : > { %5092 = vst [vmem:[#allocation24_spill] sm:$0xff] %v4458_v58 }
 0x29c   : > { %v4460_v59 = vpop.f32.mrb[6].mxu0 }
 0x29d   : > { %5093 = vst [vmem:[#allocation25_spill] sm:$0xff] %v4460_v59  ;;  %v4462_v60 = vpop.f32.mrb[7].mxu0 }
 0x29e   : > { %5094 = vst [vmem:[#allocation26_spill] sm:$0xff] %v4462_v60  ;;  %v1641_v1 = vpop.permute.xlu1 %1640 }
 0x29f   : > { %v1688_v10 = vsel %vm1527_vm0, %v1641_v1, 0.0 }
 0x2a0   : > { %v4478_v21 = vpop.f32.mrb[8].mxu0 }
 0x2a1   : > { %5095 = vst [vmem:[#allocation27_spill] sm:$0xff] %v4478_v21  ;;  %v4480_v22 = vpop.f32.mrb[9].mxu0 }
 0x2a2   : > { %v1643_v4 = vpop.permute.xlu0 %1642  ;;  %v1645_v6 = vpop.permute.xlu1 %1644  ;;  %5096 = vst [vmem:[#allocation28_spill] sm:$0xff] %v4480_v22 }
 0x2a3   : > { %v1694_v11 = vsel %vm1527_vm0, %v1645_v6, 0.0  ;;  %v1691_v14 = vsel %vm1527_vm0, %v1643_v4, 0.0 }
 0x2a4   : > { %v4482_v26 = vpop.f32.mrb[10].mxu0 }
 0x2a5   : > { %v4484_v31 = vpop.f32.mrb[11].mxu0 }
 0x2a6   : > { %v1649_v12 = vpop.permute.xlu0 %1648  ;;  %v1647_v13 = vpop.permute.xlu1 %1646 }
 0x2a7   : > { %v1700_v15 = vsel %vm1527_vm0, %v1649_v12, 0.0  ;;  %v1697_v16 = vsel %vm1527_vm0, %v1647_v13, 0.0 }
 0x2a8   : > { %1553 = vadd.xlane.f32.xlu0 %v1552_v61  ;;  %v4486_v39 = vpop.f32.mrb[12].mxu0 }
 0x2a9   : > { %1556 = vadd.xlane.f32.xlu1 %v1555_v62  ;;  %5097 = vst [vmem:[#allocation29_spill] sm:$0xff] %v4486_v39  ;;  %v4488_v41 = vpop.f32.mrb[13].mxu0 }
 0x2aa   : > { %v1651_v17 = vpop.permute.xlu1 %1650 }
 0x2ab   : > { %v1703_v18 = vsel %vm1527_vm0, %v1651_v17, 0.0 }
 0x2ac   : > { %1562 = vadd.xlane.f32.xlu0 %v1561_v63  ;;  %v4490_v51 = vpop.f32.mrb[14].mxu0 }
 0x2ad   : > { %1559 = vadd.xlane.f32.xlu1 %v1558_v0  ;;  %v4493_v62 = vpop.f32.mrb[15].mxu0 }
 0x2b0   : > { %1568 = vadd.xlane.f32.xlu0 %v1567_v2 }
 0x2b1   : > { %1565 = vadd.xlane.f32.xlu1 %v1564_v3 }
 0x2b4   : > { %1574 = vadd.xlane.f32.xlu0 %v1573_v5 }
 0x2b5   : > { %1571 = vadd.xlane.f32.xlu1 %v1570_v8 }
 0x2b8   : > { %1689 = vadd.xlane.f32.xlu0 %v1688_v10 }
 0x2b9   : > { %1695 = vadd.xlane.f32.xlu1 %v1694_v11 }
 0x2bc   : > { %1692 = vadd.xlane.f32.xlu0 %v1691_v14 }
 0x2bd   : > { %1701 = vadd.xlane.f32.xlu1 %v1700_v15 }
 0x2c0   : > { %1698 = vadd.xlane.f32.xlu0 %v1697_v16 }
 0x2c4   : > { %1704 = vadd.xlane.f32.xlu0 %v1703_v18 }
 0x2e0   : > { %v1530_v19 = vpop.xlane.xlu0 %1529 }
 0x2e1   : > { %v1576_v20 = vmax.f32 %v1530_v19, 1e-24 }
 0x2e3   : > { %3533 = vrsqrt.f32 %v1576_v20 }
 0x2e4   : > { %v1536_v23 = vpop.xlane.xlu0 %1535 }
 0x2e5   : > { %v1578_v25 = vmax.f32 %v1536_v23, 1e-24 }
 0x2e7   : > { %3535 = vrsqrt.f32 %v1578_v25 }
 0x2e8   : > { %v1539_v32 = vpop.xlane.xlu0 %1538 }
 0x2e9   : > { %v1579_v33 = vmax.f32 %v1539_v32, 1e-24  ;;  %v1533_v38 = vpop.xlane.xlu1 %1532 }
 0x2ea   : > { %v1577_v40 = vmax.f32 %v1533_v38, 1e-24 }
 0x2eb   : > { %3537 = vrsqrt.f32 %v1579_v33 }
 0x2ec   : > { %3539 = vrsqrt.f32 %v1577_v40  ;;  %v1545_v46 = vpop.xlane.xlu0 %1544 }
 0x2ed   : > { %v3534_v47 = vpop.eup %3533  ;;  %v1581_v48 = vmax.f32 %v1545_v46, 1e-24  ;;  %v1542_v50 = vpop.xlane.xlu1 %1541 }
 0x2ee   : > { %v1608_v52 = vmul.f32 %v3534_v47, %v4322_v28  ;;  %v1580_v61 = vmax.f32 %v1542_v50, 1e-24 }
 0x2ef   : > { %3541 = vrsqrt.f32 %v1581_v48 }
 0x2f0   : > { %v1784_v63 = vsub.f32 0.0, %v1608_v52  ;;  %3543 = vrsqrt.f32 %v1580_v61  ;;  %v1551_v0 = vpop.xlane.xlu0 %1550 }
 0x2f1   : > { %v3536_v1 = vpop.eup %3535  ;;  %v1583_v2 = vmax.f32 %v1551_v0, 1e-24  ;;  %v1548_v3 = vpop.xlane.xlu1 %1547 }
 0x2f2   : > { %v1800_v4 = vmul.f32 1.442695, %v1784_v63  ;;  %v1610_v5 = vmul.f32 %v3536_v1, %v4320_v27  ;;  %v1582_v6 = vmax.f32 %v1548_v3, 1e-24 }
 0x2f3   : > { %3545 = vrsqrt.f32 %v1583_v2 }
 0x2f4   : > { %3547 = vpow2.f32 %v1800_v4  ;;  %v1786_v8 = vsub.f32 0.0, %v1610_v5  ;;  %v1653_v10 = vpop.permute.xlu0 %1652 }
 0x2f5   : > { %v3538_v11 = vpop.eup %3537  ;;  %3549 = vrsqrt.f32 %v1582_v6  ;;  %v1655_v12 = vpop.permute.xlu1 %1654  ;;  %v1706_v13 = vsel %vm1527_vm0, %v1653_v10, 0.0 }
 0x2f6   : > { %v3540_v14 = vpop.eup %3539  ;;  %v1804_v15 = vmul.f32 1.442695, %v1786_v8  ;;  %v1611_v16 = vmul.f32 %v3538_v11, %v4331_v37  ;;  %1707 = vadd.xlane.f32.xlu1 %v1706_v13  ;;  %v1709_v17 = vsel %vm1527_vm0, %v1655_v12, 0.0 }
 0x2f7   : > { %v1609_v18 = vmul.f32 %v3540_v14, %v4326_v34  ;;  %1710 = vadd.xlane.f32.xlu0 %v1709_v17 }
 0x2f8   : > { %3551 = vpow2.f32 %v1804_v15  ;;  %v1787_v19 = vsub.f32 0.0, %v1611_v16  ;;  %v1657_v20 = vpop.permute.xlu0 %1656 }
 0x2f9   : > { %v3542_v23 = vpop.eup %3541  ;;  %v1785_v25 = vsub.f32 0.0, %v1609_v18  ;;  %v1659_v32 = vpop.permute.xlu1 %1658  ;;  %v1712_v33 = vsel %vm1527_vm0, %v1657_v20, 0.0 }
 0x2fa   : > { %v3544_v38 = vpop.eup %3543  ;;  %v1806_v40 = vmul.f32 1.442695, %v1787_v19  ;;  %v1613_v46 = vmul.f32 %v3542_v23, %v4339_v43  ;;  %1713 = vadd.xlane.f32.xlu1 %v1712_v33  ;;  %v1715_v47 = vsel %vm1527_vm0, %v1659_v32, 0.0 }
 0x2fb   : > { %v1802_v48 = vmul.f32 1.442695, %v1785_v25  ;;  %v1612_v50 = vmul.f32 %v3544_v38, %v4335_v42  ;;  %1716 = vadd.xlane.f32.xlu0 %v1715_v47 }
 0x2fc   : > { %3553 = vpow2.f32 %v1806_v40  ;;  %v1789_v52 = vsub.f32 0.0, %v1613_v46  ;;  %v1661_v61 = vpop.permute.xlu0 %1660 }
 0x2fd   : > { %v3546_v63 = vpop.eup %3545  ;;  %3555 = vpow2.f32 %v1802_v48  ;;  %v1788_v0 = vsub.f32 0.0, %v1612_v50  ;;  %v1663_v1 = vpop.permute.xlu1 %1662  ;;  %v1718_v2 = vsel %vm1527_vm0, %v1661_v61, 0.0 }
 0x2fe   : > { %v3548_v3 = vpop.eup %3547  ;;  %v1810_v4 = vmul.f32 1.442695, %v1789_v52  ;;  %v1615_v5 = vmul.f32 %v3546_v63, %v4378_v7  ;;  %1719 = vadd.xlane.f32.xlu1 %v1718_v2  ;;  %v1721_v6 = vsel %vm1527_vm0, %v1663_v1, 0.0 }
 0x2ff   : > { %v3550_v8 = vpop.eup %3549  ;;  %v1808_v10 = vmul.f32 1.442695, %v1788_v0  ;;  %1722 = vadd.xlane.f32.xlu0 %v1721_v6  ;;  %v1832_v11 = vadd.f32 1.0, %v3548_v3 }
 0x300   : > { %3557 = vpow2.f32 %v1810_v4  ;;  %v1791_v12 = vsub.f32 0.0, %v1615_v5  ;;  %v1614_v13 = vmul.f32 %v3550_v8, %v4381_v9  ;;  %v1665_v14 = vpop.permute.xlu0 %1664 }
 0x301   : > { %3559 = vpow2.f32 %v1808_v10  ;;  %v1667_v15 = vpop.permute.xlu1 %1666  ;;  %v1724_v16 = vsel %vm1527_vm0, %v1665_v14, 0.0 }
 0x302   : > { %v3552_v17 = vpop.eup %3551  ;;  %v1814_v18 = vmul.f32 1.442695, %v1791_v12  ;;  %v1790_v19 = vsub.f32 0.0, %v1614_v13  ;;  %1725 = vadd.xlane.f32.xlu1 %v1724_v16  ;;  %v1727_v20 = vsel %vm1527_vm0, %v1667_v15, 0.0  ;;  %3561 = vrcp.f32 %v1832_v11 }
 0x303   : > { %1728 = vadd.xlane.f32.xlu0 %v1727_v20  ;;  %v1834_v23 = vadd.f32 1.0, %v3552_v17 }
 0x304   : > { %3563 = vpow2.f32 %v1814_v18  ;;  %v1812_v25 = vmul.f32 1.442695, %v1790_v19  ;;  %v1669_v32 = vpop.permute.xlu0 %1668 }
 0x305   : > { %v1671_v33 = vpop.permute.xlu1 %1670  ;;  %v1730_v38 = vsel %vm1527_vm0, %v1669_v32, 0.0  ;;  %3565 = vrcp.f32 %v1834_v23 }
 0x306   : > { %v3554_v40 = vpop.eup %3553  ;;  %3567 = vpow2.f32 %v1812_v25  ;;  %1731 = vadd.xlane.f32.xlu1 %v1730_v38  ;;  %v1733_v46 = vsel %vm1527_vm0, %v1671_v33, 0.0 }
 0x307   : > { %v3556_v47 = vpop.eup %3555  ;;  %1734 = vadd.xlane.f32.xlu0 %v1733_v46  ;;  %v1835_v48 = vadd.f32 1.0, %v3554_v40 }
 0x308   : > { %v1833_v50 = vadd.f32 1.0, %v3556_v47 }
 0x309   : > { %3569 = vrcp.f32 %v1835_v48 }
 0x30a   : > { %v3558_v52 = vpop.eup %3557  ;;  %3571 = vrcp.f32 %v1833_v50 }
 0x30b   : > { %v3560_v61 = vpop.eup %3559  ;;  %v1837_v63 = vadd.f32 1.0, %v3558_v52 }
 0x30c   : > { %v3562_v0 = vpop.eup %3561  ;;  %v1836_v1 = vadd.f32 1.0, %v3560_v61 }
 0x30d   : > { %v2419_v2 = vmul.f32 %v3562_v0, %v4450_v54  ;;  %3573 = vrcp.f32 %v1837_v63 }
 0x30e   : > { %v3564_v3 = vpop.eup %3563  ;;  %3575 = vrcp.f32 %v1836_v1 }
 0x30f   : > { %v3566_v4 = vpop.eup %3565  ;;  %v2435_v5 = vsel %vm1527_vm0, %v2419_v2, 0.0  ;;  %v1839_v6 = vadd.f32 1.0, %v3564_v3 }
 0x310   : > { %v3568_v8 = vpop.eup %3567  ;;  %v2421_v10 = vmul.f32 %v3566_v4, %v4454_v56  ;;  %2436 = vadd.xlane.f32.xlu1 %v2435_v5 }
 0x311   : > { %v1838_v11 = vadd.f32 1.0, %v3568_v8  ;;  %3577 = vrcp.f32 %v1839_v6 }
 0x312   : > { %v2441_v12 = vsel %vm1527_vm0, %v2421_v10, 0.0 }
 0x313   : > { %v3570_v13 = vpop.eup %3569  ;;  %3579 = vrcp.f32 %v1838_v11 }
 0x314   : > { %v3572_v14 = vpop.eup %3571  ;;  %2442 = vadd.xlane.f32.xlu1 %v2441_v12  ;;  %v2422_v17 = vmul.f32 %v3570_v13, %v4452_v55 }
 0x315   : > { %v2420_v15 = vmul.f32 %v3572_v14, %v4448_v53 }
 0x316   : > { %v2444_v25 = vsel %vm1527_vm0, %v2422_v17, 0.0 }
 0x317   : > { %v3574_v16 = vpop.eup %3573  ;;  %v2438_v18 = vsel %vm1527_vm0, %v2420_v15, 0.0 }
 0x318   : > { %v3576_v19 = vpop.eup %3575  ;;  %2439 = vadd.xlane.f32.xlu0 %v2438_v18  ;;  %v2424_v23 = vmul.f32 %v3574_v16, %v4456_v57 }
 0x319   : > { %v2423_v20 = vmul.f32 %v3576_v19, %v4458_v58 }
 0x31a   : > { %v2450_v61 = vsel %vm1527_vm0, %v2424_v23, 0.0 }
 0x31b   : > { %v2447_v32 = vsel %vm1527_vm0, %v2423_v20, 0.0  ;;  %v3578_v33 = vpop.eup %3577 }
 0x31c   : > { %v4523_v38 = vpop.f32.mrb[0].mxu1  ;;  %2445 = vadd.xlane.f32.xlu0 %v2444_v25  ;;  %2448 = vadd.xlane.f32.xlu1 %v2447_v32  ;;  %v2426_v52 = vmul.f32 %v3578_v33, %v4460_v59 }
 0x31d   : > { %v3580_v40 = vpop.eup %3579  ;;  %v4526_v46 = vmul.f32 %v3572_v14, %v4523_v38  ;;  %v4528_v47 = vpop.f32.mrb[1].mxu1 }
 0x31e   : > { %v2425_v48 = vmul.f32 %v3580_v40, %v4462_v60  ;;  %v4532_v50 = vmul.f32 %v3562_v0, %v4528_v47  ;;  %v2456_v0 = vsel %vm1527_vm0, %v2426_v52, 0.0 }
 0x320   : > { %v4536_v63 = vpop.f32.mrb[2].mxu1  ;;  %2451 = vadd.xlane.f32.xlu0 %v2450_v61  ;;  %v2453_v1 = vsel %vm1527_vm0, %v2425_v48, 0.0 }
 0x321   : > { %v4540_v2 = vmul.f32 %v3570_v13, %v4536_v63  ;;  %2454 = vadd.xlane.f32.xlu1 %v2453_v1  ;;  %v4542_v3 = vpop.f32.mrb[3].mxu1 }
 0x322   : > { %v4545_v5 = vmul.f32 %v3566_v4, %v4542_v3 }
 0x324   : > { %v4548_v6 = vpop.f32.mrb[4].mxu1  ;;  %2457 = vadd.xlane.f32.xlu0 %v2456_v0 }
 0x325   : > { %5098 = vst [vmem:[#allocation30_spill] sm:$0xff] %v4548_v6  ;;  %v4551_v8 = vmul.f32 %v3574_v16, %v4548_v6  ;;  %v4553_v10 = vpop.f32.mrb[5].mxu1 }
 0x326   : > { %v4556_v11 = vmul.f32 %v3576_v19, %v4553_v10 }
 0x328   : > { %v4558_v12 = vpop.f32.mrb[6].mxu1 }
 0x329   : > { %5099 = vst [vmem:[#allocation31_spill] sm:$0xff] %v4558_v12  ;;  %v4561_v13 = vmul.f32 %v3578_v33, %v4558_v12  ;;  %v4563_v4 = vpop.f32.mrb[7].mxu1 }
 0x32a   : > { %v4566_v14 = vmul.f32 %v3580_v40, %v4563_v4 }
 0x32c   : > { %v4568_v15 = vpop.f32.mrb[8].mxu1 }
 0x32d   : > { %v4570_v17 = vpop.f32.mrb[9].mxu1 }
 0x330   : > { %v4572_v16 = vpop.f32.mrb[10].mxu1 }
 0x331   : > { %v4574_v18 = vpop.f32.mrb[11].mxu1 }
 0x334   : > { %v4576_v19 = vpop.f32.mrb[12].mxu1 }
 0x335   : > { %v1554_v20 = vpop.xlane.xlu0 %1553  ;;  %v4578_v23 = vpop.f32.mrb[13].mxu1 }
 0x336   : > { %v1584_v25 = vmax.f32 %v1554_v20, 1e-24  ;;  %v1557_v32 = vpop.xlane.xlu1 %1556 }
 0x337   : > { %v1585_v33 = vmax.f32 %v1557_v32, 1e-24 }
 0x338   : > { %3581 = vrsqrt.f32 %v1584_v25  ;;  %v4580_v48 = vpop.f32.mrb[14].mxu1 }
 0x339   : > { %3583 = vrsqrt.f32 %v1585_v33  ;;  %v1563_v40 = vpop.xlane.xlu0 %1562  ;;  %v4582_v52 = vpop.f32.mrb[15].mxu1 }
 0x33a   : > { %v1587_v61 = vmax.f32 %v1563_v40, 1e-24  ;;  %v1560_v1 = vpop.xlane.xlu1 %1559 }
 0x33b   : > { %v1586_v0 = vmax.f32 %v1560_v1, 1e-24 }
 0x33c   : > { %3585 = vrsqrt.f32 %v1587_v61 }
 0x33d   : > { %3587 = vrsqrt.f32 %v1586_v0  ;;  %v1569_v59 = vpop.xlane.xlu0 %1568 }
 0x33e   : > { %v1589_v57 = vmax.f32 %v1569_v59, 1e-24  ;;  %v1566_v55 = vpop.xlane.xlu1 %1565 }
 0x33f   : > { %v1588_v60 = vmax.f32 %v1566_v55, 1e-24 }
 0x340   : > { %3589 = vrsqrt.f32 %v1589_v57 }
 0x341   : > { %3591 = vrsqrt.f32 %v1588_v60  ;;  %v1575_v20 = vpop.xlane.xlu0 %1574 }
 0x342   : > { %v3582_v32 = vpop.eup %3581  ;;  %v1591_v25 = vmax.f32 %v1575_v20, 1e-24  ;;  %v1572_v53 = vpop.xlane.xlu1 %1571 }
 0x343   : > { %v3584_v58 = vpop.eup %3583  ;;  %v1616_v33 = vmul.f32 %v3582_v32, %v4403_v29  ;;  %v1590_v56 = vmax.f32 %v1572_v53, 1e-24 }
 0x344   : > { %v1617_v40 = vmul.f32 %v3584_v58, %v4399_v24  ;;  %3593 = vrsqrt.f32 %v1591_v25 }
 0x345   : > { %v1792_v1 = vsub.f32 0.0, %v1616_v33  ;;  %3595 = vrsqrt.f32 %v1590_v56 }
 0x346   : > { %v3586_v61 = vpop.eup %3585  ;;  %v1793_v0 = vsub.f32 0.0, %v1617_v40 }
 0x347   : > { %v3588_v59 = vpop.eup %3587  ;;  %v1816_v54 = vmul.f32 1.442695, %v1792_v1  ;;  %v1619_v55 = vmul.f32 %v3586_v61, %v4406_v30 }
 0x348   : > { %v1818_v57 = vmul.f32 1.442695, %v1793_v0  ;;  %v1618_v60 = vmul.f32 %v3588_v59, %v4413_v35 }
 0x349   : > { %3597 = vpow2.f32 %v1816_v54  ;;  %v1795_v20 = vsub.f32 0.0, %v1619_v55 }
 0x34a   : > { %v3590_v12 = vpop.eup %3589  ;;  %3599 = vpow2.f32 %v1818_v57  ;;  %v1794_v32 = vsub.f32 0.0, %v1618_v60 }
 0x34b   : > { %v3592_v53 = vpop.eup %3591  ;;  %v1822_v6 = vmul.f32 1.442695, %v1795_v20  ;;  %v1621_v58 = vmul.f32 %v3590_v12, %v4416_v36 }
 0x34c   : > { %v1820_v25 = vmul.f32 1.442695, %v1794_v32  ;;  %v1620_v56 = vmul.f32 %v3592_v53, %v4425_v44 }
 0x34d   : > { %3601 = vpow2.f32 %v1822_v6  ;;  %v1797_v33 = vsub.f32 0.0, %v1621_v58 }
 0x34e   : > { %v3594_v40 = vpop.eup %3593  ;;  %3603 = vpow2.f32 %v1820_v25  ;;  %v1796_v1 = vsub.f32 0.0, %v1620_v56 }
 0x34f   : > { %v3596_v61 = vpop.eup %3595  ;;  %v1826_v0 = vmul.f32 1.442695, %v1797_v33  ;;  %v1623_v54 = vmul.f32 %v3594_v40, %v4428_v45 }
 0x350   : > { %v1824_v59 = vmul.f32 1.442695, %v1796_v1  ;;  %v1622_v55 = vmul.f32 %v3596_v61, %v4437_v49  ;;  %v1690_v61 = vpop.xlane.xlu0 %1689 }
 0x351   : > { %3605 = vpow2.f32 %v1826_v0  ;;  %v1799_v57 = vsub.f32 0.0, %v1623_v54 }
 0x352   : > { %3607 = vpow2.f32 %v1824_v59  ;;  %v1798_v60 = vsub.f32 0.0, %v1622_v55  ;;  %v1696_v55 = vpop.xlane.xlu1 %1695 }
 0x353   : > { %v3598_v12 = vpop.eup %3597  ;;  %v1830_v20 = vmul.f32 1.442695, %v1799_v57 }
 0x354   : > { %v3600_v32 = vpop.eup %3599  ;;  %v1828_v53 = vmul.f32 1.442695, %v1798_v60  ;;  %v1840_v6 = vadd.f32 1.0, %v3598_v12 }
 0x355   : > { %3609 = vpow2.f32 %v1830_v20  ;;  %v1841_v58 = vadd.f32 1.0, %v3600_v32  ;;  %v1693_v32 = vpop.xlane.xlu0 %1692 }
 0x356   : > { %3611 = vpow2.f32 %v1828_v53 }
 0x357   : > { %v3602_v25 = vpop.eup %3601  ;;  %3613 = vrcp.f32 %v1841_v58  ;;  %v1736_v58 = vmax.f32 %v1690_v61, 1e-24 }
 0x358   : > { %v3604_v56 = vpop.eup %3603  ;;  %3615 = vrcp.f32 %v1840_v6  ;;  %v1843_v33 = vadd.f32 1.0, %v3602_v25 }
 0x359   : > { %v1842_v40 = vadd.f32 1.0, %v3604_v56 }
 0x35a   : > { %3617 = vrcp.f32 %v1843_v33 }
 0x35b   : > { %v3606_v1 = vpop.eup %3605  ;;  %3619 = vrcp.f32 %v1842_v40  ;;  %v1702_v40 = vpop.xlane.xlu1 %1701 }
 0x35c   : > { %v3608_v0 = vpop.eup %3607  ;;  %v1845_v54 = vadd.f32 1.0, %v3606_v1 }
 0x35d   : > { %v1844_v59 = vadd.f32 1.0, %v3608_v0 }
 0x35e   : > { %3621 = vrcp.f32 %v1845_v54  ;;  %v1738_v54 = vmax.f32 %v1696_v55, 1e-24 }
 0x35f   : > { %v3610_v57 = vpop.eup %3609  ;;  %3623 = vrcp.f32 %v1844_v59 }
 0x360   : > { %v3612_v60 = vpop.eup %3611  ;;  %v1847_v12 = vadd.f32 1.0, %v3610_v57  ;;  %v1737_v57 = vmax.f32 %v1693_v32, 1e-24 }
 0x361   : > { %v4592_v20 = vpop.eup %3613  ;;  %v1846_v53 = vadd.f32 1.0, %v3612_v60 }
 0x362   : > { %v4594_v6 = vpop.eup %3615  ;;  %v2428_v25 = vmul.f32 %v4592_v20, %v4478_v21  ;;  %3625 = vrcp.f32 %v1847_v12  ;;  %v1740_v12 = vmax.f32 %v1702_v40, 1e-24 }
 0x363   : > { %v2427_v56 = vmul.f32 %v4594_v6, %v4480_v22  ;;  %3627 = vrcp.f32 %v1846_v53  ;;  %v1699_v53 = vpop.xlane.xlu0 %1698 }
 0x364   : > { %v4600_v33 = vpop.eup %3617  ;;  %v2462_v1 = vsel %vm1527_vm0, %v2428_v25, 0.0  ;;  %3629 = vrsqrt.f32 %v1736_v58  ;;  %v1739_v32 = vmax.f32 %v1699_v53, 1e-24 }
 0x365   : > { %v4603_v0 = vpop.eup %3619  ;;  %v2430_v59 = vmul.f32 %v4600_v33, %v4482_v26  ;;  %v2459_v61 = vsel %vm1527_vm0, %v2427_v56, 0.0  ;;  %2463 = vadd.xlane.f32.xlu0 %v2462_v1  ;;  %3631 = vrsqrt.f32 %v1738_v54 }
 0x366   : > { %v2429_v60 = vmul.f32 %v4603_v0, %v4484_v31  ;;  %2460 = vadd.xlane.f32.xlu1 %v2459_v61  ;;  %3633 = vrsqrt.f32 %v1737_v57 }
 0x367   : > { %v2468_v21 = vsel %vm1527_vm0, %v2430_v59, 0.0  ;;  %3635 = vrsqrt.f32 %v1740_v12  ;;  %v1705_v54 = vpop.xlane.xlu0 %1704 }
 0x368   : > { %v4611_v25 = vpop.eup %3621  ;;  %v2465_v55 = vsel %vm1527_vm0, %v2429_v60, 0.0  ;;  %3637 = vrsqrt.f32 %v1739_v32  ;;  %v1741_v53 = vmax.f32 %v1705_v54, 1e-24  ;;  %v2536_v32 = vsel %vm1527_vm0, %v4526_v46, 0.0 }
 0x369   : > { %v4614_v22 = vpop.eup %3623  ;;  %v2432_v56 = vmul.f32 %v4611_v25, %v4486_v39  ;;  %2469 = vadd.xlane.f32.xlu0 %v2468_v21  ;;  %v2539_v46 = vsel %vm1527_vm0, %v4545_v5, 0.0 }
 0x36a   : > { %v2431_v58 = vmul.f32 %v4614_v22, %v4488_v41  ;;  %2466 = vadd.xlane.f32.xlu1 %v2465_v55  ;;  %3639 = vrsqrt.f32 %v1741_v53 }
 0x36b   : > { %v2474_v40 = vsel %vm1527_vm0, %v2432_v56, 0.0 }
 0x36c   : > { %v4621_v1 = vpop.eup %3625  ;;  %v2471_v59 = vsel %vm1527_vm0, %v2431_v58, 0.0 }
 0x36d   : > { %v4624_v61 = vpop.eup %3627  ;;  %v2434_v60 = vmul.f32 %v4621_v1, %v4490_v51  ;;  %2475 = vadd.xlane.f32.xlu0 %v2474_v40 }
 0x36e   : > { %v2433_v21 = vmul.f32 %v4624_v61, %v4493_v62  ;;  %2472 = vadd.xlane.f32.xlu1 %v2471_v59  ;;  %v3630_v12 = vpop.eup %3629  ;;  %v2533_v59 = vsel %vm1527_vm0, %v4532_v50, 0.0 }
 0x36f   : > { %v2480_v57 = vsel %vm1527_vm0, %v2434_v60, 0.0  ;;  %v3632_v56 = vpop.eup %3631  ;;  %v1768_v58 = vmul.f32 %v3630_v12, %v4322_v28  ;;  %v2542_v28 = vsel %vm1527_vm0, %v4540_v2, 0.0 }
 0x370   : > { %v2477_v55 = vsel %vm1527_vm0, %v2433_v21, 0.0  ;;  %v3634_v39 = vpop.eup %3633  ;;  %v1770_v60 = vmul.f32 %v3632_v56, %v4320_v27 }
 0x371   : > { %2481 = vadd.xlane.f32.xlu0 %v2480_v57  ;;  %v3636_v40 = vpop.eup %3635  ;;  %v1880_v54 = vsub.f32 0.0, %v1768_v58  ;;  %v1769_v21 = vmul.f32 %v3634_v39, %v4326_v34  ;;  %v2548_v34 = vsel %vm1527_vm0, %v4551_v8, 0.0  ;;  %v2525_v8 = vmul.f32 %v4594_v6, %v4570_v17 }
 0x372   : > { %2478 = vadd.xlane.f32.xlu1 %v2477_v55  ;;  %v3638_v57 = vpop.eup %3637  ;;  %v1772_v55 = vmul.f32 %v3636_v40, %v4335_v42  ;;  %v1882_v12 = vsub.f32 0.0, %v1770_v60  ;;  %v2545_v42 = vsel %vm1527_vm0, %v4556_v11, 0.0  ;;  %v2526_v40 = vmul.f32 %v4592_v20, %v4568_v15 }
 0x373   : > { %v1896_v50 = vmul.f32 1.442695, %v1880_v54  ;;  %v1881_v53 = vsub.f32 0.0, %v1769_v21  ;;  %v1771_v27 = vmul.f32 %v3638_v57, %v4331_v37  ;;  %v2554_v37 = vsel %vm1527_vm0, %v4561_v13, 0.0 }
 0x374   : > { %v1884_v56 = vsub.f32 0.0, %v1772_v55  ;;  %v3640_v39 = vpop.eup %3639  ;;  %v1900_v2 = vmul.f32 1.442695, %v1882_v12  ;;  %v2551_v11 = vsel %vm1527_vm0, %v4566_v14, 0.0  ;;  %v2528_v20 = vmul.f32 %v4600_v33, %v4572_v16 }
 0x375   : > { %2537 = vadd.xlane.f32.xlu0 %v2536_v32  ;;  %3641 = vpow2.f32 %v1896_v50  ;;  %v1898_v5 = vmul.f32 1.442695, %v1881_v53  ;;  %v1883_v58 = vsub.f32 0.0, %v1771_v27  ;;  %v2527_v6 = vmul.f32 %v4603_v0, %v4574_v18 }
 0x376   : > { %2534 = vadd.xlane.f32.xlu1 %v2533_v59  ;;  %v1904_v32 = vmul.f32 1.442695, %v1884_v56  ;;  %v1773_v59 = vmul.f32 %v3640_v39, %v4339_v43  ;;  %3643 = vpow2.f32 %v1900_v2  ;;  %v2560_v43 = vsel %vm1527_vm0, %v2526_v40, 0.0 }
 0x377   : > { %3645 = vpow2.f32 %v1898_v5  ;;  %v1902_v60 = vmul.f32 1.442695, %v1883_v58  ;;  %v2557_v14 = vsel %vm1527_vm0, %v2525_v8, 0.0  ;;  %v2530_v33 = vmul.f32 %v4611_v25, %v4576_v19 }
 0x378   : > { %3647 = vpow2.f32 %v1904_v32  ;;  %v1885_v57 = vsub.f32 0.0, %v1773_v59  ;;  %v2566_v50 = vsel %vm1527_vm0, %v2528_v20, 0.0  ;;  %v2529_v0 = vmul.f32 %v4614_v22, %v4578_v23 }
 0x379   : > { %2543 = vadd.xlane.f32.xlu0 %v2542_v28  ;;  %v2532_v25 = vmul.f32 %v4621_v1, %v4580_v48  ;;  %v2572_v32 = vsel %vm1527_vm0, %v2530_v33, 0.0  ;;  %v2531_v22 = vmul.f32 %v4624_v61, %v4582_v52 }
 0x37a   : > { %2540 = vadd.xlane.f32.xlu1 %v2539_v46  ;;  %v1906_v27 = vmul.f32 1.442695, %v1885_v57  ;;  %v2569_v59 = vsel %vm1527_vm0, %v2529_v0, 0.0 }
 0x37d   : > { %2549 = vadd.xlane.f32.xlu0 %v2548_v34  ;;  %v2563_v34 = vsel %vm1527_vm0, %v2527_v6, 0.0  ;;  %v2575_v6 = vsel %vm1527_vm0, %v2531_v22, 0.0 }
 0x37e   : > { %2546 = vadd.xlane.f32.xlu1 %v2545_v42 }
 0x37f   : > { %v3642_v53 = vpop.eup %3641 }
 0x380   : > { %v3644_v39 = vpop.eup %3643  ;;  %v1928_v2 = vadd.f32 1.0, %v3642_v53 }
 0x381   : > { %2555 = vadd.xlane.f32.xlu0 %v2554_v37  ;;  %v3646_v40 = vpop.eup %3645  ;;  %v1930_v1 = vadd.f32 1.0, %v3644_v39 }
 0x382   : > { %2552 = vadd.xlane.f32.xlu1 %v2551_v11  ;;  %v3648_v8 = vpop.eup %3647 }
 0x383   : > { %v1708_v54 = vpop.xlane.xlu1 %1707 }
 0x384   : > { %v1742_v21 = vmax.f32 %v1708_v54, 1e-24  ;;  %v1711_v13 = vpop.xlane.xlu0 %1710 }
 0x385   : > { %v1743_v55 = vmax.f32 %v1711_v13, 1e-24  ;;  %2561 = vadd.xlane.f32.xlu0 %v2560_v43  ;;  %v1929_v43 = vadd.f32 1.0, %v3646_v40 }
 0x386   : > { %3649 = vrsqrt.f32 %v1742_v21  ;;  %2558 = vadd.xlane.f32.xlu1 %v2557_v14  ;;  %v2578_v21 = vsel %vm1527_vm0, %v2532_v25, 0.0 }
 0x387   : > { %3651 = vrsqrt.f32 %v1743_v55  ;;  %v1714_v28 = vpop.xlane.xlu1 %1713 }
 0x388   : > { %3653 = vpow2.f32 %v1902_v60  ;;  %v1744_v46 = vmax.f32 %v1714_v28, 1e-24  ;;  %v1717_v12 = vpop.xlane.xlu0 %1716 }
 0x389   : > { %v1745_v56 = vmax.f32 %v1717_v12, 1e-24  ;;  %2567 = vadd.xlane.f32.xlu0 %v2566_v50 }
 0x38a   : > { %3655 = vrsqrt.f32 %v1744_v46  ;;  %2564 = vadd.xlane.f32.xlu1 %v2563_v34  ;;  %v1932_v34 = vadd.f32 1.0, %v3648_v8  ;;  %v4687_v8 = vstv %s4680_s20 }
 0x38b   : > { %3657 = vrsqrt.f32 %v1745_v56  ;;  %v1720_v42 = vpop.xlane.xlu1 %1719 }
 0x38c   : > { %v1746_v5 = vmax.f32 %v1720_v42, 1e-24  ;;  %v1723_v58 = vpop.xlane.xlu0 %1722  ;;  %3659 = vpow2.f32 %v1906_v27 }
 0x38d   : > { %v1747_v37 = vmax.f32 %v1723_v58, 1e-24  ;;  %2573 = vadd.xlane.f32.xlu0 %v2572_v32 }
 0x38e   : > { %3661 = vrsqrt.f32 %v1746_v5  ;;  %2570 = vadd.xlane.f32.xlu1 %v2569_v59 }
 0x38f   : > { %3663 = vrsqrt.f32 %v1747_v37  ;;  %v1726_v11 = vpop.xlane.xlu1 %1725 }
 0x390   : > { %v3650_v60 = vpop.eup %3649  ;;  %3665 = vrcp.f32 %v1928_v2  ;;  %v1748_v54 = vmax.f32 %v1726_v11, 1e-24  ;;  %v1729_v20 = vpop.xlane.xlu0 %1728 }
 0x391   : > { %v3652_v13 = vpop.eup %3651  ;;  %v1774_v61 = vmul.f32 %v3650_v60, %v4381_v9  ;;  %v1749_v57 = vmax.f32 %v1729_v20, 1e-24  ;;  %2579 = vadd.xlane.f32.xlu0 %v2578_v21 }
 0x392   : > { %v3654_v55 = vpop.eup %3653  ;;  %v1775_v14 = vmul.f32 %v3652_v13, %v4378_v7  ;;  %3667 = vrsqrt.f32 %v1748_v54  ;;  %2576 = vadd.xlane.f32.xlu1 %v2575_v6 }
 0x393   : > { %v1886_v28 = vsub.f32 0.0, %v1774_v61  ;;  %3669 = vrsqrt.f32 %v1749_v57  ;;  %v1732_v33 = vpop.xlane.xlu1 %1731  ;;  %v1931_v32 = vadd.f32 1.0, %v3654_v55 }
 0x394   : > { %v3656_v46 = vpop.eup %3655  ;;  %3671 = vrcp.f32 %v1930_v1  ;;  %v1887_v12 = vsub.f32 0.0, %v1775_v14  ;;  %v1750_v50 = vmax.f32 %v1732_v33, 1e-24  ;;  %v1735_v53 = vpop.xlane.xlu0 %1734 }
 0x395   : > { %v3658_v9 = vpop.eup %3657  ;;  %3673 = vrcp.f32 %v1929_v43  ;;  %v1908_v27 = vmul.f32 1.442695, %v1886_v28  ;;  %v1776_v0 = vmul.f32 %v3656_v46, %v4403_v29  ;;  %v1751_v56 = vmax.f32 %v1735_v53, 1e-24 }
 0x396   : > { %v1910_v7 = vmul.f32 1.442695, %v1887_v12  ;;  %v1777_v42 = vmul.f32 %v3658_v9, %v4399_v24  ;;  %3675 = vrsqrt.f32 %v1750_v50  ;;  %v3660_v39 = vpop.eup %3659 }
 0x397   : > { %3677 = vpow2.f32 %v1908_v27  ;;  %v1888_v2 = vsub.f32 0.0, %v1776_v0  ;;  %v1933_v13 = vadd.f32 1.0, %v3660_v39 }
 0x398   : > { %v3662_v25 = vpop.eup %3661  ;;  %3679 = vpow2.f32 %v1910_v7  ;;  %v1889_v5 = vsub.f32 0.0, %v1777_v42 }
 0x399   : > { %v3664_v58 = vpop.eup %3663  ;;  %v1912_v40 = vmul.f32 1.442695, %v1888_v2  ;;  %v1778_v22 = vmul.f32 %v3662_v25, %v4413_v35  ;;  %3681 = vrsqrt.f32 %v1751_v56 }
 0x39a   : > { %v3666_v29 = vpop.eup %3665  ;;  %3683 = vrcp.f32 %v1932_v34  ;;  %v1914_v37 = vmul.f32 1.442695, %v1889_v5  ;;  %v1779_v59 = vmul.f32 %v3664_v58, %v4406_v30 }
 0x39b   : > { %3685 = vpow2.f32 %v1912_v40  ;;  %v1890_v24 = vsub.f32 0.0, %v1778_v22 }
 0x39c   : > { %v3668_v11 = vpop.eup %3667  ;;  %3687 = vpow2.f32 %v1914_v37  ;;  %v1891_v60 = vsub.f32 0.0, %v1779_v59 }
 0x39d   : > { %v3670_v1 = vpop.eup %3669  ;;  %3689 = vrcp.f32 %v1931_v32  ;;  %v1916_v54 = vmul.f32 1.442695, %v1890_v24  ;;  %v1780_v20 = vmul.f32 %v3668_v11, %v4425_v44  ;;  %v2437_v35 = vpop.xlane.xlu1 %2436 }
 0x39e   : > { %v3672_v21 = vpop.eup %3671  ;;  %v1918_v43 = vmul.f32 1.442695, %v1891_v60  ;;  %v1781_v30 = vmul.f32 %v3670_v1, %v4416_v36  ;;  %v2484_v61 = vadd.f32 %v4687_v8, %v2437_v35 }
 0x39f   : > { %v3674_v57 = vpop.eup %3673  ;;  %3691 = vpow2.f32 %v1916_v54  ;;  %v1892_v6 = vsub.f32 0.0, %v1780_v20 }
 0x3a0   : > { %v3676_v55 = vpop.eup %3675  ;;  %3693 = vpow2.f32 %v1918_v43  ;;  %v1893_v14 = vsub.f32 0.0, %v1781_v30  ;;  %2501 = vst.msk [vmem:[%s4071_s21] sm:$0xff] %vm2500_vm1, %v2484_v61 }
 0x3a1   : > { %v3678_v28 = vpop.eup %3677  ;;  %v1920_v33 = vmul.f32 1.442695, %v1892_v6  ;;  %v1782_v44 = vmul.f32 %v3676_v55, %v4437_v49  ;;  %v2443_v46 = vpop.xlane.xlu1 %2442  ;;  %3695 = vrcp.f32 %v1933_v13 }
 0x3a2   : > { %v3680_v12 = vpop.eup %3679  ;;  %v1934_v50 = vadd.f32 1.0, %v3678_v28  ;;  %v1922_v36 = vmul.f32 1.442695, %v1893_v14  ;;  %v2486_v53 = vadd.f32 %v4687_v8, %v2443_v46 }
 0x3a3   : > { %v3682_v9 = vpop.eup %3681  ;;  %v1935_v27 = vadd.f32 1.0, %v3680_v12  ;;  %3697 = vpow2.f32 %v1920_v33  ;;  %v1894_v0 = vsub.f32 0.0, %v1782_v44  ;;  %2630 = vrot.lane.b32.xlu1 %v3666_v29, %s3840_s13 }
 0x3a4   : > { %v3684_v56 = vpop.eup %3683  ;;  %3699 = vrcp.f32 %v1934_v50  ;;  %v1783_v34 = vmul.f32 %v3682_v9, %v4428_v45  ;;  %2503 = vst.msk [vmem:[%s4071_s21 + $0x10] sm:$0xff] %vm2500_vm1, %v2486_v53 }
 0x3a5   : > { %v3686_v49 = vpop.eup %3685  ;;  %3701 = vrcp.f32 %v1935_v27  ;;  %v1924_v7 = vmul.f32 1.442695, %v1894_v0  ;;  %v2440_v42 = vpop.xlane.xlu0 %2439 }
 0x3a6   : > { %v3688_v39 = vpop.eup %3687  ;;  %v1936_v2 = vadd.f32 1.0, %v3686_v49  ;;  %3703 = vpow2.f32 %v1922_v36  ;;  %v1895_v25 = vsub.f32 0.0, %v1783_v34  ;;  %v2485_v5 = vadd.f32 %v4687_v8, %v2440_v42 }
 0x3a7   : > { %v3690_v58 = vpop.eup %3689  ;;  %v1937_v32 = vadd.f32 1.0, %v3688_v39  ;;  %3705 = vpow2.f32 %v1924_v7  ;;  %2634 = vrot.lane.b32.xlu1 %v3672_v21, %s3840_s13  ;;  %2632 = vrot.lane.b32.xlu0 %v3674_v57, %s3840_s13 }
 0x3a8   : > { %3707 = vrcp.f32 %v1936_v2  ;;  %v1926_v45 = vmul.f32 1.442695, %v1895_v25  ;;  %2502 = vst.msk [vmem:[%s4071_s21 + $0x8] sm:$0xff] %vm2500_vm1, %v2485_v5 }
 0x3a9   : > { %v3692_v40 = vpop.eup %3691  ;;  %v2449_v22 = vpop.xlane.xlu1 %2448 }
 0x3aa   : > { %v2446_v29 = vpop.xlane.xlu0 %2445  ;;  %v3694_v37 = vpop.eup %3693  ;;  %v1938_v59 = vadd.f32 1.0, %v3692_v40  ;;  %3709 = vpow2.f32 %v1926_v45  ;;  %v2488_v24 = vadd.f32 %v4687_v8, %v2449_v22 }
 0x3ab   : > { %v2487_v11 = vadd.f32 %v4687_v8, %v2446_v29  ;;  %3711 = vrcp.f32 %v1937_v32  ;;  %v1939_v60 = vadd.f32 1.0, %v3694_v37  ;;  %2636 = vrot.lane.b32.xlu1 %v3690_v58, %s3840_s13  ;;  %2638 = vrot.lane.b32.xlu0 %v3684_v56, %s3840_s13  ;;  %v3696_v1 = vpop.eup %3695 }
 0x3ac   : > { %3713 = vrcp.f32 %v1938_v59  ;;  %2505 = vst.msk [vmem:[%s4071_s21 + $0x20] sm:$0xff] %vm2500_vm1, %v2488_v24 }
 0x3ad   : > { %2504 = vst.msk [vmem:[%s4071_s21 + $0x18] sm:$0xff] %vm2500_vm1, %v2487_v11  ;;  %v3698_v54 = vpop.eup %3697  ;;  %3715 = vrcp.f32 %v1939_v60 }
 0x3ae   : > { %v2452_v20 = vpop.xlane.xlu0 %2451  ;;  %v3700_v35 = vpop.eup %3699  ;;  %v1940_v21 = vadd.f32 1.0, %v3698_v54 }
 0x3af   : > { %v2455_v13 = vpop.xlane.xlu1 %2454  ;;  %v2489_v43 = vadd.f32 %v4687_v8, %v2452_v20  ;;  %v3702_v30 = vpop.eup %3701  ;;  %2640 = vrot.lane.b32.xlu1 %v3696_v1, %s3840_s13  ;;  %2642 = vrot.lane.b32.xlu0 %v3700_v35, %s3840_s13 }
 0x3b0   : > { %v2490_v61 = vadd.f32 %v4687_v8, %v2455_v13  ;;  %v3704_v57 = vpop.eup %3703  ;;  %3717 = vrcp.f32 %v1940_v21 }
 0x3b1   : > { %2506 = vst.msk [vmem:[%s4071_s21 + $0x28] sm:$0xff] %vm2500_vm1, %v2489_v43  ;;  %v3706_v6 = vpop.eup %3705  ;;  %v1941_v55 = vadd.f32 1.0, %v3704_v57 }
 0x3b2   : > { %2507 = vst.msk [vmem:[%s4071_s21 + $0x30] sm:$0xff] %vm2500_vm1, %v2490_v61  ;;  %v2458_v14 = vpop.xlane.xlu0 %2457  ;;  %v3708_v28 = vpop.eup %3707  ;;  %v1942_v33 = vadd.f32 1.0, %v3706_v6 }
 0x3b3   : > { %v2491_v44 = vadd.f32 %v4687_v8, %v2458_v14  ;;  %3719 = vrcp.f32 %v1941_v55  ;;  %2644 = vrot.lane.b32.xlu1 %v3702_v30, %s3840_s13  ;;  %2646 = vrot.lane.b32.xlu0 %v3708_v28, %s3840_s13 }
 0x3b4   : > { %v3710_v46 = vpop.eup %3709  ;;  %3721 = vrcp.f32 %v1942_v33 }
 0x3b5   : > { %2508 = vst.msk [vmem:[%s4071_s21 + $0x38] sm:$0xff] %vm2500_vm1, %v2491_v44  ;;  %v3712_v12 = vpop.eup %3711  ;;  %v1943_v50 = vadd.f32 1.0, %v3710_v46 }
 0x3b6   : > { %v3714_v36 = vpop.eup %3713 }
 0x3b7   : > { %2648 = vrot.lane.b32.xlu1 %v3712_v12, %s3840_s13  ;;  %2650 = vrot.lane.b32.xlu0 %v3714_v36, %s3840_s13  ;;  %3723 = vrcp.f32 %v1943_v50  ;;  %v3716_v53 = vpop.eup %3715 }
 0x3ba   : > { %v3718_v9 = vpop.eup %3717 }
 0x3bb   : > { %2652 = vrot.lane.b32.xlu1 %v3716_v53, %s3840_s13  ;;  %2654 = vrot.lane.b32.xlu0 %v3718_v9, %s3840_s13 }
 0x3bd   : > { %v3720_v27 = vpop.eup %3719 }
 0x3be   : > { %v3722_v0 = vpop.eup %3721 }
 0x3bf   : > { %2656 = vrot.lane.b32.xlu1 %v3720_v27, %s3840_s13  ;;  %2658 = vrot.lane.b32.xlu0 %v3722_v0, %s3840_s13 }
 0x3c1   : > { %v3724_v56 = vpop.eup %3723 }
 0x3c3   : > { %2660 = vrot.lane.b32.xlu1 %v3724_v56, %s3840_s13 }
 0x3f2   : > { %v2464_v34 = vpop.xlane.xlu0 %2463 }
 0x3f3   : > { %v2461_v49 = vpop.xlane.xlu1 %2460  ;;  %v2493_v7 = vadd.f32 %v4687_v8, %v2464_v34 }
 0x3f4   : > { %v2492_v42 = vadd.f32 %v4687_v8, %v2461_v49 }
 0x3f5   : > { %2510 = vst.msk [vmem:[%s4071_s21 + $0x48] sm:$0xff] %vm2500_vm1, %v2493_v7 }
 0x3f6   : > { %2509 = vst.msk [vmem:[%s4071_s21 + $0x40] sm:$0xff] %vm2500_vm1, %v2492_v42  ;;  %v2470_v39 = vpop.xlane.xlu0 %2469 }
 0x3f7   : > { %v2467_v2 = vpop.xlane.xlu1 %2466  ;;  %v2495_v25 = vadd.f32 %v4687_v8, %v2470_v39 }
 0x3f8   : > { %v2494_v5 = vadd.f32 %v4687_v8, %v2467_v2 }
 0x3f9   : > { %2512 = vst.msk [vmem:[%s4071_s21 + $0x58] sm:$0xff] %vm2500_vm1, %v2495_v25 }
 0x3fa   : > { %2511 = vst.msk [vmem:[%s4071_s21 + $0x50] sm:$0xff] %vm2500_vm1, %v2494_v5  ;;  %v2476_v58 = vpop.xlane.xlu0 %2475 }
 0x3fb   : > { %v2473_v32 = vpop.xlane.xlu1 %2472  ;;  %v2497_v45 = vadd.f32 %v4687_v8, %v2476_v58 }
 0x3fc   : > { %v2496_v40 = vadd.f32 %v4687_v8, %v2473_v32 }
 0x3fd   : > { %2514 = vst.msk [vmem:[%s4071_s21 + $0x68] sm:$0xff] %vm2500_vm1, %v2497_v45 }
 0x3fe   : > { %2513 = vst.msk [vmem:[%s4071_s21 + $0x60] sm:$0xff] %vm2500_vm1, %v2496_v40  ;;  %v2482_v22 = vpop.xlane.xlu0 %2481 }
 0x3ff   : > { %v2479_v29 = vpop.xlane.xlu1 %2478  ;;  %v2499_v37 = vadd.f32 %v4687_v8, %v2482_v22 }
 0x400   : > { %v2498_v59 = vadd.f32 %v4687_v8, %v2479_v29 }
 0x401   : > { %2516 = vst.msk [vmem:[%s4071_s21 + $0x78] sm:$0xff] %vm2500_vm1, %v2499_v37 }
 0x402   : > { %2515 = vst.msk [vmem:[%s4071_s21 + $0x70] sm:$0xff] %vm2500_vm1, %v2498_v59  ;;  %v2538_v24 = vpop.xlane.xlu0 %2537 }
 0x403   : > { %v2535_v11 = vpop.xlane.xlu1 %2534  ;;  %v2582_v60 = vadd.f32 %v2538_v24, %v4687_v8 }
 0x404   : > { %v2581_v1 = vadd.f32 %v2535_v11, %v4687_v8 }
 0x405   : > { %2599 = vst.msk [vmem:[%s4071_s21 + $0x8] sm:$0xff] %vm2597_vm2, %v2582_v60 }
 0x406   : > { %2598 = vst.msk [vmem:[%s4071_s21] sm:$0xff] %vm2597_vm2, %v2581_v1  ;;  %v2544_v54 = vpop.xlane.xlu0 %2543 }
 0x407   : > { %v2541_v20 = vpop.xlane.xlu1 %2540  ;;  %v2584_v35 = vadd.f32 %v2544_v54, %v4687_v8 }
 0x408   : > { %v2583_v21 = vadd.f32 %v2541_v20, %v4687_v8  ;;  %v5100_v20 = vld [vmem:[#allocation30_spill] sm:$0xff] }
 0x409   : > { %2601 = vst.msk [vmem:[%s4071_s21 + $0x18] sm:$0xff] %vm2597_vm2, %v2584_v35 }
 0x40a   : > { %2600 = vst.msk [vmem:[%s4071_s21 + $0x10] sm:$0xff] %vm2597_vm2, %v2583_v21  ;;  %v2550_v13 = vpop.xlane.xlu0 %2549 }
 0x40b   : > { %v2547_v43 = vpop.xlane.xlu1 %2546  ;;  %v2586_v30 = vadd.f32 %v2550_v13, %v4687_v8 }
 0x40c   : > { %v2585_v61 = vadd.f32 %v2547_v43, %v4687_v8 }
 0x40d   : > { %2603 = vst.msk [vmem:[%s4071_s21 + $0x28] sm:$0xff] %vm2597_vm2, %v2586_v30  ;;  %v5101_v30 = vld [vmem:[#allocation31_spill] sm:$0xff] }
 0x40e   : > { %2602 = vst.msk [vmem:[%s4071_s21 + $0x20] sm:$0xff] %vm2597_vm2, %v2585_v61  ;;  %v2556_v57 = vpop.xlane.xlu0 %2555 }
 0x40f   : > { %v2553_v6 = vpop.xlane.xlu1 %2552  ;;  %v2588_v55 = vadd.f32 %v2556_v57, %v4687_v8 }
 0x410   : > { %v2587_v14 = vadd.f32 %v2553_v6, %v4687_v8 }
 0x411   : > { %2605 = vst.msk [vmem:[%s4071_s21 + $0x38] sm:$0xff] %vm2597_vm2, %v2588_v55 }
 0x412   : > { %2604 = vst.msk [vmem:[%s4071_s21 + $0x30] sm:$0xff] %vm2597_vm2, %v2587_v14  ;;  %v2562_v28 = vpop.xlane.xlu0 %2561 }
 0x413   : > { %v2559_v33 = vpop.xlane.xlu1 %2558  ;;  %v2590_v44 = vadd.f32 %v2562_v28, %v4687_v8 }
 0x414   : > { %v2589_v46 = vadd.f32 %v2559_v33, %v4687_v8 }
 0x415   : > { %2607 = vst.msk [vmem:[%s4071_s21 + $0x48] sm:$0xff] %vm2597_vm2, %v2590_v44 }
 0x416   : > { %2606 = vst.msk [vmem:[%s4071_s21 + $0x40] sm:$0xff] %vm2597_vm2, %v2589_v46  ;;  %v2568_v12 = vpop.xlane.xlu0 %2567 }
 0x417   : > { %v2565_v50 = vpop.xlane.xlu1 %2564  ;;  %v2592_v36 = vadd.f32 %v2568_v12, %v4687_v8 }
 0x418   : > { %v2591_v53 = vadd.f32 %v2565_v50, %v4687_v8 }
 0x419   : > { %2609 = vst.msk [vmem:[%s4071_s21 + $0x58] sm:$0xff] %vm2597_vm2, %v2592_v36  ;;  %v5102_v36 = vld [vmem:[#allocation20_spill] sm:$0xff] }
 0x41a   : > { %2608 = vst.msk [vmem:[%s4071_s21 + $0x50] sm:$0xff] %vm2597_vm2, %v2591_v53  ;;  %v2574_v9 = vpop.xlane.xlu0 %2573 }
 0x41b   : > { %v2571_v27 = vpop.xlane.xlu1 %2570  ;;  %v2594_v0 = vadd.f32 %v2574_v9, %v4687_v8 }
 0x41c   : > { %v2593_v56 = vadd.f32 %v2571_v27, %v4687_v8 }
 0x41d   : > { %2611 = vst.msk [vmem:[%s4071_s21 + $0x68] sm:$0xff] %vm2597_vm2, %v2594_v0  ;;  %v5103_v0 = vld [vmem:[#allocation22_spill] sm:$0xff] }
 0x41e   : > { %2610 = vst.msk [vmem:[%s4071_s21 + $0x60] sm:$0xff] %vm2597_vm2, %v2593_v56  ;;  %v2580_v34 = vpop.xlane.xlu0 %2579 }
 0x41f   : > { %v2577_v49 = vpop.xlane.xlu1 %2576  ;;  %v2596_v7 = vadd.f32 %v2580_v34, %v4687_v8 }
 0x420   : > { %v2595_v42 = vadd.f32 %v2577_v49, %v4687_v8 }
 0x421   : > { %2613 = vst.msk [vmem:[%s4071_s21 + $0x78] sm:$0xff] %vm2597_vm2, %v2596_v7  ;;  %v5104_v7 = vld [vmem:[#allocation24_spill] sm:$0xff] }
 0x422   : > { %2612 = vst.msk [vmem:[%s4071_s21 + $0x70] sm:$0xff] %vm2597_vm2, %v2595_v42  ;;  %v4805_v39 = vpop.permute.xlu0 %2632 }
 0x423   : > { %v2631_v2 = vpop.permute.xlu1 %2630  ;;  %v2679_v25 = vmul.f32 %v4523_v38, %v4805_v39 }
 0x424   : > { %v2678_v5 = vmul.f32 %v2631_v2, %v4528_v47  ;;  %v2775_v53 = vmul.f32 %v2631_v2, %v5102_v36 }
 0x425   : > { %v2697_v58 = vsel %vm1527_vm0, %v2679_v25, 0.0  ;;  %v5105_v25 = vld [vmem:[#allocation19_spill] sm:$0xff] }
 0x426   : > { %v2694_v32 = vsel %vm1527_vm0, %v2678_v5, 0.0  ;;  %2698 = vadd.xlane.f32.xlu1 %v2697_v58  ;;  %v2639_v45 = vpop.permute.xlu0 %2638  ;;  %v2791_v34 = vsel %vm1527_vm0, %v2775_v53, 0.0  ;;  %v2776_v5 = vmul.f32 %v5105_v25, %v4805_v39  ;;  %v5106_v58 = vld [vmem:[#allocation26_spill] sm:$0xff] }
 0x427   : > { %v2635_v40 = vpop.permute.xlu1 %2634  ;;  %2695 = vadd.xlane.f32.xlu0 %v2694_v32  ;;  %v2682_v22 = vmul.f32 %v2639_v45, %v4553_v10  ;;  %v2779_v42 = vmul.f32 %v2639_v45, %v5104_v7 }
 0x428   : > { %v2680_v29 = vmul.f32 %v2635_v40, %v4542_v3  ;;  %v2777_v56 = vmul.f32 %v2635_v40, %v5103_v0 }
 0x429   : > { %v2706_v37 = vsel %vm1527_vm0, %v2682_v22, 0.0  ;;  %v2803_v40 = vsel %vm1527_vm0, %v2779_v42, 0.0  ;;  %v5107_v22 = vld [vmem:[#allocation21_spill] sm:$0xff] }
 0x42a   : > { %v2700_v59 = vsel %vm1527_vm0, %v2680_v29, 0.0  ;;  %2707 = vadd.xlane.f32.xlu1 %v2706_v37  ;;  %v2643_v38 = vpop.permute.xlu0 %2642  ;;  %v2797_v2 = vsel %vm1527_vm0, %v2777_v56, 0.0  ;;  %v2794_v37 = vsel %vm1527_vm0, %v2776_v5, 0.0 }
 0x42b   : > { %2701 = vadd.xlane.f32.xlu0 %v2700_v59  ;;  %v2637_v47 = vpop.permute.xlu1 %2636  ;;  %v2684_v24 = vmul.f32 %v2643_v38, %v4563_v4  ;;  %v2781_v32 = vmul.f32 %v2643_v38, %v5106_v58 }
 0x42c   : > { %v2681_v11 = vmul.f32 %v4536_v63, %v2637_v47  ;;  %v2778_v29 = vmul.f32 %v5107_v22, %v2637_v47 }
 0x42d   : > { %v2712_v60 = vsel %vm1527_vm0, %v2684_v24, 0.0  ;;  %v2809_v59 = vsel %vm1527_vm0, %v2781_v32, 0.0  ;;  %v5109_v24 = vld [vmem:[#allocation23_spill] sm:$0xff] }
 0x42e   : > { %v2703_v1 = vsel %vm1527_vm0, %v2681_v11, 0.0  ;;  %2713 = vadd.xlane.f32.xlu1 %v2712_v60  ;;  %v2647_v10 = vpop.permute.xlu0 %2646  ;;  %v2800_v11 = vsel %vm1527_vm0, %v2778_v29, 0.0 }
 0x42f   : > { %2704 = vadd.xlane.f32.xlu0 %v2703_v1  ;;  %v2641_v3 = vpop.permute.xlu1 %2640  ;;  %v2686_v54 = vmul.f32 %v2647_v10, %v4570_v17  ;;  %v5110_v1 = vld [vmem:[#allocation25_spill] sm:$0xff] }
 0x430   : > { %v2683_v35 = vmul.f32 %v5100_v20, %v2641_v3  ;;  %v2780_v39 = vmul.f32 %v5109_v24, %v2641_v3 }
 0x431   : > { %v2718_v21 = vsel %vm1527_vm0, %v2686_v54, 0.0 }
 0x432   : > { %v2709_v13 = vsel %vm1527_vm0, %v2683_v35, 0.0  ;;  %2719 = vadd.xlane.f32.xlu1 %v2718_v21  ;;  %v2651_v4 = vpop.permute.xlu0 %2650  ;;  %v2806_v54 = vsel %vm1527_vm0, %v2780_v39, 0.0  ;;  %v5111_v35 = vld [vmem:[#allocation27_spill] sm:$0xff] }
 0x433   : > { %2710 = vadd.xlane.f32.xlu0 %v2709_v13  ;;  %v2645_v63 = vpop.permute.xlu1 %2644  ;;  %v2688_v43 = vmul.f32 %v2651_v4, %v4574_v18  ;;  %v2785_v38 = vmul.f32 %v2651_v4, %v4484_v31 }
 0x434   : > { %v2685_v61 = vmul.f32 %v5101_v30, %v2645_v63  ;;  %v2782_v47 = vmul.f32 %v5110_v1, %v2645_v63 }
 0x435   : > { %v2724_v57 = vsel %vm1527_vm0, %v2688_v43, 0.0  ;;  %v2821_v20 = vsel %vm1527_vm0, %v2785_v38, 0.0  ;;  %v5112_v43 = vld [vmem:[#allocation29_spill] sm:$0xff] }
 0x436   : > { %v2715_v6 = vsel %vm1527_vm0, %v2685_v61, 0.0  ;;  %2725 = vadd.xlane.f32.xlu1 %v2724_v57  ;;  %v2655_v17 = vpop.permute.xlu0 %2654  ;;  %v2812_v21 = vsel %vm1527_vm0, %v2782_v47, 0.0 }
 0x437   : > { %2716 = vadd.xlane.f32.xlu0 %v2715_v6  ;;  %v2649_v55 = vpop.permute.xlu1 %2648  ;;  %v2690_v14 = vmul.f32 %v2655_v17, %v4578_v23 }
 0x438   : > { %v2687_v28 = vmul.f32 %v4568_v15, %v2649_v55  ;;  %v2784_v3 = vmul.f32 %v5111_v35, %v2649_v55 }
 0x439   : > { %v2730_v33 = vsel %vm1527_vm0, %v2690_v14, 0.0 }
 0x43a   : > { %v2721_v44 = vsel %vm1527_vm0, %v2687_v28, 0.0  ;;  %2731 = vadd.xlane.f32.xlu1 %v2730_v33  ;;  %v2659_v18 = vpop.permute.xlu0 %2658  ;;  %v2818_v63 = vsel %vm1527_vm0, %v2784_v3, 0.0 }
 0x43b   : > { %2722 = vadd.xlane.f32.xlu0 %v2721_v44  ;;  %v2653_v46 = vpop.permute.xlu1 %2652  ;;  %v2692_v12 = vmul.f32 %v2659_v18, %v4582_v52  ;;  %v2789_v31 = vmul.f32 %v2659_v18, %v4493_v62 }
 0x43c   : > { %v2689_v50 = vmul.f32 %v4572_v16, %v2653_v46  ;;  %v2786_v4 = vmul.f32 %v4482_v26, %v2653_v46 }
 0x43d   : > { %v2736_v9 = vsel %vm1527_vm0, %v2692_v12, 0.0 }
 0x43e   : > { %v2727_v23 = vsel %vm1527_vm0, %v2689_v50, 0.0  ;;  %2737 = vadd.xlane.f32.xlu1 %v2736_v9  ;;  %v2824_v61 = vsel %vm1527_vm0, %v2786_v4, 0.0 }
 0x43f   : > { %2728 = vadd.xlane.f32.xlu0 %v2727_v23  ;;  %v2657_v15 = vpop.permute.xlu1 %2656 }
 0x440   : > { %v2691_v27 = vmul.f32 %v4576_v19, %v2657_v15  ;;  %v2788_v30 = vmul.f32 %v5112_v43, %v2657_v15 }
 0x442   : > { %v2733_v49 = vsel %vm1527_vm0, %v2691_v27, 0.0  ;;  %2792 = vadd.xlane.f32.xlu1 %v2791_v34  ;;  %v2830_v57 = vsel %vm1527_vm0, %v2788_v30, 0.0 }
 0x443   : > { %2734 = vadd.xlane.f32.xlu0 %v2733_v49  ;;  %v2661_v16 = vpop.permute.xlu1 %2660 }
 0x444   : > { %v2693_v52 = vmul.f32 %v4580_v48, %v2661_v16  ;;  %v5108_v48 = vld [vmem:[#allocation28_spill] sm:$0xff]  ;;  %v2790_v62 = vmul.f32 %v4490_v51, %v2661_v16 }
 0x445   : > { %v2783_v45 = vmul.f32 %v2647_v10, %v5108_v48  ;;  %v2787_v10 = vmul.f32 %v2655_v17, %v4488_v41  ;;  %v2833_v41 = vsel %vm1527_vm0, %v2789_v31, 0.0 }
 0x446   : > { %v2739_v19 = vsel %vm1527_vm0, %v2693_v52, 0.0  ;;  %2798 = vadd.xlane.f32.xlu1 %v2797_v2  ;;  %v2836_v26 = vsel %vm1527_vm0, %v2790_v62, 0.0 }
 0x447   : > { %2740 = vadd.xlane.f32.xlu0 %v2739_v19  ;;  %v2815_v60 = vsel %vm1527_vm0, %v2783_v45, 0.0  ;;  %v2827_v13 = vsel %vm1527_vm0, %v2787_v10, 0.0 }
 0x44a   : > { %2804 = vadd.xlane.f32.xlu1 %v2803_v40 }
 0x44b   : > { %2795 = vadd.xlane.f32.xlu0 %v2794_v37 }
 0x44e   : > { %2810 = vadd.xlane.f32.xlu1 %v2809_v59 }
 0x44f   : > { %2801 = vadd.xlane.f32.xlu0 %v2800_v11 }
 0x452   : > { %2816 = vadd.xlane.f32.xlu1 %v2815_v60 }
 0x453   : > { %2807 = vadd.xlane.f32.xlu0 %v2806_v54 }
 0x456   : > { %2822 = vadd.xlane.f32.xlu1 %v2821_v20 }
 0x457   : > { %2813 = vadd.xlane.f32.xlu0 %v2812_v21 }
 0x45a   : > { %2828 = vadd.xlane.f32.xlu1 %v2827_v13 }
 0x45b   : > { %2819 = vadd.xlane.f32.xlu0 %v2818_v63 }
 0x45e   : > { %2834 = vadd.xlane.f32.xlu1 %v2833_v41 }
 0x45f   : > { %2825 = vadd.xlane.f32.xlu0 %v2824_v61 }
 0x463   : > { %2831 = vadd.xlane.f32.xlu0 %v2830_v57 }
 0x467   : > { %2837 = vadd.xlane.f32.xlu0 %v2836_v26 }
 0x4b3   : > { %v2699_v6 = vpop.xlane.xlu1 %2698 }
 0x4b4   : > { %v2743_v17 = vadd.f32 %v2699_v6, %v4687_v8  ;;  %v2696_v55 = vpop.xlane.xlu0 %2695 }
 0x4b5   : > { %v2742_v14 = vadd.f32 %v2696_v55, %v4687_v8 }
 0x4b6   : > { %2760 = vst.msk [vmem:[%s4071_s21 + $0x8] sm:$0xff] %vm2758_vm3, %v2743_v17 }
 0x4b7   : > { %2759 = vst.msk [vmem:[%s4071_s21] sm:$0xff] %vm2758_vm3, %v2742_v14  ;;  %v2708_v51 = vpop.xlane.xlu1 %2707 }
 0x4b8   : > { %v2746_v28 = vadd.f32 %v2708_v51, %v4687_v8  ;;  %v2702_v33 = vpop.xlane.xlu0 %2701 }
 0x4b9   : > { %v2744_v44 = vadd.f32 %v2702_v33, %v4687_v8 }
 0x4ba   : > { %2763 = vst.msk [vmem:[%s4071_s21 + $0x20] sm:$0xff] %vm2758_vm3, %v2746_v28 }
 0x4bb   : > { %2761 = vst.msk [vmem:[%s4071_s21 + $0x10] sm:$0xff] %vm2758_vm3, %v2744_v44  ;;  %v2714_v18 = vpop.xlane.xlu1 %2713 }
 0x4bc   : > { %v2748_v46 = vadd.f32 %v2714_v18, %v4687_v8  ;;  %v2705_v12 = vpop.xlane.xlu0 %2704 }
 0x4bd   : > { %v2745_v50 = vadd.f32 %v2705_v12, %v4687_v8 }
 0x4be   : > { %2765 = vst.msk [vmem:[%s4071_s21 + $0x30] sm:$0xff] %vm2758_vm3, %v2748_v46 }
 0x4bf   : > { %2762 = vst.msk [vmem:[%s4071_s21 + $0x18] sm:$0xff] %vm2758_vm3, %v2745_v50  ;;  %v2720_v36 = vpop.xlane.xlu1 %2719 }
 0x4c0   : > { %v2750_v53 = vadd.f32 %v2720_v36, %v4687_v8  ;;  %v2711_v9 = vpop.xlane.xlu0 %2710 }
 0x4c1   : > { %v2747_v23 = vadd.f32 %v2711_v9, %v4687_v8 }
 0x4c2   : > { %2767 = vst.msk [vmem:[%s4071_s21 + $0x40] sm:$0xff] %vm2758_vm3, %v2750_v53 }
 0x4c3   : > { %2764 = vst.msk [vmem:[%s4071_s21 + $0x28] sm:$0xff] %vm2758_vm3, %v2747_v23  ;;  %v2726_v15 = vpop.xlane.xlu1 %2725 }
 0x4c4   : > { %v2752_v27 = vadd.f32 %v2726_v15, %v4687_v8  ;;  %v2717_v0 = vpop.xlane.xlu0 %2716 }
 0x4c5   : > { %v2749_v56 = vadd.f32 %v2717_v0, %v4687_v8 }
 0x4c6   : > { %2769 = vst.msk [vmem:[%s4071_s21 + $0x50] sm:$0xff] %vm2758_vm3, %v2752_v27 }
 0x4c7   : > { %2766 = vst.msk [vmem:[%s4071_s21 + $0x38] sm:$0xff] %vm2758_vm3, %v2749_v56  ;;  %v2732_v34 = vpop.xlane.xlu1 %2731 }
 0x4c8   : > { %v2754_v49 = vadd.f32 %v2732_v34, %v4687_v8  ;;  %v2723_v16 = vpop.xlane.xlu0 %2722 }
 0x4c9   : > { %v2751_v52 = vadd.f32 %v2723_v16, %v4687_v8 }
 0x4ca   : > { %2771 = vst.msk [vmem:[%s4071_s21 + $0x60] sm:$0xff] %vm2758_vm3, %v2754_v49 }
 0x4cb   : > { %2768 = vst.msk [vmem:[%s4071_s21 + $0x48] sm:$0xff] %vm2758_vm3, %v2751_v52  ;;  %v2738_v7 = vpop.xlane.xlu1 %2737 }
 0x4cc   : > { %v2756_v42 = vadd.f32 %v2738_v7, %v4687_v8  ;;  %v2729_v2 = vpop.xlane.xlu0 %2728 }
 0x4cd   : > { %v2753_v25 = vadd.f32 %v2729_v2, %v4687_v8 }
 0x4ce   : > { %2773 = vst.msk [vmem:[%s4071_s21 + $0x70] sm:$0xff] %vm2758_vm3, %v2756_v42 }
 0x4cf   : > { %2770 = vst.msk [vmem:[%s4071_s21 + $0x58] sm:$0xff] %vm2758_vm3, %v2753_v25  ;;  %v2793_v5 = vpop.xlane.xlu1 %2792 }
 0x4d0   : > { %v2839_v19 = vadd.f32 %v2793_v5, %v4687_v8  ;;  %v2735_v58 = vpop.xlane.xlu0 %2734 }
 0x4d1   : > { %v2755_v32 = vadd.f32 %v2735_v58, %v4687_v8 }
 0x4d2   : > { %2856 = vst.msk [vmem:[%s4071_s21] sm:$0xff] %vm2855_vm4, %v2839_v19 }
 0x4d3   : > { %2772 = vst.msk [vmem:[%s4071_s21 + $0x68] sm:$0xff] %vm2758_vm3, %v2755_v32  ;;  %v2799_v40 = vpop.xlane.xlu1 %2798 }
 0x4d4   : > { %v2841_v22 = vadd.f32 %v2799_v40, %v4687_v8  ;;  %v2741_v29 = vpop.xlane.xlu0 %2740 }
 0x4d5   : > { %v2757_v37 = vadd.f32 %v2741_v29, %v4687_v8 }
 0x4d6   : > { %2858 = vst.msk [vmem:[%s4071_s21 + $0x10] sm:$0xff] %vm2855_vm4, %v2841_v22 }
 0x4d7   : > { %2774 = vst.msk [vmem:[%s4071_s21 + $0x78] sm:$0xff] %vm2758_vm3, %v2757_v37  ;;  %v2805_v48 = vpop.xlane.xlu1 %2804 }
 0x4d8   : > { %v2843_v45 = vadd.f32 %v2805_v48, %v4687_v8  ;;  %v2796_v59 = vpop.xlane.xlu0 %2795 }
 0x4d9   : > { %v2840_v24 = vadd.f32 %v2796_v59, %v4687_v8 }
 0x4da   : > { %2860 = vst.msk [vmem:[%s4071_s21 + $0x20] sm:$0xff] %vm2855_vm4, %v2843_v45 }
 0x4db   : > { %2857 = vst.msk [vmem:[%s4071_s21 + $0x8] sm:$0xff] %vm2855_vm4, %v2840_v24  ;;  %v2811_v39 = vpop.xlane.xlu1 %2810 }
 0x4dc   : > { %v2845_v11 = vadd.f32 %v2811_v39, %v4687_v8  ;;  %v2802_v38 = vpop.xlane.xlu0 %2801 }
 0x4dd   : > { %v2842_v60 = vadd.f32 %v2802_v38, %v4687_v8 }
 0x4de   : > { %2862 = vst.msk [vmem:[%s4071_s21 + $0x30] sm:$0xff] %vm2855_vm4, %v2845_v11 }
 0x4df   : > { %2859 = vst.msk [vmem:[%s4071_s21 + $0x18] sm:$0xff] %vm2855_vm4, %v2842_v60  ;;  %v2817_v1 = vpop.xlane.xlu1 %2816 }
 0x4e0   : > { %v2847_v47 = vadd.f32 %v2817_v1, %v4687_v8  ;;  %v2808_v54 = vpop.xlane.xlu0 %2807 }
 0x4e1   : > { %v2844_v10 = vadd.f32 %v2808_v54, %v4687_v8 }
 0x4e2   : > { %2864 = vst.msk [vmem:[%s4071_s21 + $0x40] sm:$0xff] %vm2855_vm4, %v2847_v47 }
 0x4e3   : > { %2861 = vst.msk [vmem:[%s4071_s21 + $0x28] sm:$0xff] %vm2855_vm4, %v2844_v10  ;;  %v2823_v20 = vpop.xlane.xlu1 %2822 }
 0x4e4   : > { %v2849_v35 = vadd.f32 %v2823_v20, %v4687_v8  ;;  %v2814_v3 = vpop.xlane.xlu0 %2813 }
 0x4e5   : > { %v2846_v21 = vadd.f32 %v2814_v3, %v4687_v8 }
 0x4e6   : > { %2866 = vst.msk [vmem:[%s4071_s21 + $0x50] sm:$0xff] %vm2855_vm4, %v2849_v35 }
 0x4e7   : > { %2863 = vst.msk [vmem:[%s4071_s21 + $0x38] sm:$0xff] %vm2855_vm4, %v2846_v21  ;;  %v2829_v31 = vpop.xlane.xlu1 %2828 }
 0x4e8   : > { %v2851_v13 = vadd.f32 %v2829_v31, %v4687_v8  ;;  %v2820_v4 = vpop.xlane.xlu0 %2819 }
 0x4e9   : > { %v2848_v63 = vadd.f32 %v2820_v4, %v4687_v8 }
 0x4ea   : > { %2868 = vst.msk [vmem:[%s4071_s21 + $0x60] sm:$0xff] %vm2855_vm4, %v2851_v13 }
 0x4eb   : > { %2865 = vst.msk [vmem:[%s4071_s21 + $0x48] sm:$0xff] %vm2855_vm4, %v2848_v63  ;;  %v2835_v41 = vpop.xlane.xlu1 %2834 }
 0x4ec   : > { %v2853_v43 = vadd.f32 %v2835_v41, %v4687_v8  ;;  %v2826_v30 = vpop.xlane.xlu0 %2825 }
 0x4ed   : > { %v2850_v61 = vadd.f32 %v2826_v30, %v4687_v8 }
 0x4ee   : > { %2870 = vst.msk [vmem:[%s4071_s21 + $0x70] sm:$0xff] %vm2855_vm4, %v2853_v43 }
 0x4ef   : > { %2867 = vst.msk [vmem:[%s4071_s21 + $0x58] sm:$0xff] %vm2855_vm4, %v2850_v61 }
 0x4f0   : > { %v2832_v62 = vpop.xlane.xlu0 %2831 }
 0x4f1   : > { %v2852_v57 = vadd.f32 %v2832_v62, %v4687_v8 }
 0x4f3   : > { %2869 = vst.msk [vmem:[%s4071_s21 + $0x68] sm:$0xff] %vm2855_vm4, %v2852_v57 }
 0x4f4   : > { %v2838_v26 = vpop.xlane.xlu0 %2837 }
 0x4f5   : > { %v2854_v6 = vadd.f32 %v2838_v26, %v4687_v8 }
 0x4f7   : > { %2871 = vst.msk [vmem:[%s4071_s21 + $0x78] sm:$0xff] %vm2855_vm4, %v2854_v6 }
 0x4f8 PF: > { %s3181_s0 = sshll.u32 %s3823_s17, 12  ;;  %s2892_s22 = sshll.u32 %s4077_s19, 4  ;;  %s4976_s22 = int_to_ptr.vmem [resolvable:$true] %s2892_s22 }
 0x4f9   : > { %s4973_s18 = scalar_lea.hbm %s5046_s8, %s3181_s0  ;;  %s5113_s24 = sand.u32 1, %s3803_s12  }
 0x4fa   : > { %s4980_s11 = scalar_lea.sflag [#allocation7], %s5113_s24  ;;  %s3725_s21 = scalar_lea.vmem %s4976_s22, 4096 }
 0x4fb   : > { %p3726_p8 = scmp.ne.s32.totalorder %s4976_s22, %s3725_s21  ;;  %s3841_s17 = smov [#allocation6]  }
 0x4fc   : > { %s3729_s23 = sshll.u32 %s3841_s17, 4  ;;  %s3730_s23 = int_to_ptr.vmem [resolvable:$false] %s3729_s23 }
 0x4fd   : > { %p3727_p9 = pnand %p3726_p8, %p3969_p7  ;;  %s3731_s10 = scalar_lea.vmem %s3730_s23, 8192 }
 0x4fe   : > { %p3732_p11 = scmp.lt.s32.totalorder %s4976_s22, %s3730_s23  ;;  %p3733_p13 = scmp.lt.s32.totalorder %s3731_s10, %s3725_s21 }
 0x4ff   : > { %p3728_p10 = pneg %p3727_p9 }
 0x500   : > { %p3734_p0 = por %p3733_p13, %p3732_p11 }
 0x502   : > { %p3735_p1 = pnand %p3734_p0, %p3728_p10 }
 0x504   : > { %3738 = shalt.err (!%p3735_p1)
}
 0x505   : > { %s3739_s19 = scalar_lea.hbm %s4973_s18, 4096  ;;  %s3743_s14 = scalar_lea.hbm %s5046_s8, 8192 }
 0x506   : > { %p3740_p2 = scmp.ne.s32.totalorder %s4973_s18, %s3739_s19  ;;  %p3744_p5 = scmp.lt.u32.totalorder %s4973_s18, %s5046_s8 }
 0x507   : > { %p3745_p6 = scmp.lt.u32.totalorder %s3743_s14, %s3739_s19  ;;  %p3747_p9 = scmp.lt.u32.totalorder %s3739_s19, %s4973_s18 }
 0x508   : > { %p3741_p3 = pnand %p3740_p2, %p3969_p7 }
 0x509   : > { %p3746_p8 = por %p3745_p6, %p3744_p5 }
 0x50a   : > { %p3742_p4 = pneg %p3741_p3 }
 0x50b   : > { %p3748_p10 = por %p3747_p9, %p3746_p8 }
 0x50d   : > { %p3749_p11 = pnand %p3748_p10, %p3742_p4 }
 0x50f   : > { %3752 = shalt.err (!%p3749_p11)
}
 0x510   : > { %s3842_s30 = smov 256   ;;  %s3843_s1 = smov 16  }
 0x511   : > { %3390 = dma.vmem_to_hbm [thread:$0]  (%p3969_p7), %s4976_s22, 4096, %s4973_s18, %s4980_s11, %s3842_s30, %s3842_s30, %s3843_s1  }
 0x512 PF: > { %s5114_s13 = sld [smem:[#allocation9_spill]]  ;;  %p3396_p13 = scmp.ge.s32.totalorder %s3835_s7, 2 }
 0x514   : > { %p3393_p0 = pnand %p3396_p13, %p3977_p12 }
 0x518   : > { %s2911_s0 = sand.u32 1, %s5114_s13  }
 0x519   : > { %s2912_s15 = scalar_lea.sflag [#allocation7], %s2911_s0 }
 0x51a   : > { %3794 = dma.done.wait (!%p3393_p0), %s2912_s15, 4096  }
 0x51b   : > { %3796 = vsyncadd (!%p3393_p0), %s2912_s15, 4294963200  ;;  %s24_s7 = sadd.s32 1, %s3835_s7   ;;  %s5116_s16 = sld [smem:[#allocation10_spill]] }
 0x51c   : > { %p21_p1 = scmp.ge.s32.totalorder %s24_s7, 6   ;;  %s5117_s13 = sld [smem:[#allocation17_spill]] }
 0x51d   : > { %s5118_s14 = sld [smem:[#allocation11_spill]]  ;;  %s5119_s15 = sld [smem:[#allocation18_spill]] }
 0x51e   : > { %s5120_s28 = sld [smem:[#allocation12_spill]]  ;;  %s5121_s17 = sld [smem:[#allocation13_spill]] }
 0x51f   : > { %s5122_s18 = sld [smem:[#allocation14_spill]]  ;;  %s5123_s19 = sld [smem:[#allocation15_spill]] }
 0x520   : > { %s5124_s11 = smov %s3803_s12  ;;  %23 = sbr.rel (!%p21_p1) target bundleno = 10 (0xa), region = 214 }
 0x521   : > { %s5125_s12 = smov %s5116_s16 }
 0x524   : > { %s5126_s16 = smov %s5120_s28 }
 0x527   :  { %2925 = vsyncpa [#allocation7], 1 }
 0x528   :  { %2927 = vsyncpa [#allocation7 + $0x1], 1 }

</bundles_post_ra>
